<compile_context>
chip_gen: v5e
topology: v5e:2x2
jax: 0.10.0
libtpu: 0.0.40
codegen_flags: <defaults>
</compile_context>

<pallas_src>
import functools

import jax
import jax.numpy as jnp
from jax.experimental import pallas as pl
from jax.experimental.pallas import tpu as pltpu


_VMEM_LIMIT_BYTES = 64 * 1024 * 1024
_MASK_NEG = -1e30          # big-negative mask value; exp underflows to exactly 0

# Single-buffer constant-index weight blocks (halves their VMEM residency --
# important on v7x's 64 MiB VMEM at real Swin sizes).  Flipped off at runtime
# if this JAX/Mosaic build rejects pl.Buffered(1).
_SINGLE_BUFFER_WEIGHTS = [True]


# ----------------------------------------------------------------------------
# small helpers
# ----------------------------------------------------------------------------
def _cdiv(a, b):
    return (a + b - 1) // b


def _round_up(n, m):
    return _cdiv(n, m) * m


def _plan_window_tiling(Bw, ws, target_rows=512):
    """Pick (G, GT, Bw_pad).

    G  : windows packed per attention group (target G*ws ~= 128 lanes/rows)
    GT : groups per grid step (target ~target_rows rows per step)
    Bw_pad : padded window count so the grid divides evenly (padding is safe:
             the block-diagonal mask keeps every window self-contained).
    """
    G = max(1, 128 // ws)
    G = min(G, Bw)
    Gws = G * ws
    GT = max(1, target_rows // Gws)
    GT = min(GT, _cdiv(Bw, G))
    WB = GT * G
    Bw_pad = WB * _cdiv(Bw, WB)
    # TODO(synk): on v7x (2 TensorCores) make sure Bw_pad // WB >= 2 at real
    # sizes so the "parallel" grid axis can be sharded across both cores.
    return G, GT, Bw_pad


def _pick_row_tile(N, cap=512):
    """Row tile for the MLP kernel: multiple of 8, <= cap (rows are padded)."""
    return min(cap, _round_up(N, 8))


def _pick_hidden_tile(H, cap=512):
    """Hidden-dim tile: a divisor of H that is a multiple of 128 if possible."""
    if H <= cap:
        return H
    for c in range(cap, 127, -1):
        if H % c == 0 and c % 128 == 0:
            return c
    # TODO(synk): for awkward H (no 128-multiple divisor) pad H instead of
    # keeping the whole hidden dim resident.
    return H


def _pack_rel_bias(rel_bias, ws, G):
    """(nH, ws, ws) -> (nH, G*ws, G*ws) tiled bias + block-diagonal mask.

    Cross-window entries get a large negative value so the packed softmax
    normalizes exactly within each window (their exp underflows to 0.0).
    """
    Gws = G * ws
    tiled = jnp.tile(rel_bias.astype(jnp.float32), (1, G, G))
    win = jnp.arange(Gws) // ws
    same = win[:, None] == win[None, :]
    return jnp.where(same[None], tiled, jnp.float32(_MASK_NEG))


def _erf_poly(x):
    """Abramowitz & Stegun 7.1.26 erf approximation, |error| <= 1.5e-7.

    Uses only exp/div/mul/abs/sign so it lowers on all TPU generations."""
    a1, a2, a3, a4, a5 = (0.254829592, -0.284496736, 1.421413741,
                          -1.453152027, 1.061405429)
    p = 0.3275911
    s = jnp.sign(x)
    z = jnp.abs(x)
    t = 1.0 / (1.0 + p * z)
    poly = ((((a5 * t + a4) * t + a3) * t + a2) * t + a1) * t
    return s * (1.0 - poly * jnp.exp(-z * z))


def _gelu(x, approximate):
    if approximate:
        # tanh approximation: moves most of the cost to the EUP slot.
        c = 0.7978845608028654  # sqrt(2/pi)
        return 0.5 * x * (1.0 + jnp.tanh(c * (x + 0.044715 * x * x * x)))
    # exact (erf) GELU, matching nn.GELU() default.
    return 0.5 * x * (1.0 + _erf_poly(x * 0.7071067811865476))


# ----------------------------------------------------------------------------
# Kernel 1: fused LayerNorm1 + QKV + packed window attention
# ----------------------------------------------------------------------------
def _ln_window_attention_kernel(xw_ref, lnw_ref, lnb_ref, qkvw_ref, qkvb_ref,
                                bias_ref, o_ref, *maybe_a_ref, num_heads,
                                head_dim, hidden_dim, window_size, group, eps,
                                compute_dtype, approx_recip, emit_attention):
    C, hd, ws, G = hidden_dim, head_dim, window_size, group
    Gws = G * ws

    xw = xw_ref[...]                           # (WB, ws, C) raw tokens, f32
    WB = xw.shape[0]
    GT = WB // G
    rows = WB * ws
    x2 = xw.reshape(rows, C)

    # LayerNorm1 in f32 (row-wise, so it commutes with the window-partition
    # row permutation done host-side on the raw tokens).
    mu = jnp.mean(x2, axis=-1, keepdims=True)
    var = jnp.mean(jnp.square(x2 - mu), axis=-1, keepdims=True)
    xn = (x2 - mu) * jax.lax.rsqrt(var + eps)
    xn = xn * lnw_ref[...] + lnb_ref[...]

    # One QKV GEMM for the whole tile: bf16 MXU operands, f32 accumulation.
    # The attention scale is already folded into the Q columns (host-side).
    qkv = jnp.dot(xn.astype(compute_dtype), qkvw_ref[...],
                  preferred_element_type=jnp.float32) + qkvb_ref[...]   # (rows, 3C)

    outs = []
    for h in range(num_heads):                 # static & small; groups batched
        q = qkv[:, h * hd:(h + 1) * hd].reshape(GT, Gws, hd).astype(compute_dtype)
        k = qkv[:, C + h * hd:C + (h + 1) * hd].reshape(GT, Gws, hd).astype(compute_dtype)
        v = qkv[:, 2 * C + h * hd:2 * C + (h + 1) * hd].reshape(GT, Gws, hd).astype(compute_dtype)

        # Packed scores: (GT, Gws, Gws) with Gws ~= 128 -> near-full MXU tiles
        # and lane-dense softmax vregs (vs. per-window 8x8 matmuls).
        s = jnp.einsum("gqd,gkd->gqk", q, k, preferred_element_type=jnp.float32)
        s = s + bias_ref[h]                    # rel-pos bias + block-diag mask
        s = s - jnp.max(s, axis=-1, keepdims=True)
        e = jnp.exp(s)                         # cross-window entries underflow to 0
        denom = jnp.sum(e, axis=-1, keepdims=True)
        if approx_recip:
            p = e * pl.reciprocal(denom, approx=True)   # EUP slot (bf16 fast path)
        else:
            p = e / denom                               # exact (f32 verify path)
        if emit_attention:
            maybe_a_ref[0][:, h, :, :] = p     # lane-dense packed attention
        outs.append(jnp.einsum("gqk,gkd->gqd", p.astype(compute_dtype), v,
                               preferred_element_type=jnp.float32))

    out = jnp.concatenate(outs, axis=-1)       # (GT, Gws, C), head-major like torch
    o_ref[...] = out.reshape(WB, ws, C).astype(o_ref.dtype)


def ln_window_attention_pallas(x_windows, ln_w, ln_b, qkv_w, qkv_b, packed_bias,
                               *, num_heads, group, groups_per_tile,
                               return_attention=False, eps=1e-5):
    Bw_pad, ws, C = x_windows.shape
    nH = num_heads
    hd = C // nH
    G, GT = group, groups_per_tile
    WB = G * GT
    Gws = G * ws
    n_tiles = Bw_pad // WB
    compute_dtype = qkv_w.dtype
    approx_recip = jnp.dtype(compute_dtype) != jnp.dtype(jnp.float32)

    kernel = functools.partial(
        _ln_window_attention_kernel,
        num_heads=nH, head_dim=hd, hidden_dim=C, window_size=ws, group=G,
        eps=eps, compute_dtype=compute_dtype, approx_recip=approx_recip,
        emit_attention=return_attention)

    if return_attention:
        out_shape = (
            jax.ShapeDtypeStruct((Bw_pad, ws, C), x_windows.dtype),
            jax.ShapeDtypeStruct((Bw_pad // G, nH, Gws, Gws), jnp.float32),
        )
        out_specs = (
            pl.BlockSpec((WB, ws, C), lambda i: (i, 0, 0)),
            pl.BlockSpec((GT, nH, Gws, Gws), lambda i: (i, 0, 0, 0)),
        )
    else:
        out_shape = jax.ShapeDtypeStruct((Bw_pad, ws, C), x_windows.dtype)
        out_specs = pl.BlockSpec((WB, ws, C), lambda i: (i, 0, 0))

    def run(qkvw_spec):
        in_specs = [
            pl.BlockSpec((WB, ws, C), lambda i: (i, 0, 0)),
            pl.BlockSpec((1, C), lambda i: (0, 0)),
            pl.BlockSpec((1, C), lambda i: (0, 0)),
            qkvw_spec,
            pl.BlockSpec((1, 3 * C), lambda i: (0, 0)),
            pl.BlockSpec((nH, Gws, Gws), lambda i: (0, 0, 0)),
        ]
        return pl.pallas_call(
            kernel,
            grid=(n_tiles,),
            in_specs=in_specs,
            out_specs=out_specs,
            out_shape=out_shape,
            compiler_params=pltpu.CompilerParams(
                dimension_semantics=("parallel",),
                vmem_limit_bytes=_VMEM_LIMIT_BYTES),
        )(x_windows, ln_w.reshape(1, C), ln_b.reshape(1, C),
          qkv_w, qkv_b.reshape(1, 3 * C), packed_bias)

    # The QKV weight block index never changes -> single-buffer it so it is
    # not double-buffered in VMEM (matters on v7x's 64 MiB VMEM).
    if _SINGLE_BUFFER_WEIGHTS[0]:
        try:
            spec = pl.BlockSpec((C, 3 * C), lambda i: (0, 0),
                                pipeline_mode=pl.Buffered(1))
            return run(spec)
        except Exception:
            _SINGLE_BUFFER_WEIGHTS[0] = False
    return run(pl.BlockSpec((C, 3 * C), lambda i: (0, 0)))


# ----------------------------------------------------------------------------
# Kernel 2: fused residual + LayerNorm2 + MLP + residual
#           (row tiles x hidden-dim reduction grid axis, f32 accumulator)
# ----------------------------------------------------------------------------
def _resid_ln_mlp_kernel(sc_ref, y_ref, lw_ref, lb_ref, w1_ref, b1_ref,
                         w2_ref, b2_ref, o_ref, xn_ref, acc_ref, *,
                         eps, compute_dtype, gelu_approximate):
    th = pl.program_id(1)

    @pl.when(th == 0)
    def _():
        x = sc_ref[...] + y_ref[...]                    # residual add, f32
        mu = jnp.mean(x, axis=-1, keepdims=True)
        var = jnp.mean(jnp.square(x - mu), axis=-1, keepdims=True)
        xn = (x - mu) * jax.lax.rsqrt(var + eps)
        xn = xn * lw_ref[...] + lb_ref[...]
        xn_ref[...] = xn.astype(xn_ref.dtype)           # reused for every TH slab
        acc_ref[...] = jnp.zeros_like(acc_ref)

    # (RT, TH) hidden slab: bf16 MXU operands, f32 accumulation.
    h = jnp.dot(xn_ref[...], w1_ref[...],
                preferred_element_type=jnp.float32) + b1_ref[...]
    h = _gelu(h, gelu_approximate)                      # f32 elementwise
    acc_ref[...] += jnp.dot(h.astype(compute_dtype), w2_ref[...],
                            preferred_element_type=jnp.float32)

    @pl.when(th == pl.num_programs(1) - 1)
    def _():
        x = sc_ref[...] + y_ref[...]
        o_ref[...] = (x + acc_ref[...] + b2_ref[...]).astype(o_ref.dtype)


def resid_ln_mlp_pallas(shortcut, attn_out, ln_w, ln_b, w1, b1, w2, b2, *,
                        eps=1e-5, gelu_approximate=False):
    B, L, C = shortcut.shape
    H = w1.shape[1]
    N = B * L
    compute_dtype = w1.dtype

    RT = _pick_row_tile(N, cap=512)
    N_pad = _round_up(N, RT)
    TH = _pick_hidden_tile(H, cap=512)

    sc2 = shortcut.reshape(N, C)
    y2 = attn_out.reshape(N, C)
    if N_pad != N:
        pad = ((0, N_pad - N), (0, 0))
        sc2 = jnp.pad(sc2, pad)
        y2 = jnp.pad(y2, pad)

    kernel = functools.partial(_resid_ln_mlp_kernel, eps=eps,
                               compute_dtype=compute_dtype,
                               gelu_approximate=gelu_approximate)

    out = pl.pallas_call(
        kernel,
        grid=(N_pad // RT, H // TH),
        in_specs=[
            pl.BlockSpec((RT, C), lambda i, t: (i, 0)),
            pl.BlockSpec((RT, C), lambda i, t: (i, 0)),
            pl.BlockSpec((1, C), lambda i, t: (0, 0)),
            pl.BlockSpec((1, C), lambda i, t: (0, 0)),
            pl.BlockSpec((C, TH), lambda i, t: (0, t)),
            pl.BlockSpec((1, TH), lambda i, t: (0, t)),
            pl.BlockSpec((TH, C), lambda i, t: (t, 0)),
            pl.BlockSpec((1, C), lambda i, t: (0, 0)),
        ],
        out_specs=pl.BlockSpec((RT, C), lambda i, t: (i, 0)),
        out_shape=jax.ShapeDtypeStruct((N_pad, C), shortcut.dtype),
        scratch_shapes=[pltpu.VMEM((RT, C), compute_dtype),
                        pltpu.VMEM((RT, C), jnp.float32)],
        compiler_params=pltpu.CompilerParams(
            dimension_semantics=("parallel", "arbitrary"),
            vmem_limit_bytes=_VMEM_LIMIT_BYTES),
    )(sc2, y2, ln_w.reshape(1, C), ln_b.reshape(1, C),
      w1, b1.reshape(1, H), w2, b2.reshape(1, C))
    return out[:N].reshape(B, L, C)


# ----------------------------------------------------------------------------
# JAX glue mirroring the PyTorch code exactly
# ----------------------------------------------------------------------------
def window_partition(x, window_size):
    B, L, C = x.shape
    x = x.reshape(B, L // window_size, window_size, C)
    x = jnp.transpose(x, (0, 2, 1, 3))
    return x.reshape(-1, window_size, C)


def window_reverse(windows, window_size, L):
    B = windows.shape[0] // (L // window_size)
    return windows.reshape(B, L, -1)


def prepare_params(params, *, num_heads, compute_dtype=jnp.bfloat16):
    """One-time parameter prep (NOT per forward): fold the attention scale into
    the Q columns of the QKV projection (exact) and cast the big weight
    matrices to the MXU compute dtype.  Biases / LN params stay f32 (they are
    only added to f32 accumulators)."""
    C = params["qkv_w"].shape[0]
    scale = (C // num_heads) ** (-0.5)
    qkv_w = params["qkv_w"].at[:, :C].multiply(scale)
    qkv_b = params["qkv_b"].at[:C].multiply(scale)
    cdt = jnp.dtype(compute_dtype)
    return {
        "ln1_w": params["ln1_w"], "ln1_b": params["ln1_b"],
        "ln2_w": params["ln2_w"], "ln2_b": params["ln2_b"],
        "qkv_w": qkv_w.astype(cdt), "qkv_b": qkv_b,
        "rel_bias": params["rel_bias"],
        "fc1_w": params["fc1_w"].astype(cdt), "fc1_b": params["fc1_b"],
        "fc2_w": params["fc2_w"].astype(cdt), "fc2_b": params["fc2_b"],
    }


def _extract_window_attention(packed_attn, Bw, num_heads, ws, G):
    """(NG, nH, G*ws, G*ws) packed attention -> (Bw, nH, ws, ws) diag blocks."""
    NG = packed_attn.shape[0]
    a = packed_attn.reshape(NG, num_heads, G, ws, G, ws)
    idx = jnp.arange(G)
    a = a[:, :, idx, :, idx, :]            # (G, NG, nH, ws, ws)
    a = jnp.moveaxis(a, 0, 1)              # (NG, G, nH, ws, ws)
    return a.reshape(NG * G, num_heads, ws, ws)[:Bw]


def swin_block_forward(x, prepared, *, num_heads, window_size,
                       return_attention=False):
    """SwinTransformerBlock.forward using the Pallas kernels above."""
    B, L, C = x.shape
    ws = window_size
    shortcut = x

    # Partition the RAW tokens: LayerNorm1 is row-wise so it commutes with the
    # window-partition row permutation and is fused into kernel 1.
    x_windows = window_partition(x, ws)                 # (Bw, ws, C)
    Bw = x_windows.shape[0]

    G, GT, Bw_pad = _plan_window_tiling(Bw, ws)
    if Bw_pad != Bw:
        x_windows = jnp.pad(x_windows, ((0, Bw_pad - Bw), (0, 0), (0, 0)))
    packed_bias = _pack_rel_bias(prepared["rel_bias"], ws, G)

    res = ln_window_attention_pallas(
        x_windows, prepared["ln1_w"], prepared["ln1_b"],
        prepared["qkv_w"], prepared["qkv_b"], packed_bias,
        num_heads=num_heads, group=G, groups_per_tile=GT,
        return_attention=return_attention)
    if return_attention:
        attn_windows, packed_attn = res
    else:
        attn_windows, packed_attn = res, None
    attn_windows = attn_windows[:Bw]

    # window_reverse is a pure reshape (exactly as in the PyTorch code).
    attn_out = window_reverse(attn_windows, ws, L)

    # Fused residual + LN2 + MLP + residual.
    out = resid_ln_mlp_pallas(
        shortcut, attn_out, prepared["ln2_w"], prepared["ln2_b"],
        prepared["fc1_w"], prepared["fc1_b"],
        prepared["fc2_w"], prepared["fc2_b"])

    if return_attention:
        attn = _extract_window_attention(packed_attn, Bw, num_heads, ws, G)
        return out, attn
    return out


# ----------------------------------------------------------------------------
# Pure-JAX reference (mirrors the PyTorch forward exactly) for verification
# ----------------------------------------------------------------------------
def reference_forward(x, params, *, num_heads, window_size):
    eps = 1e-5
    B, L, C = x.shape
    hd = C // num_heads
    scale = hd ** (-0.5)

    def ln(t, w, b):
        mu = t.mean(-1, keepdims=True)
        var = ((t - mu) ** 2).mean(-1, keepdims=True)
        return (t - mu) / jnp.sqrt(var + eps) * w + b

    shortcut = x
    xn = ln(x, params["ln1_w"], params["ln1_b"])
    xw = window_partition(xn, window_size)
    Bw, ws, _ = xw.shape
    qkv = xw @ params["qkv_w"] + params["qkv_b"]
    qkv = qkv.reshape(Bw, ws, 3, num_heads, hd).transpose(2, 0, 3, 1, 4)
    q, k, v = qkv[0] * scale, qkv[1], qkv[2]
    attn = jnp.einsum("bhld,bhmd->bhlm", q, k) + params["rel_bias"][None]
    attn = jax.nn.softmax(attn, axis=-1)
    out = jnp.einsum("bhlm,bhmd->bhld", attn, v)
    out = out.transpose(0, 2, 1, 3).reshape(Bw, ws, C)
    x1 = shortcut + window_reverse(out, window_size, L)
    xn2 = ln(x1, params["ln2_w"], params["ln2_b"])
    h = jax.nn.gelu(xn2 @ params["fc1_w"] + params["fc1_b"], approximate=False)
    return x1 + (h @ params["fc2_w"] + params["fc2_b"]), attn


# ----------------------------------------------------------------------------
# Deterministic parameter construction + run
# ----------------------------------------------------------------------------
def make_params(key, hidden_dim, num_heads, window_size, mlp_ratio):
    C = hidden_dim
    H = int(C * mlp_ratio)
    ks = jax.random.split(key, 8)
    params = {
        "ln1_w": jnp.ones((C,), jnp.float32),
        "ln1_b": jnp.zeros((C,), jnp.float32),
        "ln2_w": jnp.ones((C,), jnp.float32),
        "ln2_b": jnp.zeros((C,), jnp.float32),
        # linears stored as (in, out): y = x @ W + b
        "qkv_w": 0.05 * jax.random.normal(ks[0], (C, 3 * C), jnp.float32),
        "qkv_b": 0.05 * jax.random.normal(ks[1], (3 * C,), jnp.float32),
        "fc1_w": 0.05 * jax.random.normal(ks[2], (C, H), jnp.float32),
        "fc1_b": 0.05 * jax.random.normal(ks[3], (H,), jnp.float32),
        "fc2_w": 0.05 * jax.random.normal(ks[4], (H, C), jnp.float32),
        "fc2_b": 0.05 * jax.random.normal(ks[5], (C,), jnp.float32),
    }
    # relative position bias: table (2*ws-1, num_heads), trunc_normal(std=0.02)
    table = 0.02 * jax.random.normal(ks[6], (2 * window_size - 1, num_heads),
                                     jnp.float32)
    coords = jnp.arange(window_size)
    rel_idx = coords[:, None] - coords[None, :] + (window_size - 1)  # (ws, ws)
    rel_bias = table[rel_idx.reshape(-1)].reshape(window_size, window_size,
                                                  num_heads)
    params["rel_bias"] = jnp.transpose(rel_bias, (2, 0, 1))          # (nH, ws, ws)
    return params


if __name__ == "__main__":
    # Small shapes consistent with the module's forward: x is (B, L, C).
    B, L, C = 2, 16, 32
    num_heads = 4
    window_size = 8            # must divide L
    mlp_ratio = 4.0

    key = jax.random.PRNGKey(0)
    kx, kp = jax.random.split(key)
    x = jax.random.normal(kx, (B, L, C), jnp.float32)
    params = make_params(kp, C, num_heads, window_size, mlp_ratio)

    ref_out, ref_attn = reference_forward(x, params, num_heads=num_heads,
                                          window_size=window_size)

    # 1) f32 compute path with return_attention=True: tight check of the fused
    #    kernels (including the packed / block-diagonal-masked attention math).
    prep_f32 = prepare_params(params, num_heads=num_heads,
                              compute_dtype=jnp.float32)
    out_f32, attn_f32 = swin_block_forward(
        x, prep_f32, num_heads=num_heads, window_size=window_size,
        return_attention=True)
    out_f32, attn_f32 = jax.block_until_ready((out_f32, attn_f32))
    assert out_f32.shape == (B, L, C)
    assert attn_f32.shape == (B * (L // window_size), num_heads,
                              window_size, window_size)
    assert jnp.allclose(out_f32, ref_out, rtol=1e-4, atol=1e-4), \
        "f32 output mismatch"
    assert jnp.allclose(attn_f32, ref_attn, rtol=1e-4, atol=1e-4), \
        "f32 attention mismatch"

    # 2) bf16 fast path (MXU-native operands, f32 accumulation), default
    #    forward (return_attention=False, as in the PyTorch module).  Looser
    #    tolerance because bf16 operand rounding is ~2^-9 relative.
    prep_bf16 = prepare_params(params, num_heads=num_heads,
                               compute_dtype=jnp.bfloat16)
    out_fast = swin_block_forward(x, prep_bf16, num_heads=num_heads,
                                  window_size=window_size)
    out_fast = jax.block_until_ready(out_fast)
    assert out_fast.shape == (B, L, C)
    assert jnp.allclose(out_fast, ref_out, rtol=2e-2, atol=2e-2), \
        "bf16 output mismatch"

    # TODO(synk): dropout / DropPath are identities (p=0); self.proj /
    # self.proj_drop results are discarded by the PyTorch code so they are
    # skipped.  gelu_approximate=True (tanh, EUP slot) is available for
    # perf experiments but kept off to match nn.GELU() exactly.
    print("KERNEL_OK")
</pallas_src>

<mosaic_0001>
module attributes {stable_mosaic.version = 11 : i64} {
  func.func @_ln_window_attention_kernel(%arg0: i32, %arg1: memref<4x8x32xf32, #tpu.memory_space<vmem>>, %arg2: memref<1x32xf32, #tpu.memory_space<vmem>>, %arg3: memref<1x32xf32, #tpu.memory_space<vmem>>, %arg4: memref<32x96xf32, #tpu.memory_space<vmem>>, %arg5: memref<1x96xf32, #tpu.memory_space<vmem>>, %arg6: memref<4x32x32xf32, #tpu.memory_space<vmem>>, %arg7: memref<4x8x32xf32, #tpu.memory_space<vmem>>, %arg8: memref<1x4x32x32xf32, #tpu.memory_space<vmem>>) attributes {dimension_semantics = [#tpu.dimension_semantics<parallel>], iteration_bounds = array<i64: 1>, scalar_prefetch = 0 : i64, scratch_operands = 0 : i64, tpu.core_type = #tpu.core_type<tc>, window_params = [{transform_indices = @transform_0, window_bounds = array<i64: 4, 8, 32>}, {pipeline_mode = #tpu.pipeline_mode<synchronous>, transform_indices = @transform_1, window_bounds = array<i64: 1, 32>}, {pipeline_mode = #tpu.pipeline_mode<synchronous>, transform_indices = @transform_2, window_bounds = array<i64: 1, 32>}, {pipeline_mode = #tpu.pipeline_mode<synchronous>, transform_indices = @transform_3, window_bounds = array<i64: 32, 96>}, {pipeline_mode = #tpu.pipeline_mode<synchronous>, transform_indices = @transform_4, window_bounds = array<i64: 1, 96>}, {pipeline_mode = #tpu.pipeline_mode<synchronous>, transform_indices = @transform_5, window_bounds = array<i64: 4, 32, 32>}, {transform_indices = @transform_6, window_bounds = array<i64: 4, 8, 32>}, {transform_indices = @transform_7, window_bounds = array<i64: 1, 4, 32, 32>}]} {
    %c0 = arith.constant 0 : index
    %c0_0 = arith.constant 0 : index
    %c0_1 = arith.constant 0 : index
    %0 = vector.load %arg1[%c0, %c0_0, %c0_1] : memref<4x8x32xf32, #tpu.memory_space<vmem>>, vector<4x8x32xf32>
    %1 = vector.shape_cast %0 : vector<4x8x32xf32> to vector<32x32xf32>
    %cst = arith.constant dense<0.000000e+00> : vector<32xf32>
    %2 = vector.multi_reduction <add>, %1, %cst [1] : vector<32x32xf32> to vector<32xf32>
    %3 = vector.shape_cast %2 : vector<32xf32> to vector<32x1xf32>
    %cst_2 = arith.constant 3.200000e+01 : f32
    %4 = vector.broadcast %cst_2 : f32 to vector<32x1xf32>
    %5 = arith.divf %3, %4 : vector<32x1xf32>
    %6 = vector.broadcast %5 : vector<32x1xf32> to vector<32x32xf32>
    %7 = arith.subf %1, %6 : vector<32x32xf32>
    %8 = arith.mulf %7, %7 : vector<32x32xf32>
    %cst_3 = arith.constant dense<0.000000e+00> : vector<32xf32>
    %9 = vector.multi_reduction <add>, %8, %cst_3 [1] : vector<32x32xf32> to vector<32xf32>
    %10 = vector.shape_cast %9 : vector<32xf32> to vector<32x1xf32>
    %cst_4 = arith.constant 3.200000e+01 : f32
    %11 = vector.broadcast %cst_4 : f32 to vector<32x1xf32>
    %12 = arith.divf %10, %11 : vector<32x1xf32>
    %13 = vector.broadcast %5 : vector<32x1xf32> to vector<32x32xf32>
    %14 = arith.subf %1, %13 : vector<32x32xf32>
    %cst_5 = arith.constant 9.99999974E-6 : f32
    %15 = vector.broadcast %cst_5 : f32 to vector<32x1xf32>
    %16 = arith.addf %12, %15 : vector<32x1xf32>
    %17 = math.rsqrt %16 : vector<32x1xf32>
    %18 = vector.broadcast %17 : vector<32x1xf32> to vector<32x32xf32>
    %19 = arith.mulf %14, %18 : vector<32x32xf32>
    %c0_6 = arith.constant 0 : index
    %c0_7 = arith.constant 0 : index
    %20 = vector.load %arg2[%c0_6, %c0_7] : memref<1x32xf32, #tpu.memory_space<vmem>>, vector<1x32xf32>
    %21 = vector.broadcast %20 : vector<1x32xf32> to vector<32x32xf32>
    %22 = arith.mulf %19, %21 : vector<32x32xf32>
    %c0_8 = arith.constant 0 : index
    %c0_9 = arith.constant 0 : index
    %23 = vector.load %arg3[%c0_8, %c0_9] : memref<1x32xf32, #tpu.memory_space<vmem>>, vector<1x32xf32>
    %24 = vector.broadcast %23 : vector<1x32xf32> to vector<32x32xf32>
    %25 = arith.addf %22, %24 : vector<32x32xf32>
    %c0_10 = arith.constant 0 : index
    %c0_11 = arith.constant 0 : index
    %26 = vector.load %arg4[%c0_10, %c0_11] : memref<32x96xf32, #tpu.memory_space<vmem>>, vector<32x96xf32>
    %cst_12 = arith.constant dense<0.000000e+00> : vector<32x96xf32>
    %27 = tpu.matmul %25, %26, %cst_12 {dimension_numbers = #tpu.dot_dimension_numbers<[1], [0], [0], [1], [0, 0, 1, 1], [], []>} : vector<32x32xf32>, vector<32x96xf32>, vector<32x96xf32> -> vector<32x96xf32>
    %c0_13 = arith.constant 0 : index
    %c0_14 = arith.constant 0 : index
    %28 = vector.load %arg5[%c0_13, %c0_14] : memref<1x96xf32, #tpu.memory_space<vmem>>, vector<1x96xf32>
    %29 = vector.broadcast %28 : vector<1x96xf32> to vector<32x96xf32>
    %30 = arith.addf %27, %29 : vector<32x96xf32>
    %31 = vector.extract_strided_slice %30 {offsets = [0, 0], sizes = [32, 8], strides = [1, 1]} : vector<32x96xf32> to vector<32x8xf32>
    %32 = vector.shape_cast %31 : vector<32x8xf32> to vector<1x32x8xf32>
    %33 = vector.extract_strided_slice %30 {offsets = [0, 32], sizes = [32, 8], strides = [1, 1]} : vector<32x96xf32> to vector<32x8xf32>
    %34 = vector.shape_cast %33 : vector<32x8xf32> to vector<1x32x8xf32>
    %35 = vector.extract_strided_slice %30 {offsets = [0, 64], sizes = [32, 8], strides = [1, 1]} : vector<32x96xf32> to vector<32x8xf32>
    %36 = vector.shape_cast %35 : vector<32x8xf32> to vector<1x32x8xf32>
    "tpu.trace_start"() <{level = 10 : i32, message = "gqd,gkd->gqk"}> : () -> ()
    %cst_15 = arith.constant dense<0.000000e+00> : vector<1x32x32xf32>
    %37 = tpu.matmul %32, %34, %cst_15 {dimension_numbers = #tpu.dot_dimension_numbers<[2], [2], [1], [1], [0, 0, 0, 1, 1, 1], [0], [0]>} : vector<1x32x8xf32>, vector<1x32x8xf32>, vector<1x32x32xf32> -> vector<1x32x32xf32>
    "tpu.trace_stop"() : () -> ()
    %c0_16 = arith.constant 0 : index
    %c0_17 = arith.constant 0 : index
    %c0_18 = arith.constant 0 : index
    %38 = vector.load %arg6[%c0_16, %c0_17, %c0_18] : memref<4x32x32xf32, #tpu.memory_space<vmem>>, vector<1x32x32xf32>
    %39 = vector.shape_cast %38 : vector<1x32x32xf32> to vector<32x32xf32>
    %40 = vector.shape_cast %39 : vector<32x32xf32> to vector<1x32x32xf32>
    %41 = arith.addf %37, %40 : vector<1x32x32xf32>
    %cst_19 = arith.constant dense<0xFF800000> : vector<1x32xf32>
    %42 = vector.multi_reduction <maximumf>, %41, %cst_19 [2] : vector<1x32x32xf32> to vector<1x32xf32>
    %43 = vector.shape_cast %42 : vector<1x32xf32> to vector<1x32x1xf32>
    %44 = vector.broadcast %43 : vector<1x32x1xf32> to vector<1x32x32xf32>
    %45 = arith.subf %41, %44 : vector<1x32x32xf32>
    %46 = math.exp %45 : vector<1x32x32xf32>
    %cst_20 = arith.constant dense<0.000000e+00> : vector<1x32xf32>
    %47 = vector.multi_reduction <add>, %46, %cst_20 [2] : vector<1x32x32xf32> to vector<1x32xf32>
    %48 = vector.shape_cast %47 : vector<1x32xf32> to vector<1x32x1xf32>
    %49 = vector.broadcast %48 : vector<1x32x1xf32> to vector<1x32x32xf32>
    %50 = arith.divf %46, %49 : vector<1x32x32xf32>
    %c0_21 = arith.constant 0 : index
    %c0_22 = arith.constant 0 : index
    %c0_23 = arith.constant 0 : index
    %c0_24 = arith.constant 0 : index
    %51 = vector.load %arg8[%c0_21, %c0_22, %c0_23, %c0_24] : memref<1x4x32x32xf32, #tpu.memory_space<vmem>>, vector<1x1x32x32xf32>
    %52 = vector.shape_cast %51 : vector<1x1x32x32xf32> to vector<1x32x32xf32>
    %53 = vector.shape_cast %50 : vector<1x32x32xf32> to vector<1x1x32x32xf32>
    tpu.vector_store %arg8[%c0_21, %c0_22, %c0_23, %c0_24], %53 {strides = array<i32>} : memref<1x4x32x32xf32, #tpu.memory_space<vmem>>, vector<1x1x32x32xf32>,
    "tpu.trace_start"() <{level = 10 : i32, message = "gqk,gkd->gqd"}> : () -> ()
    %cst_25 = arith.constant dense<0.000000e+00> : vector<1x32x8xf32>
    %54 = tpu.matmul %50, %36, %cst_25 {dimension_numbers = #tpu.dot_dimension_numbers<[2], [1], [1], [2], [0, 0, 0, 1, 1, 2], [0], [0]>} : vector<1x32x32xf32>, vector<1x32x8xf32>, vector<1x32x8xf32> -> vector<1x32x8xf32>
    "tpu.trace_stop"() : () -> ()
    %55 = vector.extract_strided_slice %30 {offsets = [0, 8], sizes = [32, 8], strides = [1, 1]} : vector<32x96xf32> to vector<32x8xf32>
    %56 = vector.shape_cast %55 : vector<32x8xf32> to vector<1x32x8xf32>
    %57 = vector.extract_strided_slice %30 {offsets = [0, 40], sizes = [32, 8], strides = [1, 1]} : vector<32x96xf32> to vector<32x8xf32>
    %58 = vector.shape_cast %57 : vector<32x8xf32> to vector<1x32x8xf32>
    %59 = vector.extract_strided_slice %30 {offsets = [0, 72], sizes = [32, 8], strides = [1, 1]} : vector<32x96xf32> to vector<32x8xf32>
    %60 = vector.shape_cast %59 : vector<32x8xf32> to vector<1x32x8xf32>
    "tpu.trace_start"() <{level = 10 : i32, message = "gqd,gkd->gqk"}> : () -> ()
    %cst_26 = arith.constant dense<0.000000e+00> : vector<1x32x32xf32>
    %61 = tpu.matmul %56, %58, %cst_26 {dimension_numbers = #tpu.dot_dimension_numbers<[2], [2], [1], [1], [0, 0, 0, 1, 1, 1], [0], [0]>} : vector<1x32x8xf32>, vector<1x32x8xf32>, vector<1x32x32xf32> -> vector<1x32x32xf32>
    "tpu.trace_stop"() : () -> ()
    %c1 = arith.constant 1 : index
    %c0_27 = arith.constant 0 : index
    %c0_28 = arith.constant 0 : index
    %62 = vector.load %arg6[%c1, %c0_27, %c0_28] : memref<4x32x32xf32, #tpu.memory_space<vmem>>, vector<1x32x32xf32>
    %63 = vector.shape_cast %62 : vector<1x32x32xf32> to vector<32x32xf32>
    %64 = vector.shape_cast %63 : vector<32x32xf32> to vector<1x32x32xf32>
    %65 = arith.addf %61, %64 : vector<1x32x32xf32>
    %cst_29 = arith.constant dense<0xFF800000> : vector<1x32xf32>
    %66 = vector.multi_reduction <maximumf>, %65, %cst_29 [2] : vector<1x32x32xf32> to vector<1x32xf32>
    %67 = vector.shape_cast %66 : vector<1x32xf32> to vector<1x32x1xf32>
    %68 = vector.broadcast %67 : vector<1x32x1xf32> to vector<1x32x32xf32>
    %69 = arith.subf %65, %68 : vector<1x32x32xf32>
    %70 = math.exp %69 : vector<1x32x32xf32>
    %cst_30 = arith.constant dense<0.000000e+00> : vector<1x32xf32>
    %71 = vector.multi_reduction <add>, %70, %cst_30 [2] : vector<1x32x32xf32> to vector<1x32xf32>
    %72 = vector.shape_cast %71 : vector<1x32xf32> to vector<1x32x1xf32>
    %73 = vector.broadcast %72 : vector<1x32x1xf32> to vector<1x32x32xf32>
    %74 = arith.divf %70, %73 : vector<1x32x32xf32>
    %c0_31 = arith.constant 0 : index
    %c1_32 = arith.constant 1 : index
    %c0_33 = arith.constant 0 : index
    %c0_34 = arith.constant 0 : index
    %75 = vector.load %arg8[%c0_31, %c1_32, %c0_33, %c0_34] : memref<1x4x32x32xf32, #tpu.memory_space<vmem>>, vector<1x1x32x32xf32>
    %76 = vector.shape_cast %75 : vector<1x1x32x32xf32> to vector<1x32x32xf32>
    %77 = vector.shape_cast %74 : vector<1x32x32xf32> to vector<1x1x32x32xf32>
    tpu.vector_store %arg8[%c0_31, %c1_32, %c0_33, %c0_34], %77 {strides = array<i32>} : memref<1x4x32x32xf32, #tpu.memory_space<vmem>>, vector<1x1x32x32xf32>,
    "tpu.trace_start"() <{level = 10 : i32, message = "gqk,gkd->gqd"}> : () -> ()
    %cst_35 = arith.constant dense<0.000000e+00> : vector<1x32x8xf32>
    %78 = tpu.matmul %74, %60, %cst_35 {dimension_numbers = #tpu.dot_dimension_numbers<[2], [1], [1], [2], [0, 0, 0, 1, 1, 2], [0], [0]>} : vector<1x32x32xf32>, vector<1x32x8xf32>, vector<1x32x8xf32> -> vector<1x32x8xf32>
    "tpu.trace_stop"() : () -> ()
    %79 = vector.extract_strided_slice %30 {offsets = [0, 16], sizes = [32, 8], strides = [1, 1]} : vector<32x96xf32> to vector<32x8xf32>
    %80 = vector.shape_cast %79 : vector<32x8xf32> to vector<1x32x8xf32>
    %81 = vector.extract_strided_slice %30 {offsets = [0, 48], sizes = [32, 8], strides = [1, 1]} : vector<32x96xf32> to vector<32x8xf32>
    %82 = vector.shape_cast %81 : vector<32x8xf32> to vector<1x32x8xf32>
    %83 = vector.extract_strided_slice %30 {offsets = [0, 80], sizes = [32, 8], strides = [1, 1]} : vector<32x96xf32> to vector<32x8xf32>
    %84 = vector.shape_cast %83 : vector<32x8xf32> to vector<1x32x8xf32>
    "tpu.trace_start"() <{level = 10 : i32, message = "gqd,gkd->gqk"}> : () -> ()
    %cst_36 = arith.constant dense<0.000000e+00> : vector<1x32x32xf32>
    %85 = tpu.matmul %80, %82, %cst_36 {dimension_numbers = #tpu.dot_dimension_numbers<[2], [2], [1], [1], [0, 0, 0, 1, 1, 1], [0], [0]>} : vector<1x32x8xf32>, vector<1x32x8xf32>, vector<1x32x32xf32> -> vector<1x32x32xf32>
    "tpu.trace_stop"() : () -> ()
    %c2 = arith.constant 2 : index
    %c0_37 = arith.constant 0 : index
    %c0_38 = arith.constant 0 : index
    %86 = vector.load %arg6[%c2, %c0_37, %c0_38] : memref<4x32x32xf32, #tpu.memory_space<vmem>>, vector<1x32x32xf32>
    %87 = vector.shape_cast %86 : vector<1x32x32xf32> to vector<32x32xf32>
    %88 = vector.shape_cast %87 : vector<32x32xf32> to vector<1x32x32xf32>
    %89 = arith.addf %85, %88 : vector<1x32x32xf32>
    %cst_39 = arith.constant dense<0xFF800000> : vector<1x32xf32>
    %90 = vector.multi_reduction <maximumf>, %89, %cst_39 [2] : vector<1x32x32xf32> to vector<1x32xf32>
    %91 = vector.shape_cast %90 : vector<1x32xf32> to vector<1x32x1xf32>
    %92 = vector.broadcast %91 : vector<1x32x1xf32> to vector<1x32x32xf32>
    %93 = arith.subf %89, %92 : vector<1x32x32xf32>
    %94 = math.exp %93 : vector<1x32x32xf32>
    %cst_40 = arith.constant dense<0.000000e+00> : vector<1x32xf32>
    %95 = vector.multi_reduction <add>, %94, %cst_40 [2] : vector<1x32x32xf32> to vector<1x32xf32>
    %96 = vector.shape_cast %95 : vector<1x32xf32> to vector<1x32x1xf32>
    %97 = vector.broadcast %96 : vector<1x32x1xf32> to vector<1x32x32xf32>
    %98 = arith.divf %94, %97 : vector<1x32x32xf32>
    %c0_41 = arith.constant 0 : index
    %c2_42 = arith.constant 2 : index
    %c0_43 = arith.constant 0 : index
    %c0_44 = arith.constant 0 : index
    %99 = vector.load %arg8[%c0_41, %c2_42, %c0_43, %c0_44] : memref<1x4x32x32xf32, #tpu.memory_space<vmem>>, vector<1x1x32x32xf32>
    %100 = vector.shape_cast %99 : vector<1x1x32x32xf32> to vector<1x32x32xf32>
    %101 = vector.shape_cast %98 : vector<1x32x32xf32> to vector<1x1x32x32xf32>
    tpu.vector_store %arg8[%c0_41, %c2_42, %c0_43, %c0_44], %101 {strides = array<i32>} : memref<1x4x32x32xf32, #tpu.memory_space<vmem>>, vector<1x1x32x32xf32>,
    "tpu.trace_start"() <{level = 10 : i32, message = "gqk,gkd->gqd"}> : () -> ()
    %cst_45 = arith.constant dense<0.000000e+00> : vector<1x32x8xf32>
    %102 = tpu.matmul %98, %84, %cst_45 {dimension_numbers = #tpu.dot_dimension_numbers<[2], [1], [1], [2], [0, 0, 0, 1, 1, 2], [0], [0]>} : vector<1x32x32xf32>, vector<1x32x8xf32>, vector<1x32x8xf32> -> vector<1x32x8xf32>
    "tpu.trace_stop"() : () -> ()
    %103 = vector.extract_strided_slice %30 {offsets = [0, 24], sizes = [32, 8], strides = [1, 1]} : vector<32x96xf32> to vector<32x8xf32>
    %104 = vector.shape_cast %103 : vector<32x8xf32> to vector<1x32x8xf32>
    %105 = vector.extract_strided_slice %30 {offsets = [0, 56], sizes = [32, 8], strides = [1, 1]} : vector<32x96xf32> to vector<32x8xf32>
    %106 = vector.shape_cast %105 : vector<32x8xf32> to vector<1x32x8xf32>
    %107 = vector.extract_strided_slice %30 {offsets = [0, 88], sizes = [32, 8], strides = [1, 1]} : vector<32x96xf32> to vector<32x8xf32>
    %108 = vector.shape_cast %107 : vector<32x8xf32> to vector<1x32x8xf32>
    "tpu.trace_start"() <{level = 10 : i32, message = "gqd,gkd->gqk"}> : () -> ()
    %cst_46 = arith.constant dense<0.000000e+00> : vector<1x32x32xf32>
    %109 = tpu.matmul %104, %106, %cst_46 {dimension_numbers = #tpu.dot_dimension_numbers<[2], [2], [1], [1], [0, 0, 0, 1, 1, 1], [0], [0]>} : vector<1x32x8xf32>, vector<1x32x8xf32>, vector<1x32x32xf32> -> vector<1x32x32xf32>
    "tpu.trace_stop"() : () -> ()
    %c3 = arith.constant 3 : index
    %c0_47 = arith.constant 0 : index
    %c0_48 = arith.constant 0 : index
    %110 = vector.load %arg6[%c3, %c0_47, %c0_48] : memref<4x32x32xf32, #tpu.memory_space<vmem>>, vector<1x32x32xf32>
    %111 = vector.shape_cast %110 : vector<1x32x32xf32> to vector<32x32xf32>
    %112 = vector.shape_cast %111 : vector<32x32xf32> to vector<1x32x32xf32>
    %113 = arith.addf %109, %112 : vector<1x32x32xf32>
    %cst_49 = arith.constant dense<0xFF800000> : vector<1x32xf32>
    %114 = vector.multi_reduction <maximumf>, %113, %cst_49 [2] : vector<1x32x32xf32> to vector<1x32xf32>
    %115 = vector.shape_cast %114 : vector<1x32xf32> to vector<1x32x1xf32>
    %116 = vector.broadcast %115 : vector<1x32x1xf32> to vector<1x32x32xf32>
    %117 = arith.subf %113, %116 : vector<1x32x32xf32>
    %118 = math.exp %117 : vector<1x32x32xf32>
    %cst_50 = arith.constant dense<0.000000e+00> : vector<1x32xf32>
    %119 = vector.multi_reduction <add>, %118, %cst_50 [2] : vector<1x32x32xf32> to vector<1x32xf32>
    %120 = vector.shape_cast %119 : vector<1x32xf32> to vector<1x32x1xf32>
    %121 = vector.broadcast %120 : vector<1x32x1xf32> to vector<1x32x32xf32>
    %122 = arith.divf %118, %121 : vector<1x32x32xf32>
    %c0_51 = arith.constant 0 : index
    %c3_52 = arith.constant 3 : index
    %c0_53 = arith.constant 0 : index
    %c0_54 = arith.constant 0 : index
    %123 = vector.load %arg8[%c0_51, %c3_52, %c0_53, %c0_54] : memref<1x4x32x32xf32, #tpu.memory_space<vmem>>, vector<1x1x32x32xf32>
    %124 = vector.shape_cast %123 : vector<1x1x32x32xf32> to vector<1x32x32xf32>
    %125 = vector.shape_cast %122 : vector<1x32x32xf32> to vector<1x1x32x32xf32>
    tpu.vector_store %arg8[%c0_51, %c3_52, %c0_53, %c0_54], %125 {strides = array<i32>} : memref<1x4x32x32xf32, #tpu.memory_space<vmem>>, vector<1x1x32x32xf32>,
    "tpu.trace_start"() <{level = 10 : i32, message = "gqk,gkd->gqd"}> : () -> ()
    %cst_55 = arith.constant dense<0.000000e+00> : vector<1x32x8xf32>
    %126 = tpu.matmul %122, %108, %cst_55 {dimension_numbers = #tpu.dot_dimension_numbers<[2], [1], [1], [2], [0, 0, 0, 1, 1, 2], [0], [0]>} : vector<1x32x32xf32>, vector<1x32x8xf32>, vector<1x32x8xf32> -> vector<1x32x8xf32>
    "tpu.trace_stop"() : () -> ()
    %127 = tpu.concatenate %54, %78, %102, %126 in 2 : vector<1x32x8xf32>, vector<1x32x8xf32>, vector<1x32x8xf32>, vector<1x32x8xf32> -> vector<1x32x32xf32>
    %128 = vector.shape_cast %127 : vector<1x32x32xf32> to vector<4x8x32xf32>
    %c0_56 = arith.constant 0 : index
    %c0_57 = arith.constant 0 : index
    %c0_58 = arith.constant 0 : index
    %129 = vector.load %arg7[%c0_56, %c0_57, %c0_58] : memref<4x8x32xf32, #tpu.memory_space<vmem>>, vector<4x8x32xf32>
    tpu.vector_store %arg7[%c0_56, %c0_57, %c0_58], %128 {strides = array<i32>} : memref<4x8x32xf32, #tpu.memory_space<vmem>>, vector<4x8x32xf32>,
    return
  }
  func.func @transform_0(%arg0: i32) -> (i32, i32, i32) {
    %c0_i32 = arith.constant 0 : i32
    %c0_i32_0 = arith.constant 0 : i32
    %c0_i32_1 = arith.constant 0 : i32
    return %arg0, %c0_i32, %c0_i32_0 : i32, i32, i32
  }
  func.func @transform_1(%arg0: i32) -> (i32, i32) {
    %c0_i32 = arith.constant 0 : i32
    %c0_i32_0 = arith.constant 0 : i32
    %c0_i32_1 = arith.constant 0 : i32
    return %c0_i32, %c0_i32_0 : i32, i32
  }
  func.func @transform_2(%arg0: i32) -> (i32, i32) {
    %c0_i32 = arith.constant 0 : i32
    %c0_i32_0 = arith.constant 0 : i32
    %c0_i32_1 = arith.constant 0 : i32
    return %c0_i32, %c0_i32_0 : i32, i32
  }
  func.func @transform_3(%arg0: i32) -> (i32, i32) {
    %c0_i32 = arith.constant 0 : i32
    %c0_i32_0 = arith.constant 0 : i32
    %c0_i32_1 = arith.constant 0 : i32
    return %c0_i32, %c0_i32_0 : i32, i32
  }
  func.func @transform_4(%arg0: i32) -> (i32, i32) {
    %c0_i32 = arith.constant 0 : i32
    %c0_i32_0 = arith.constant 0 : i32
    %c0_i32_1 = arith.constant 0 : i32
    return %c0_i32, %c0_i32_0 : i32, i32
  }
  func.func @transform_5(%arg0: i32) -> (i32, i32, i32) {
    %c0_i32 = arith.constant 0 : i32
    %c0_i32_0 = arith.constant 0 : i32
    %c0_i32_1 = arith.constant 0 : i32
    %c0_i32_2 = arith.constant 0 : i32
    return %c0_i32, %c0_i32_0, %c0_i32_1 : i32, i32, i32
  }
  func.func @transform_6(%arg0: i32) -> (i32, i32, i32) {
    %c0_i32 = arith.constant 0 : i32
    %c0_i32_0 = arith.constant 0 : i32
    %c0_i32_1 = arith.constant 0 : i32
    return %arg0, %c0_i32, %c0_i32_0 : i32, i32, i32
  }
  func.func @transform_7(%arg0: i32) -> (i32, i32, i32, i32) {
    %c0_i32 = arith.constant 0 : i32
    %c0_i32_0 = arith.constant 0 : i32
    %c0_i32_1 = arith.constant 0 : i32
    %c0_i32_2 = arith.constant 0 : i32
    return %arg0, %c0_i32, %c0_i32_0, %c0_i32_1 : i32, i32, i32, i32
  }
}

module attributes {stable_mosaic.version = 11 : i64} {
  func.func @_ln_window_attention_kernel(%arg0: i32, %arg1: memref<4x8x32xf32, #tpu.memory_space<vmem>>, %arg2: memref<1x32xf32, #tpu.memory_space<vmem>>, %arg3: memref<1x32xf32, #tpu.memory_space<vmem>>, %arg4: memref<32x96xf32, #tpu.memory_space<vmem>>, %arg5: memref<1x96xf32, #tpu.memory_space<vmem>>, %arg6: memref<4x32x32xf32, #tpu.memory_space<vmem>>, %arg7: memref<4x8x32xf32, #tpu.memory_space<vmem>>, %arg8: memref<1x4x32x32xf32, #tpu.memory_space<vmem>>) attributes {dimension_semantics = [#tpu.dimension_semantics<parallel>], iteration_bounds = array<i64: 1>, scalar_prefetch = 0 : i64, scratch_operands = 0 : i64, tpu.core_type = #tpu.core_type<tc>, window_params = [{transform_indices = @transform_0, window_bounds = array<i64: 4, 8, 32>}, {pipeline_mode = #tpu.pipeline_mode<synchronous>, transform_indices = @transform_1, window_bounds = array<i64: 1, 32>}, {pipeline_mode = #tpu.pipeline_mode<synchronous>, transform_indices = @transform_2, window_bounds = array<i64: 1, 32>}, {pipeline_mode = #tpu.pipeline_mode<synchronous>, transform_indices = @transform_3, window_bounds = array<i64: 32, 96>}, {pipeline_mode = #tpu.pipeline_mode<synchronous>, transform_indices = @transform_4, window_bounds = array<i64: 1, 96>}, {pipeline_mode = #tpu.pipeline_mode<synchronous>, transform_indices = @transform_5, window_bounds = array<i64: 4, 32, 32>}, {transform_indices = @transform_6, window_bounds = array<i64: 4, 8, 32>}, {transform_indices = @transform_7, window_bounds = array<i64: 1, 4, 32, 32>}]} {
    %c0 = arith.constant 0 : index
    %c0_0 = arith.constant 0 : index
    %c0_1 = arith.constant 0 : index
    %0 = vector.load %arg1[%c0, %c0_0, %c0_1] : memref<4x8x32xf32, #tpu.memory_space<vmem>>, vector<4x8x32xf32>
    %1 = vector.shape_cast %0 : vector<4x8x32xf32> to vector<32x32xf32>
    %cst = arith.constant dense<0.000000e+00> : vector<32xf32>
    %2 = vector.multi_reduction <add>, %1, %cst [1] : vector<32x32xf32> to vector<32xf32>
    %3 = vector.shape_cast %2 : vector<32xf32> to vector<32x1xf32>
    %cst_2 = arith.constant 3.200000e+01 : f32
    %4 = vector.broadcast %cst_2 : f32 to vector<32x1xf32>
    %5 = arith.divf %3, %4 : vector<32x1xf32>
    %6 = vector.broadcast %5 : vector<32x1xf32> to vector<32x32xf32>
    %7 = arith.subf %1, %6 : vector<32x32xf32>
    %8 = arith.mulf %7, %7 : vector<32x32xf32>
    %cst_3 = arith.constant dense<0.000000e+00> : vector<32xf32>
    %9 = vector.multi_reduction <add>, %8, %cst_3 [1] : vector<32x32xf32> to vector<32xf32>
    %10 = vector.shape_cast %9 : vector<32xf32> to vector<32x1xf32>
    %cst_4 = arith.constant 3.200000e+01 : f32
    %11 = vector.broadcast %cst_4 : f32 to vector<32x1xf32>
    %12 = arith.divf %10, %11 : vector<32x1xf32>
    %13 = vector.broadcast %5 : vector<32x1xf32> to vector<32x32xf32>
    %14 = arith.subf %1, %13 : vector<32x32xf32>
    %cst_5 = arith.constant 9.99999974E-6 : f32
    %15 = vector.broadcast %cst_5 : f32 to vector<32x1xf32>
    %16 = arith.addf %12, %15 : vector<32x1xf32>
    %17 = math.rsqrt %16 : vector<32x1xf32>
    %18 = vector.broadcast %17 : vector<32x1xf32> to vector<32x32xf32>
    %19 = arith.mulf %14, %18 : vector<32x32xf32>
    %c0_6 = arith.constant 0 : index
    %c0_7 = arith.constant 0 : index
    %20 = vector.load %arg2[%c0_6, %c0_7] : memref<1x32xf32, #tpu.memory_space<vmem>>, vector<1x32xf32>
    %21 = vector.broadcast %20 : vector<1x32xf32> to vector<32x32xf32>
    %22 = arith.mulf %19, %21 : vector<32x32xf32>
    %c0_8 = arith.constant 0 : index
    %c0_9 = arith.constant 0 : index
    %23 = vector.load %arg3[%c0_8, %c0_9] : memref<1x32xf32, #tpu.memory_space<vmem>>, vector<1x32xf32>
    %24 = vector.broadcast %23 : vector<1x32xf32> to vector<32x32xf32>
    %25 = arith.addf %22, %24 : vector<32x32xf32>
    %c0_10 = arith.constant 0 : index
    %c0_11 = arith.constant 0 : index
    %26 = vector.load %arg4[%c0_10, %c0_11] : memref<32x96xf32, #tpu.memory_space<vmem>>, vector<32x96xf32>
    %cst_12 = arith.constant dense<0.000000e+00> : vector<32x96xf32>
    %27 = tpu.matmul %25, %26, %cst_12 {dimension_numbers = #tpu.dot_dimension_numbers<[1], [0], [0], [1], [0, 0, 1, 1], [], []>} : vector<32x32xf32>, vector<32x96xf32>, vector<32x96xf32> -> vector<32x96xf32>
    %c0_13 = arith.constant 0 : index
    %c0_14 = arith.constant 0 : index
    %28 = vector.load %arg5[%c0_13, %c0_14] : memref<1x96xf32, #tpu.memory_space<vmem>>, vector<1x96xf32>
    %29 = vector.broadcast %28 : vector<1x96xf32> to vector<32x96xf32>
    %30 = arith.addf %27, %29 : vector<32x96xf32>
    %31 = vector.extract_strided_slice %30 {offsets = [0, 0], sizes = [32, 8], strides = [1, 1]} : vector<32x96xf32> to vector<32x8xf32>
    %32 = vector.shape_cast %31 : vector<32x8xf32> to vector<1x32x8xf32>
    %33 = vector.extract_strided_slice %30 {offsets = [0, 32], sizes = [32, 8], strides = [1, 1]} : vector<32x96xf32> to vector<32x8xf32>
    %34 = vector.shape_cast %33 : vector<32x8xf32> to vector<1x32x8xf32>
    %35 = vector.extract_strided_slice %30 {offsets = [0, 64], sizes = [32, 8], strides = [1, 1]} : vector<32x96xf32> to vector<32x8xf32>
    %36 = vector.shape_cast %35 : vector<32x8xf32> to vector<1x32x8xf32>
    "tpu.trace_start"() <{level = 10 : i32, message = "gqd,gkd->gqk"}> : () -> ()
    %cst_15 = arith.constant dense<0.000000e+00> : vector<1x32x32xf32>
    %37 = tpu.matmul %32, %34, %cst_15 {dimension_numbers = #tpu.dot_dimension_numbers<[2], [2], [1], [1], [0, 0, 0, 1, 1, 1], [0], [0]>} : vector<1x32x8xf32>, vector<1x32x8xf32>, vector<1x32x32xf32> -> vector<1x32x32xf32>
    "tpu.trace_stop"() : () -> ()
    %c0_16 = arith.constant 0 : index
    %c0_17 = arith.constant 0 : index
    %c0_18 = arith.constant 0 : index
    %38 = vector.load %arg6[%c0_16, %c0_17, %c0_18] : memref<4x32x32xf32, #tpu.memory_space<vmem>>, vector<1x32x32xf32>
    %39 = vector.shape_cast %38 : vector<1x32x32xf32> to vector<32x32xf32>
    %40 = vector.shape_cast %39 : vector<32x32xf32> to vector<1x32x32xf32>
    %41 = arith.addf %37, %40 : vector<1x32x32xf32>
    %cst_19 = arith.constant dense<0xFF800000> : vector<1x32xf32>
    %42 = vector.multi_reduction <maximumf>, %41, %cst_19 [2] : vector<1x32x32xf32> to vector<1x32xf32>
    %43 = vector.shape_cast %42 : vector<1x32xf32> to vector<1x32x1xf32>
    %44 = vector.broadcast %43 : vector<1x32x1xf32> to vector<1x32x32xf32>
    %45 = arith.subf %41, %44 : vector<1x32x32xf32>
    %46 = math.exp %45 : vector<1x32x32xf32>
    %cst_20 = arith.constant dense<0.000000e+00> : vector<1x32xf32>
    %47 = vector.multi_reduction <add>, %46, %cst_20 [2] : vector<1x32x32xf32> to vector<1x32xf32>
    %48 = vector.shape_cast %47 : vector<1x32xf32> to vector<1x32x1xf32>
    %49 = vector.broadcast %48 : vector<1x32x1xf32> to vector<1x32x32xf32>
    %50 = arith.divf %46, %49 : vector<1x32x32xf32>
    %c0_21 = arith.constant 0 : index
    %c0_22 = arith.constant 0 : index
    %c0_23 = arith.constant 0 : index
    %c0_24 = arith.constant 0 : index
    %51 = vector.load %arg8[%c0_21, %c0_22, %c0_23, %c0_24] : memref<1x4x32x32xf32, #tpu.memory_space<vmem>>, vector<1x1x32x32xf32>
    %52 = vector.shape_cast %51 : vector<1x1x32x32xf32> to vector<1x32x32xf32>
    %53 = vector.shape_cast %50 : vector<1x32x32xf32> to vector<1x1x32x32xf32>
    tpu.vector_store %arg8[%c0_21, %c0_22, %c0_23, %c0_24], %53 {strides = array<i32>} : memref<1x4x32x32xf32, #tpu.memory_space<vmem>>, vector<1x1x32x32xf32>,
    "tpu.trace_start"() <{level = 10 : i32, message = "gqk,gkd->gqd"}> : () -> ()
    %cst_25 = arith.constant dense<0.000000e+00> : vector<1x32x8xf32>
    %54 = tpu.matmul %50, %36, %cst_25 {dimension_numbers = #tpu.dot_dimension_numbers<[2], [1], [1], [2], [0, 0, 0, 1, 1, 2], [0], [0]>} : vector<1x32x32xf32>, vector<1x32x8xf32>, vector<1x32x8xf32> -> vector<1x32x8xf32>
    "tpu.trace_stop"() : () -> ()
    %55 = vector.extract_strided_slice %30 {offsets = [0, 8], sizes = [32, 8], strides = [1, 1]} : vector<32x96xf32> to vector<32x8xf32>
    %56 = vector.shape_cast %55 : vector<32x8xf32> to vector<1x32x8xf32>
    %57 = vector.extract_strided_slice %30 {offsets = [0, 40], sizes = [32, 8], strides = [1, 1]} : vector<32x96xf32> to vector<32x8xf32>
    %58 = vector.shape_cast %57 : vector<32x8xf32> to vector<1x32x8xf32>
    %59 = vector.extract_strided_slice %30 {offsets = [0, 72], sizes = [32, 8], strides = [1, 1]} : vector<32x96xf32> to vector<32x8xf32>
    %60 = vector.shape_cast %59 : vector<32x8xf32> to vector<1x32x8xf32>
    "tpu.trace_start"() <{level = 10 : i32, message = "gqd,gkd->gqk"}> : () -> ()
    %cst_26 = arith.constant dense<0.000000e+00> : vector<1x32x32xf32>
    %61 = tpu.matmul %56, %58, %cst_26 {dimension_numbers = #tpu.dot_dimension_numbers<[2], [2], [1], [1], [0, 0, 0, 1, 1, 1], [0], [0]>} : vector<1x32x8xf32>, vector<1x32x8xf32>, vector<1x32x32xf32> -> vector<1x32x32xf32>
    "tpu.trace_stop"() : () -> ()
    %c1 = arith.constant 1 : index
    %c0_27 = arith.constant 0 : index
    %c0_28 = arith.constant 0 : index
    %62 = vector.load %arg6[%c1, %c0_27, %c0_28] : memref<4x32x32xf32, #tpu.memory_space<vmem>>, vector<1x32x32xf32>
    %63 = vector.shape_cast %62 : vector<1x32x32xf32> to vector<32x32xf32>
    %64 = vector.shape_cast %63 : vector<32x32xf32> to vector<1x32x32xf32>
    %65 = arith.addf %61, %64 : vector<1x32x32xf32>
    %cst_29 = arith.constant dense<0xFF800000> : vector<1x32xf32>
    %66 = vector.multi_reduction <maximumf>, %65, %cst_29 [2] : vector<1x32x32xf32> to vector<1x32xf32>
    %67 = vector.shape_cast %66 : vector<1x32xf32> to vector<1x32x1xf32>
    %68 = vector.broadcast %67 : vector<1x32x1xf32> to vector<1x32x32xf32>
    %69 = arith.subf %65, %68 : vector<1x32x32xf32>
    %70 = math.exp %69 : vector<1x32x32xf32>
    %cst_30 = arith.constant dense<0.000000e+00> : vector<1x32xf32>
    %71 = vector.multi_reduction <add>, %70, %cst_30 [2] : vector<1x32x32xf32> to vector<1x32xf32>
    %72 = vector.shape_cast %71 : vector<1x32xf32> to vector<1x32x1xf32>
    %73 = vector.broadcast %72 : vector<1x32x1xf32> to vector<1x32x32xf32>
    %74 = arith.divf %70, %73 : vector<1x32x32xf32>
    %c0_31 = arith.constant 0 : index
    %c1_32 = arith.constant 1 : index
    %c0_33 = arith.constant 0 : index
    %c0_34 = arith.constant 0 : index
    %75 = vector.load %arg8[%c0_31, %c1_32, %c0_33, %c0_34] : memref<1x4x32x32xf32, #tpu.memory_space<vmem>>, vector<1x1x32x32xf32>
    %76 = vector.shape_cast %75 : vector<1x1x32x32xf32> to vector<1x32x32xf32>
    %77 = vector.shape_cast %74 : vector<1x32x32xf32> to vector<1x1x32x32xf32>
    tpu.vector_store %arg8[%c0_31, %c1_32, %c0_33, %c0_34], %77 {strides = array<i32>} : memref<1x4x32x32xf32, #tpu.memory_space<vmem>>, vector<1x1x32x32xf32>,
    "tpu.trace_start"() <{level = 10 : i32, message = "gqk,gkd->gqd"}> : () -> ()
    %cst_35 = arith.constant dense<0.000000e+00> : vector<1x32x8xf32>
    %78 = tpu.matmul %74, %60, %cst_35 {dimension_numbers = #tpu.dot_dimension_numbers<[2], [1], [1], [2], [0, 0, 0, 1, 1, 2], [0], [0]>} : vector<1x32x32xf32>, vector<1x32x8xf32>, vector<1x32x8xf32> -> vector<1x32x8xf32>
    "tpu.trace_stop"() : () -> ()
    %79 = vector.extract_strided_slice %30 {offsets = [0, 16], sizes = [32, 8], strides = [1, 1]} : vector<32x96xf32> to vector<32x8xf32>
    %80 = vector.shape_cast %79 : vector<32x8xf32> to vector<1x32x8xf32>
    %81 = vector.extract_strided_slice %30 {offsets = [0, 48], sizes = [32, 8], strides = [1, 1]} : vector<32x96xf32> to vector<32x8xf32>
    %82 = vector.shape_cast %81 : vector<32x8xf32> to vector<1x32x8xf32>
    %83 = vector.extract_strided_slice %30 {offsets = [0, 80], sizes = [32, 8], strides = [1, 1]} : vector<32x96xf32> to vector<32x8xf32>
    %84 = vector.shape_cast %83 : vector<32x8xf32> to vector<1x32x8xf32>
    "tpu.trace_start"() <{level = 10 : i32, message = "gqd,gkd->gqk"}> : () -> ()
    %cst_36 = arith.constant dense<0.000000e+00> : vector<1x32x32xf32>
    %85 = tpu.matmul %80, %82, %cst_36 {dimension_numbers = #tpu.dot_dimension_numbers<[2], [2], [1], [1], [0, 0, 0, 1, 1, 1], [0], [0]>} : vector<1x32x8xf32>, vector<1x32x8xf32>, vector<1x32x32xf32> -> vector<1x32x32xf32>
    "tpu.trace_stop"() : () -> ()
    %c2 = arith.constant 2 : index
    %c0_37 = arith.constant 0 : index
    %c0_38 = arith.constant 0 : index
    %86 = vector.load %arg6[%c2, %c0_37, %c0_38] : memref<4x32x32xf32, #tpu.memory_space<vmem>>, vector<1x32x32xf32>
    %87 = vector.shape_cast %86 : vector<1x32x32xf32> to vector<32x32xf32>
    %88 = vector.shape_cast %87 : vector<32x32xf32> to vector<1x32x32xf32>
    %89 = arith.addf %85, %88 : vector<1x32x32xf32>
    %cst_39 = arith.constant dense<0xFF800000> : vector<1x32xf32>
    %90 = vector.multi_reduction <maximumf>, %89, %cst_39 [2] : vector<1x32x32xf32> to vector<1x32xf32>
    %91 = vector.shape_cast %90 : vector<1x32xf32> to vector<1x32x1xf32>
    %92 = vector.broadcast %91 : vector<1x32x1xf32> to vector<1x32x32xf32>
    %93 = arith.subf %89, %92 : vector<1x32x32xf32>
    %94 = math.exp %93 : vector<1x32x32xf32>
    %cst_40 = arith.constant dense<0.000000e+00> : vector<1x32xf32>
    %95 = vector.multi_reduction <add>, %94, %cst_40 [2] : vector<1x32x32xf32> to vector<1x32xf32>
    %96 = vector.shape_cast %95 : vector<1x32xf32> to vector<1x32x1xf32>
    %97 = vector.broadcast %96 : vector<1x32x1xf32> to vector<1x32x32xf32>
    %98 = arith.divf %94, %97 : vector<1x32x32xf32>
    %c0_41 = arith.constant 0 : index
    %c2_42 = arith.constant 2 : index
    %c0_43 = arith.constant 0 : index
    %c0_44 = arith.constant 0 : index
    %99 = vector.load %arg8[%c0_41, %c2_42, %c0_43, %c0_44] : memref<1x4x32x32xf32, #tpu.memory_space<vmem>>, vector<1x1x32x32xf32>
    %100 = vector.shape_cast %99 : vector<1x1x32x32xf32> to vector<1x32x32xf32>
    %101 = vector.shape_cast %98 : vector<1x32x32xf32> to vector<1x1x32x32xf32>
    tpu.vector_store %arg8[%c0_41, %c2_42, %c0_43, %c0_44], %101 {strides = array<i32>} : memref<1x4x32x32xf32, #tpu.memory_space<vmem>>, vector<1x1x32x32xf32>,
    "tpu.trace_start"() <{level = 10 : i32, message = "gqk,gkd->gqd"}> : () -> ()
    %cst_45 = arith.constant dense<0.000000e+00> : vector<1x32x8xf32>
    %102 = tpu.matmul %98, %84, %cst_45 {dimension_numbers = #tpu.dot_dimension_numbers<[2], [1], [1], [2], [0, 0, 0, 1, 1, 2], [0], [0]>} : vector<1x32x32xf32>, vector<1x32x8xf32>, vector<1x32x8xf32> -> vector<1x32x8xf32>
    "tpu.trace_stop"() : () -> ()
    %103 = vector.extract_strided_slice %30 {offsets = [0, 24], sizes = [32, 8], strides = [1, 1]} : vector<32x96xf32> to vector<32x8xf32>
    %104 = vector.shape_cast %103 : vector<32x8xf32> to vector<1x32x8xf32>
    %105 = vector.extract_strided_slice %30 {offsets = [0, 56], sizes = [32, 8], strides = [1, 1]} : vector<32x96xf32> to vector<32x8xf32>
    %106 = vector.shape_cast %105 : vector<32x8xf32> to vector<1x32x8xf32>
    %107 = vector.extract_strided_slice %30 {offsets = [0, 88], sizes = [32, 8], strides = [1, 1]} : vector<32x96xf32> to vector<32x8xf32>
    %108 = vector.shape_cast %107 : vector<32x8xf32> to vector<1x32x8xf32>
    "tpu.trace_start"() <{level = 10 : i32, message = "gqd,gkd->gqk"}> : () -> ()
    %cst_46 = arith.constant dense<0.000000e+00> : vector<1x32x32xf32>
    %109 = tpu.matmul %104, %106, %cst_46 {dimension_numbers = #tpu.dot_dimension_numbers<[2], [2], [1], [1], [0, 0, 0, 1, 1, 1], [0], [0]>} : vector<1x32x8xf32>, vector<1x32x8xf32>, vector<1x32x32xf32> -> vector<1x32x32xf32>
    "tpu.trace_stop"() : () -> ()
    %c3 = arith.constant 3 : index
    %c0_47 = arith.constant 0 : index
    %c0_48 = arith.constant 0 : index
    %110 = vector.load %arg6[%c3, %c0_47, %c0_48] : memref<4x32x32xf32, #tpu.memory_space<vmem>>, vector<1x32x32xf32>
    %111 = vector.shape_cast %110 : vector<1x32x32xf32> to vector<32x32xf32>
    %112 = vector.shape_cast %111 : vector<32x32xf32> to vector<1x32x32xf32>
    %113 = arith.addf %109, %112 : vector<1x32x32xf32>
    %cst_49 = arith.constant dense<0xFF800000> : vector<1x32xf32>
    %114 = vector.multi_reduction <maximumf>, %113, %cst_49 [2] : vector<1x32x32xf32> to vector<1x32xf32>
    %115 = vector.shape_cast %114 : vector<1x32xf32> to vector<1x32x1xf32>
    %116 = vector.broadcast %115 : vector<1x32x1xf32> to vector<1x32x32xf32>
    %117 = arith.subf %113, %116 : vector<1x32x32xf32>
    %118 = math.exp %117 : vector<1x32x32xf32>
    %cst_50 = arith.constant dense<0.000000e+00> : vector<1x32xf32>
    %119 = vector.multi_reduction <add>, %118, %cst_50 [2] : vector<1x32x32xf32> to vector<1x32xf32>
    %120 = vector.shape_cast %119 : vector<1x32xf32> to vector<1x32x1xf32>
    %121 = vector.broadcast %120 : vector<1x32x1xf32> to vector<1x32x32xf32>
    %122 = arith.divf %118, %121 : vector<1x32x32xf32>
    %c0_51 = arith.constant 0 : index
    %c3_52 = arith.constant 3 : index
    %c0_53 = arith.constant 0 : index
    %c0_54 = arith.constant 0 : index
    %123 = vector.load %arg8[%c0_51, %c3_52, %c0_53, %c0_54] : memref<1x4x32x32xf32, #tpu.memory_space<vmem>>, vector<1x1x32x32xf32>
    %124 = vector.shape_cast %123 : vector<1x1x32x32xf32> to vector<1x32x32xf32>
    %125 = vector.shape_cast %122 : vector<1x32x32xf32> to vector<1x1x32x32xf32>
    tpu.vector_store %arg8[%c0_51, %c3_52, %c0_53, %c0_54], %125 {strides = array<i32>} : memref<1x4x32x32xf32, #tpu.memory_space<vmem>>, vector<1x1x32x32xf32>,
    "tpu.trace_start"() <{level = 10 : i32, message = "gqk,gkd->gqd"}> : () -> ()
    %cst_55 = arith.constant dense<0.000000e+00> : vector<1x32x8xf32>
    %126 = tpu.matmul %122, %108, %cst_55 {dimension_numbers = #tpu.dot_dimension_numbers<[2], [1], [1], [2], [0, 0, 0, 1, 1, 2], [0], [0]>} : vector<1x32x32xf32>, vector<1x32x8xf32>, vector<1x32x8xf32> -> vector<1x32x8xf32>
    "tpu.trace_stop"() : () -> ()
    %127 = tpu.concatenate %54, %78, %102, %126 in 2 : vector<1x32x8xf32>, vector<1x32x8xf32>, vector<1x32x8xf32>, vector<1x32x8xf32> -> vector<1x32x32xf32>
    %128 = vector.shape_cast %127 : vector<1x32x32xf32> to vector<4x8x32xf32>
    %c0_56 = arith.constant 0 : index
    %c0_57 = arith.constant 0 : index
    %c0_58 = arith.constant 0 : index
    %129 = vector.load %arg7[%c0_56, %c0_57, %c0_58] : memref<4x8x32xf32, #tpu.memory_space<vmem>>, vector<4x8x32xf32>
    tpu.vector_store %arg7[%c0_56, %c0_57, %c0_58], %128 {strides = array<i32>} : memref<4x8x32xf32, #tpu.memory_space<vmem>>, vector<4x8x32xf32>,
    return
  }
  func.func @transform_0(%arg0: i32) -> (i32, i32, i32) {
    %c0_i32 = arith.constant 0 : i32
    %c0_i32_0 = arith.constant 0 : i32
    %c0_i32_1 = arith.constant 0 : i32
    return %arg0, %c0_i32, %c0_i32_0 : i32, i32, i32
  }
  func.func @transform_1(%arg0: i32) -> (i32, i32) {
    %c0_i32 = arith.constant 0 : i32
    %c0_i32_0 = arith.constant 0 : i32
    %c0_i32_1 = arith.constant 0 : i32
    return %c0_i32, %c0_i32_0 : i32, i32
  }
  func.func @transform_2(%arg0: i32) -> (i32, i32) {
    %c0_i32 = arith.constant 0 : i32
    %c0_i32_0 = arith.constant 0 : i32
    %c0_i32_1 = arith.constant 0 : i32
    return %c0_i32, %c0_i32_0 : i32, i32
  }
  func.func @transform_3(%arg0: i32) -> (i32, i32) {
    %c0_i32 = arith.constant 0 : i32
    %c0_i32_0 = arith.constant 0 : i32
    %c0_i32_1 = arith.constant 0 : i32
    return %c0_i32, %c0_i32_0 : i32, i32
  }
  func.func @transform_4(%arg0: i32) -> (i32, i32) {
    %c0_i32 = arith.constant 0 : i32
    %c0_i32_0 = arith.constant 0 : i32
    %c0_i32_1 = arith.constant 0 : i32
    return %c0_i32, %c0_i32_0 : i32, i32
  }
  func.func @transform_5(%arg0: i32) -> (i32, i32, i32) {
    %c0_i32 = arith.constant 0 : i32
    %c0_i32_0 = arith.constant 0 : i32
    %c0_i32_1 = arith.constant 0 : i32
    %c0_i32_2 = arith.constant 0 : i32
    return %c0_i32, %c0_i32_0, %c0_i32_1 : i32, i32, i32
  }
  func.func @transform_6(%arg0: i32) -> (i32, i32, i32) {
    %c0_i32 = arith.constant 0 : i32
    %c0_i32_0 = arith.constant 0 : i32
    %c0_i32_1 = arith.constant 0 : i32
    return %arg0, %c0_i32, %c0_i32_0 : i32, i32, i32
  }
  func.func @transform_7(%arg0: i32) -> (i32, i32, i32, i32) {
    %c0_i32 = arith.constant 0 : i32
    %c0_i32_0 = arith.constant 0 : i32
    %c0_i32_1 = arith.constant 0 : i32
    %c0_i32_2 = arith.constant 0 : i32
    return %arg0, %c0_i32, %c0_i32_0, %c0_i32_1 : i32, i32, i32, i32
  }
}

</mosaic_0001>

<bundles_post_ra>
// kernel: tpu_custom_call.1
= control target key start
LH: loop header
LB: loop body
LE: loop exit
PB: predicated region body
PF: predicated region fallthrough
CT: control target
= control target key end

     0   :  { %13 = vsyncpa [#allocation3], 0  ;;  %s2086_s0 = inlined_call_operand.hbm [shape: f32[4,8,32], index: 0, kind: input, shape index: {}]   ;;  %s2087_s1 = inlined_call_operand.hbm [shape: f32[1,32], index: 1, kind: input, shape index: {}]   ;;  %s2088_s2 = inlined_call_operand.vmem [shape: f32[1,32], index: 2, kind: input, shape index: {}]   ;;  %s2089_s3 = inlined_call_operand.hbm [shape: f32[32,96], index: 3, kind: input, shape index: {}]   ;;  %s2090_s4 = inlined_call_operand.vmem [shape: f32[1,96], index: 4, kind: input, shape index: {}]   ;;  %s2091_s5 = inlined_call_operand.hbm [shape: f32[4,32,32], index: 5, kind: input, shape index: {}]   ;;  %s2092_s6 = inlined_call_operand.hbm [shape: f32[4,8,32], index: 6, kind: output, shape index: {0}]   ;;  %s2093_s7 = inlined_call_operand.hbm [shape: f32[1,4,32,32], index: 7, kind: output, shape index: {1}]  }
   0x1   :  { %14 = vsyncpa [#allocation6], 0 }
   0x2   :  { %15 = vsyncpa [#allocation9], 0 }
   0x3   :  { %16 = vsyncpa [#allocation4], 0  ;;  %s36_s26 = sshll.u32 %s2087_s1, 4  ;;  %s37_s26 = int_to_ptr.hbm [resolvable:$true] %s36_s26 }
   0x4   :  { %17 = vsyncpa [#allocation12], 0  ;;  %s1582_s27 = smov [#allocation5]   ;;  %s22_s8 = sshll.u32 %s2086_s0, 4  ;;  %s23_s8 = int_to_ptr.hbm [resolvable:$true] %s22_s8 }
   0x5   :  { %s38_s28 = sshll.u32 %s1582_s27, 4  ;;  %s1583_s9 = smov [#allocation2]   ;;  %s39_s28 = int_to_ptr.vmem [resolvable:$true] %s38_s28 }
   0x6   :  { %41 = dma.hbm_to_vmem [thread:$0]  %s37_s26, 16, %s39_s28, [#allocation6]  }
   0x7   :  { %s24_s10 = sshll.u32 %s1583_s9, 4  ;;  %s1584_s11 = smov 128   ;;  %s25_s10 = int_to_ptr.vmem [resolvable:$true] %s24_s10 }
   0x8   :  { %s1585_s12 = smov 8   ;;  %s48_s14 = sshll.u32 %s2089_s3, 4  ;;  %s49_s14 = int_to_ptr.hbm [resolvable:$true] %s48_s14 }
   0x9   :  { %30 = dma.hbm_to_vmem [thread:$0]  %s23_s8, 512, %s25_s10, [#allocation3], %s1584_s11, %s1584_s11, %s1585_s12  }
   0xa   :  { %s1586_s15 = smov [#allocation7]   ;;  %s63_s18 = sshll.u32 %s2091_s5, 4  ;;  %s64_s18 = int_to_ptr.hbm [resolvable:$true] %s63_s18 }
   0xb   :  { %s50_s16 = sshll.u32 %s1586_s15, 4  ;;  %s1587_s19 = smov [#allocation8]   ;;  %s51_s16 = int_to_ptr.vmem [resolvable:$true] %s50_s16 }
   0xc   :  { %56 = dma.hbm_to_vmem [thread:$0]  %s49_s14, 512, %s51_s16, [#allocation6], %s1584_s11, %s1584_s11, %s1585_s12  }
   0xd   :  { %s65_s20 = sshll.u32 %s1587_s19, 4  ;;  %s66_s20 = int_to_ptr.vmem [resolvable:$true] %s65_s20 }
   0xe   :  { %71 = dma.hbm_to_vmem [thread:$0]  %s64_s18, 2048, %s66_s20, [#allocation9], %s1584_s11, %s1584_s11, %s1585_s12  }
   0xf   :  { %1572 = dma.done.wait [#allocation3], 512  }
  0x10   :  { %1573 = vsyncadd [#allocation3], 4294966784 }
  0x11   :  { %1574 = dma.done.wait [#allocation6], 528  }
  0x12   :  { %1575 = vsyncadd [#allocation6], 4294966768 }
  0x13   :  { %1576 = dma.done.wait [#allocation9], 2048  }
  0x14   :  { %1577 = vsyncadd [#allocation9], 4294965248  ;;  %vm92_vm0 = vcmask 261120   ;;  %v90_v0 = vld [vmem:[#allocation2 + $0x10] sm:$0xff]  ;;  %v88_v1 = vld [vmem:[#allocation2] sm:$0xff]  ;;  %v1588_v8 = vmov 32.0  }
  0x15   :  { %v99_v2 = vsel %vm92_vm0, %v90_v0, 0.0  ;;  %v93_v3 = vsel %vm92_vm0, %v88_v1, 0.0  ;;  %v91_v4 = vld [vmem:[#allocation2 + $0x18] sm:$0xff]  ;;  %v89_v5 = vld [vmem:[#allocation2 + $0x8] sm:$0xff]  ;;  %1354 = vrcp.f32 %v1588_v8  ;;  %v1352_v8 = vld [vmem:[%s2088_s2] ss:$0 sm:$0xff] }
  0x16   :  { %100 = vadd.xlane.f32.xlu0 %v99_v2  ;;  %94 = vadd.xlane.f32.xlu1 %v93_v3  ;;  %v102_v6 = vsel %vm92_vm0, %v91_v4, 0.0  ;;  %v96_v7 = vsel %vm92_vm0, %v89_v5, 0.0  ;;  %v207_v35 = vld [vmem:[#allocation7 + $0x18] sm:$0xff]  ;;  %v206_v36 = vld [vmem:[#allocation7 + $0x10] sm:$0xff]  ;;  %v205_v37 = vld [vmem:[#allocation7 + $0x8] sm:$0xff]  ;;  %s1589_s22 = smov 96  }
  0x17   :  { %236 = vmatpush.msra.mxu0 %v207_v35  ;;  %1285 = vmatpush.msra.mxu2 %v207_v35  ;;  %v204_v38 = vld [vmem:[#allocation7] sm:$0xff]  ;;  %v1351_v3 = vld [vmem:[#allocation5] ss:$0 sm:$0xff]  ;;  %s1591_s23 = smov 88   ;;  %s1592_s24 = smov 120   ;;  %vm269_vm14 = vcmask 64512  }
  0x18   :  { %s1593_s25 = smov 80   ;;  %s1594_s26 = smov 72  }
  0x19   :  { %237 = vmatpush.msra.mxu0 %v206_v36  ;;  %1286 = vmatpush.msra.mxu2 %v206_v36  ;;  %s1595_s27 = smov 112   ;;  %s1596_s28 = smov 104  }
  0x1a   :  { %s1597_s29 = smov 56   ;;  %s1598_s30 = smov 40  }
  0x1b   :  { %v1355_v9 = vpop.eup %1354  ;;  %238 = vmatpush.msra.mxu0 %v205_v37  ;;  %1287 = vmatpush.msra.mxu2 %v205_v37  ;;  %s1599_s8 = smov 48   ;;  %s1600_s9 = smov 24  }
  0x1c   :  { %v106_v10 = vmul.f32 32.0, %v1355_v9  ;;  %vm110_vm1 = vweird.f32 %v1355_v9  ;;  %s1601_s10 = smov 16   ;;  %s1602_s1 = smov [#allocation11]  }
  0x1d   :  { %239 = vmatpush.msra.mxu0 %v204_v38  ;;  %1288 = vmatpush.msra.mxu2 %v204_v38  ;;  %s1211_s13 = sshll.u32 %s1602_s1, 4  ;;  %s1213_s16 = sshll.u32 %s2093_s7, 4  ;;  %s1212_s13 = int_to_ptr.vmem [resolvable:$true] %s1211_s13  ;;  %s1214_s16 = int_to_ptr.hbm [resolvable:$true] %s1213_s16 }
  0x1e   :  { %103 = vadd.xlane.f32.xlu0 %v102_v6  ;;  %97 = vadd.xlane.f32.xlu1 %v96_v7  ;;  %v107_v11 = vsub.f32 1.0, %v106_v10  ;;  %s1603_s7 = smov [#allocation10]   ;;  %s1200_s19 = sshll.u32 %s2092_s6, 4  ;;  %s1201_s19 = int_to_ptr.hbm [resolvable:$true] %s1200_s19 }
  0x1f   :  { %s1198_s0 = sshll.u32 %s1603_s7, 4  ;;  %s1199_s0 = int_to_ptr.vmem [resolvable:$true] %s1198_s0 }
  0x20   :  { %v108_v12 = vmul.f32 %v1355_v9, %v107_v11 }
  0x22   :  { %v109_v13 = vadd.f32 %v1355_v9, %v108_v12 }
  0x24   :  { %v111_v14 = vsel %vm110_vm1, %v1355_v9, %v109_v13 }
  0x89   :  { %v101_v15 = vpop.xlane.xlu0 %100  ;;  %v95_v16 = vpop.xlane.xlu1 %94 }
  0x8a   :  { %v114_v17 = vmul.f32 %v111_v14, %v101_v15  ;;  %v112_v18 = vmul.f32 %v111_v14, %v95_v16 }
  0x8c   :  { %v1669_v19 = vsub.f32 %v90_v0, %v114_v17  ;;  %v1671_v20 = vsub.f32 %v88_v1, %v112_v18 }
  0x8e   :  { %v122_v21 = vmul.f32 %v1669_v19, %v1669_v19  ;;  %v120_v22 = vmul.f32 %v1671_v20, %v1671_v20 }
  0x90   :  { %v130_v23 = vsel %vm92_vm0, %v122_v21, 0.0  ;;  %v124_v24 = vsel %vm92_vm0, %v120_v22, 0.0 }
  0x91   :  { %131 = vadd.xlane.f32.xlu2 %v130_v23  ;;  %v104_v25 = vpop.xlane.xlu0 %103  ;;  %125 = vadd.xlane.f32.xlu0 %v124_v24  ;;  %v98_v26 = vpop.xlane.xlu1 %97 }
  0x92   :  { %v115_v27 = vmul.f32 %v111_v14, %v104_v25  ;;  %v113_v28 = vmul.f32 %v111_v14, %v98_v26 }
  0x94   :  { %v1679_v29 = vsub.f32 %v91_v4, %v115_v27  ;;  %v1681_v30 = vsub.f32 %v89_v5, %v113_v28 }
  0x96   :  { %v123_v31 = vmul.f32 %v1679_v29, %v1679_v29  ;;  %v121_v32 = vmul.f32 %v1681_v30, %v1681_v30 }
  0x98   :  { %v133_v33 = vsel %vm92_vm0, %v123_v31, 0.0  ;;  %v127_v34 = vsel %vm92_vm0, %v121_v32, 0.0  ;;  %v1353_v32 = vld [vmem:[%s2090_s4] ss:$0 sm:$0xff]  ;;  %s1590_s4 = smov 64  }
  0x99   :  { %134 = vadd.xlane.f32.xlu2 %v133_v33  ;;  %128 = vadd.xlane.f32.xlu1 %v127_v34 }
 0x104   :  { %v132_v39 = vpop.xlane.xlu2 %131  ;;  %v126_v40 = vpop.xlane.xlu0 %125 }
 0x105   :  { %v138_v41 = vmul.f32 %v132_v39, %v111_v14  ;;  %v136_v42 = vmul.f32 %v126_v40, %v111_v14 }
 0x107   :  { %v142_v43 = vadd.f32 1e-05, %v138_v41  ;;  %v140_v44 = vadd.f32 1e-05, %v136_v42 }
 0x109   :  { %1356 = vrsqrt.f32 %v142_v43  ;;  %vm170_vm4 = vweird.f32 %v142_v43  ;;  %vm150_vm6 = vweird.f32 %v140_v44 }
 0x10a   :  { %1358 = vrsqrt.f32 %v140_v44 }
 0x10c   :  { %v135_v45 = vpop.xlane.xlu2 %134  ;;  %v129_v46 = vpop.xlane.xlu1 %128 }
 0x10d   :  { %v139_v47 = vmul.f32 %v135_v45, %v111_v14  ;;  %v137_v48 = vmul.f32 %v129_v46, %v111_v14 }
 0x10f   :  { %v1357_v49 = vpop.eup %1356  ;;  %v143_v50 = vadd.f32 1e-05, %v139_v47  ;;  %v141_v51 = vadd.f32 1e-05, %v137_v48 }
 0x110   :  { %v1359_v52 = vpop.eup %1358  ;;  %v165_v53 = vmul.f32 %v1357_v49, %v142_v43  ;;  %vm171_vm2 = vweird.f32 %v1357_v49 }
 0x111   :  { %v145_v54 = vmul.f32 %v1359_v52, %v140_v44  ;;  %1360 = vrsqrt.f32 %v143_v50  ;;  %vm151_vm3 = vweird.f32 %v1359_v52  ;;  %vm172_vm5 = vmor %vm170_vm4, %vm171_vm2  ;;  %vm180_vm8 = vweird.f32 %v143_v50 }
 0x112   :  { %v166_v55 = vmul.f32 %v1357_v49, %v165_v53  ;;  %1362 = vrsqrt.f32 %v141_v51  ;;  %vm152_vm7 = vmor %vm150_vm6, %vm151_vm3  ;;  %vm160_vm12 = vweird.f32 %v141_v51 }
 0x113   :  { %v146_v56 = vmul.f32 %v1359_v52, %v145_v54 }
 0x114   :  { %v167_v57 = vmul.f32 0.5, %v166_v55 }
 0x115   :  { %v147_v58 = vmul.f32 0.5, %v146_v56 }
 0x116   :  { %v168_v59 = vsub.f32 1.5, %v167_v57 }
 0x117   :  { %v1361_v60 = vpop.eup %1360  ;;  %v148_v61 = vsub.f32 1.5, %v147_v58 }
 0x118   :  { %v1363_v62 = vpop.eup %1362  ;;  %v169_v63 = vmul.f32 %v1357_v49, %v168_v59  ;;  %v175_v0 = vmul.f32 %v1361_v60, %v143_v50  ;;  %vm181_vm9 = vweird.f32 %v1361_v60 }
 0x119   :  { %v149_v1 = vmul.f32 %v1359_v52, %v148_v61  ;;  %v155_v2 = vmul.f32 %v1363_v62, %v141_v51  ;;  %vm161_vm10 = vweird.f32 %v1363_v62  ;;  %vm182_vm11 = vmor %vm180_vm8, %vm181_vm9  ;;  %v253_v61 = vld [vmem:[#allocation8] sm:$0xff] }
 0x11a   :  { %v173_v4 = vsel %vm172_vm5, %v1357_v49, %v169_v63  ;;  %v176_v5 = vmul.f32 %v1361_v60, %v175_v0  ;;  %vm162_vm13 = vmor %vm160_vm12, %vm161_vm10 }
 0x11b   :  { %v153_v6 = vsel %vm152_vm7, %v1359_v52, %v149_v1  ;;  %v156_v7 = vmul.f32 %v1363_v62, %v155_v2  ;;  %v186_v9 = vmul.f32 %v173_v4, %v1669_v19  ;;  %v254_v1 = vld [vmem:[#allocation8 + $0x8] sm:$0xff] }
 0x11c   :  { %v177_v10 = vmul.f32 0.5, %v176_v5  ;;  %v184_v11 = vmul.f32 %v153_v6, %v1671_v20  ;;  %v255_v5 = vld [vmem:[#allocation8 + $0x10] sm:$0xff] }
 0x11d   :  { %v157_v12 = vmul.f32 0.5, %v156_v7  ;;  %v194_v13 = vmul.f32 %v1351_v3, %v186_v9  ;;  %v256_v9 = vld [vmem:[#allocation8 + $0x18] sm:$0xff] }
 0x11e   :  { %v178_v14 = vsub.f32 1.5, %v177_v10  ;;  %v192_v15 = vmul.f32 %v1351_v3, %v184_v11 }
 0x11f   :  { %v158_v16 = vsub.f32 1.5, %v157_v12  ;;  %v202_v17 = vadd.f32 %v1352_v8, %v194_v13 }
 0x120   :  { %v179_v18 = vmul.f32 %v1361_v60, %v178_v14  ;;  %v200_v21 = vadd.f32 %v1352_v8, %v192_v15 }
 0x121   :  { %v159_v22 = vmul.f32 %v1363_v62, %v158_v16  ;;  %1235 = vmatmul.msk.f32.vlgmr.msra.gmra.mxu2 %vm92_vm0, %v202_v17 }
 0x122   :  { %v183_v19 = vsel %vm182_vm11, %v1361_v60, %v179_v18  ;;  %1233 = vmatmul.msk.f32.vlgmr.msra.gmra.mxu0 %vm92_vm0, %v200_v21 }
 0x123   :  { %v163_v20 = vsel %vm162_vm13, %v1363_v62, %v159_v22  ;;  %v187_v23 = vmul.f32 %v183_v19, %v1679_v29 }
 0x124   :  { %v185_v24 = vmul.f32 %v163_v20, %v1681_v30 }
 0x125   :  { %v195_v25 = vmul.f32 %v1351_v3, %v187_v23 }
 0x126   :  { %v193_v26 = vmul.f32 %v1351_v3, %v185_v24 }
 0x127   :  { %v203_v27 = vadd.f32 %v1352_v8, %v195_v25 }
 0x128   :  { %v201_v28 = vadd.f32 %v1352_v8, %v193_v26 }
 0x129   :  { %1236 = vmatmul.msk.f32.gmra.mxu2 %vm92_vm0, %v203_v27 }
 0x12a   :  { %1234 = vmatmul.msk.f32.gmra.mxu0 %vm92_vm0, %v201_v28 }
 0x19f   :  { %v241_v31 = vpop.f32.mrf.mxu0 }
 0x1a0   :  { %v1709_v30 = vadd.f32 %v1353_v32, %v241_v31 }
 0x1a4   :  { %v247_v33 = vpop.f32.mrf.mxu2 }
 0x1a5   :  { %v1703_v34 = vadd.f32 %v1353_v32, %v247_v33 }
 0x1a7   :  { %v244_v35 = vpop.f32.mrf.mxu0  ;;  %265 = vrot.lane.b32.xlu0 %v1703_v34, %s1589_s22 }
 0x1a8   :  { %v1706_v29 = vadd.f32 %v1353_v32, %v244_v35 }
 0x1aa   :  { %263 = vrot.lane.b32.xlu1 %v1706_v29, %s1589_s22  ;;  %v1715_v38 = vpack.i.bf16 %v1709_v30, %v1706_v29 }
 0x1ac   :  { %v250_v36 = vpop.f32.mrf.mxu2 }
 0x1ad   :  { %v1711_v37 = vadd.f32 %v1353_v32, %v250_v36 }
 0x1af   :  { %267 = vrot.lane.b32.xlu2 %v1711_v37, %s1589_s22  ;;  %1312 = vrot.lane.b32.xlu0 %v1715_v38, %s1590_s4  ;;  %v1736_v39 = vpack.i.bf16 %v1703_v34, %v1711_v37 }
 0x1b2   :  { %483 = vrot.lane.b32.xlu1 %v1706_v29, %s1591_s23 }
 0x1b7   :  { %261 = vrot.lane.b32.xlu2 %v1709_v30, %s1589_s22  ;;  %473 = vrot.lane.b32.xlu0 %v1709_v30, %s1592_s24 }
 0x1ba   :  { %481 = vrot.lane.b32.xlu1 %v1709_v30, %s1591_s23 }
 0x1bf   :  { %485 = vrot.lane.b32.xlu2 %v1703_v34, %s1591_s23  ;;  %475 = vrot.lane.b32.xlu0 %v1706_v29, %s1592_s24 }
 0x1c2   :  { %487 = vrot.lane.b32.xlu1 %v1711_v37, %s1591_s23 }
 0x1c7   :  { %705 = vrot.lane.b32.xlu2 %v1703_v34, %s1593_s25  ;;  %477 = vrot.lane.b32.xlu0 %v1703_v34, %s1592_s24 }
 0x1cf   :  { %925 = vrot.lane.b32.xlu0 %v1703_v34, %s1594_s26 }
 0x1d7   :  { %1317 = vrot.lane.b32.xlu0 %v1736_v39, %s1590_s4 }
 0x1df   :  { %707 = vrot.lane.b32.xlu0 %v1711_v37, %s1593_s25 }
 0x1e7   :  { %927 = vrot.lane.b32.xlu0 %v1711_v37, %s1594_s26 }
 0x209   :  { %v268_v40 = vpop.permute.xlu2 %267 }
 0x20a   :  { %1237 = vmatpush.xpose.msk.msra.mxu1 %vm269_vm14, %v268_v40 }
 0x211   :  { %v262_v43 = vpop.permute.xlu2 %261 }
 0x219   :  { %v266_v41 = vpop.permute.xlu0 %265  ;;  %v486_v50 = vpop.permute.xlu2 %485 }
 0x21a   :  { %1238 = vmatpush.xpose.msk.msra.mxu1 %vm269_vm14, %v266_v41 }
 0x21c   :  { %v264_v42 = vpop.permute.xlu1 %263 }
 0x21e   :  { %1239 = vmatpush.xpose.msk.msra.mxu1 %vm269_vm14, %v264_v42  ;;  %v469_v42 = vld [vmem:[#allocation8 + $0x20] sm:$0xff] }
 0x221   :  { %v1313_v44 = vpop.permute.xlu0 %1312  ;;  %v706_v59 = vpop.permute.xlu2 %705 }
 0x222   :  { %1240 = vmatpush.xpose.msk.msra.mxu1 %vm269_vm14, %v262_v43  ;;  %v1314_v56 = vunpack.i.l.bf16 %v1313_v44  ;;  %v1315_v57 = vunpack.i.h.bf16 %v1313_v44 }
 0x224   :  { %v484_v45 = vpop.permute.xlu1 %483 }
 0x225   :  { %1241 = vmatmul.msk.f32.vlgmr.msra.gmra.mxu1 %vm269_vm14, %v1709_v30 }
 0x229   :  { %v474_v46 = vpop.permute.xlu0 %473 }
 0x22c   :  { %v482_v47 = vpop.permute.xlu1 %481 }
 0x22d   :  { %1242 = vmatmul.msk.f32.gmra.mxu1 %vm269_vm14, %v1706_v29 }
 0x231   :  { %v476_v48 = vpop.permute.xlu0 %475 }
 0x234   :  { %v488_v49 = vpop.permute.xlu1 %487 }
 0x235   :  { %1249 = vmatpush.xpose.msk.msra.mxu3 %vm269_vm14, %v488_v49  ;;  %1243 = vmatmul.msk.f32.gmra.mxu1 %vm269_vm14, %v1703_v34 }
 0x239   :  { %1250 = vmatpush.xpose.msk.msra.mxu3 %vm269_vm14, %v486_v50  ;;  %v478_v51 = vpop.permute.xlu0 %477 }
 0x23d   :  { %1251 = vmatpush.xpose.msk.msra.mxu3 %vm269_vm14, %v484_v45  ;;  %1244 = vmatmul.msk.f32.gmra.mxu1 %vm269_vm14, %v1711_v37 }
 0x241   :  { %1252 = vmatpush.xpose.msk.msra.mxu3 %vm269_vm14, %v482_v47  ;;  %v926_v52 = vpop.permute.xlu0 %925 }
 0x244   :  { %1253 = vmatmul.msk.f32.vlgmr.msra.gmra.mxu3 %vm269_vm14, %v474_v46 }
 0x249   :  { %v1318_v53 = vpop.permute.xlu0 %1317 }
 0x24a   :  { %v1319_v54 = vunpack.i.l.bf16 %v1318_v53  ;;  %v1320_v55 = vunpack.i.h.bf16 %v1318_v53 }
 0x24c   :  { %1254 = vmatmul.msk.f32.gmra.mxu3 %vm269_vm14, %v476_v48  ;;  %451 = vmatpush.msrb.mxu2 %v1319_v54 }
 0x24e   :  { %452 = vmatpush.msrb.mxu2 %v1320_v55 }
 0x250   :  { %453 = vmatpush.msrb.mxu2 %v1314_v56 }
 0x251   :  { %v708_v58 = vpop.permute.xlu0 %707 }
 0x252   :  { %454 = vmatpush.msrb.mxu2 %v1315_v57 }
 0x254   :  { %1261 = vmatpush.xpose.msk.msra.mxu2 %vm269_vm14, %v708_v58  ;;  %1255 = vmatmul.msk.f32.gmra.mxu3 %vm269_vm14, %v478_v51 }
 0x258   :  { %1262 = vmatpush.xpose.msk.msra.mxu2 %vm269_vm14, %v706_v59 }
 0x259   :  { %v928_v60 = vpop.permute.xlu0 %927 }
 0x25a   :  { %1273 = vmatpush.xpose.msk.msrb.mxu3 %vm269_vm14, %v928_v60 }
 0x25e   :  { %1274 = vmatpush.xpose.msk.msrb.mxu3 %vm269_vm14, %v926_v52 }
 0x2a2   :  { %v303_v62 = vpop.f32.mrf.mxu1 }
 0x2a3   :  { %v304_v63 = vadd.f32 %v303_v62, %v253_v61 }
 0x2a5   :  { %v315_v0 = vsel %vm92_vm0, %v304_v63, -inf }
 0x2a6   :  { %316 = vmax.xlane.f32.xlu0 %v315_v0 }
 0x2aa   :  { %v306_v2 = vpop.f32.mrf.mxu1 }
 0x2ab   :  { %v307_v3 = vadd.f32 %v306_v2, %v254_v1  ;;  %v470_v2 = vld [vmem:[#allocation8 + $0x28] sm:$0xff] }
 0x2ad   :  { %v318_v4 = vsel %vm92_vm0, %v307_v3, -inf }
 0x2ae   :  { %319 = vmax.xlane.f32.xlu2 %v318_v4 }
 0x2b2   :  { %v309_v6 = vpop.f32.mrf.mxu1 }
 0x2b3   :  { %v310_v7 = vadd.f32 %v309_v6, %v255_v5 }
 0x2b5   :  { %v321_v8 = vsel %vm92_vm0, %v310_v7, -inf }
 0x2b6   :  { %322 = vmax.xlane.f32.xlu1 %v321_v8 }
 0x2ba   :  { %703 = vrot.lane.b32.xlu0 %v1706_v29, %s1593_s25  ;;  %v312_v10 = vpop.f32.mrf.mxu1 }
 0x2bb   :  { %v313_v11 = vadd.f32 %v312_v10, %v256_v9 }
 0x2bd   :  { %v324_v12 = vsel %vm92_vm0, %v313_v11, -inf }
 0x2c7   :  { %v522_v43 = vpop.f32.mrf.mxu3 }
 0x2c8   :  { %v1801_v44 = vadd.f32 %v522_v43, %v469_v42 }
 0x2ca   :  { %v534_v45 = vsel %vm92_vm0, %v1801_v44, -inf }
 0x2cf   :  { %479 = vrot.lane.b32.xlu1 %v1711_v37, %s1592_s24 }
 0x2e4   :  { %325 = vmax.xlane.f32.xlu0 %v324_v12  ;;  %v472_v12 = vld [vmem:[#allocation8 + $0x38] sm:$0xff] }
 0x2f8   :  { %923 = vrot.lane.b32.xlu0 %v1706_v29, %s1594_s26 }
 0x319   :  { %v317_v13 = vpop.xlane.xlu0 %316 }
 0x31a   :  { %v327_v14 = vsub.f32 %v304_v63, %v317_v13  ;;  %v471_v63 = vld [vmem:[#allocation8 + $0x30] sm:$0xff] }
 0x31c   :  { %v331_v15 = vmul.f32 1.442695, %v327_v14 }
 0x31e   :  { %1364 = vpow2.f32 %v331_v15 }
 0x321   :  { %v320_v16 = vpop.xlane.xlu2 %319 }
 0x322   :  { %v328_v17 = vsub.f32 %v307_v3, %v320_v16 }
 0x324   :  { %v1776_v18 = vpop.eup %1364  ;;  %v333_v21 = vmul.f32 1.442695, %v328_v17 }
 0x325   :  { %v339_v22 = vsel %vm92_vm0, %v1776_v18, 0.0 }
 0x326   :  { %1366 = vpow2.f32 %v333_v21  ;;  %340 = vadd.xlane.f32.xlu2 %v339_v22 }
 0x329   :  { %v323_v24 = vpop.xlane.xlu1 %322 }
 0x32a   :  { %v329_v26 = vsub.f32 %v310_v7, %v323_v24 }
 0x32c   :  { %v1780_v19 = vpop.eup %1366  ;;  %v704_v20 = vpop.permute.xlu0 %703  ;;  %v335_v31 = vmul.f32 1.442695, %v329_v26 }
 0x32d   :  { %1263 = vmatpush.xpose.msk.msra.mxu2 %vm269_vm14, %v704_v20  ;;  %v342_v23 = vsel %vm92_vm0, %v1780_v19, 0.0 }
 0x32e   :  { %343 = vadd.xlane.f32.xlu0 %v342_v23 }
 0x33e   :  { %701 = vrot.lane.b32.xlu2 %v1709_v30, %s1593_s25 }
 0x341   :  { %v480_v25 = vpop.permute.xlu1 %479 }
 0x342   :  { %921 = vrot.lane.b32.xlu0 %v1709_v30, %s1594_s26  ;;  %1256 = vmatmul.msk.f32.gmra.mxu3 %vm269_vm14, %v480_v25 }
 0x34a   :  { %695 = vrot.lane.b32.xlu0 %v1706_v29, %s1595_s27 }
 0x352   :  { %917 = vrot.lane.b32.xlu0 %v1703_v34, %s1596_s28 }
 0x357   :  { %v326_v27 = vpop.xlane.xlu0 %325 }
 0x358   :  { %v330_v28 = vsub.f32 %v313_v11, %v326_v27 }
 0x35a   :  { %v337_v32 = vmul.f32 1.442695, %v330_v28 }
 0x35c   :  { %1368 = vpow2.f32 %v337_v32 }
 0x35d   :  { %1370 = vpow2.f32 %v335_v31 }
 0x362   :  { %v1792_v33 = vpop.eup %1368 }
 0x363   :  { %v1794_v35 = vpop.eup %1370  ;;  %v348_v36 = vsel %vm92_vm0, %v1792_v33, 0.0 }
 0x364   :  { %349 = vadd.xlane.f32.xlu1 %v348_v36  ;;  %v345_v40 = vsel %vm92_vm0, %v1794_v35, 0.0 }
 0x367   :  { %346 = vadd.xlane.f32.xlu2 %v345_v40 }
 0x36a   :  { %v924_v41 = vpop.permute.xlu0 %923 }
 0x36b   :  { %1275 = vmatpush.xpose.msk.msrb.mxu3 %vm269_vm14, %v924_v41 }
 0x37c   :  { %535 = vmax.xlane.f32.xlu0 %v534_v45 }
 0x37d   :  { %913 = vrot.lane.b32.xlu1 %v1709_v30, %s1596_s28 }
 0x37f   :  { %693 = vrot.lane.b32.xlu2 %v1709_v30, %s1595_s27  ;;  %v525_v30 = vpop.f32.mrf.mxu3 }
 0x380   :  { %v1817_v7 = vadd.f32 %v525_v30, %v470_v2 }
 0x382   :  { %v537_v11 = vsel %vm92_vm0, %v1817_v7, -inf }
 0x385   :  { %697 = vrot.lane.b32.xlu1 %v1703_v34, %s1595_s27 }
 0x387   :  { %915 = vrot.lane.b32.xlu2 %v1706_v29, %s1596_s28  ;;  %v528_v0 = vpop.f32.mrf.mxu3 }
 0x388   :  { %v1815_v5 = vadd.f32 %v528_v0, %v471_v63 }
 0x38a   :  { %v540_v10 = vsel %vm92_vm0, %v1815_v5, -inf }
 0x38d   :  { %919 = vrot.lane.b32.xlu1 %v1711_v37, %s1596_s28 }
 0x38f   :  { %699 = vrot.lane.b32.xlu2 %v1711_v37, %s1595_s27 }
 0x399   :  { %v341_v46 = vpop.xlane.xlu2 %340 }
 0x39a   :  { %1372 = vrcp.f32 %v341_v46  ;;  %v362_v52 = vand.u32 2147483648, %v341_v46  ;;  %v360_v34 = vand.u32 2147483647, %v341_v46  ;;  %vm356_vm1 = vweird.f32 %v341_v46 }
 0x39c   :  { %v363_v37 = vor.u32 1.1754944e-38, %v362_v52  ;;  %vm361_vm3 = vcmp.eq.f32.partialorder %v360_v34, 8.507059e+37 }
 0x3a0   :  { %v1373_v47 = vpop.eup %1372 }
 0x3a1   :  { %v352_v48 = vmul.f32 %v1373_v47, %v341_v46  ;;  %v702_v49 = vpop.permute.xlu2 %701  ;;  %v344_v50 = vpop.xlane.xlu0 %343  ;;  %vm357_vm15 = vweird.f32 %v1373_v47 }
 0x3a2   :  { %1374 = vrcp.f32 %v344_v50  ;;  %1264 = vmatpush.xpose.msk.msra.mxu2 %vm269_vm14, %v702_v49  ;;  %vm358_vm2 = vmor %vm356_vm1, %vm357_vm15  ;;  %v377_v60 = vand.u32 2147483648, %v344_v50  ;;  %v375_v62 = vand.u32 2147483647, %v344_v50  ;;  %vm371_vm5 = vweird.f32 %v344_v50 }
 0x3a3   :  { %v353_v51 = vsub.f32 1.0, %v352_v48 }
 0x3a4   :  { %v378_v3 = vor.u32 1.1754944e-38, %v377_v60  ;;  %vm376_vm7 = vcmp.eq.f32.partialorder %v375_v62, 8.507059e+37  ;;  %v910_v62 = vld [vmem:[#allocation8 + $0x68] sm:$0xff] }
 0x3a5   :  { %v354_v53 = vmul.f32 %v1373_v47, %v353_v51 }
 0x3a7   :  { %v355_v29 = vadd.f32 %v1373_v47, %v354_v53 }
 0x3a8   :  { %v1375_v54 = vpop.eup %1374 }
 0x3a9   :  { %v367_v55 = vmul.f32 %v1375_v54, %v344_v50  ;;  %v359_v56 = vsel %vm358_vm2, %v1373_v47, %v355_v29  ;;  %vm372_vm4 = vweird.f32 %v1375_v54 }
 0x3aa   :  { %v364_v57 = vsel %vm361_vm3, %v363_v37, %v359_v56  ;;  %vm373_vm6 = vmor %vm371_vm5, %vm372_vm4  ;;  %v909_v37 = vld [vmem:[#allocation8 + $0x60] sm:$0xff] }
 0x3ab   :  { %v368_v58 = vsub.f32 1.0, %v367_v55  ;;  %v365_v59 = vmul.f32 %v1776_v18, %v364_v57 }
 0x3ad   :  { %v369_v61 = vmul.f32 %v1375_v54, %v368_v58  ;;  %411 = vst.msk [vmem:[#allocation11] sm:$0xff] %vm92_vm0, %v365_v59  ;;  %1245 = vmatmul.msk.f32.vlgmr.msrb.gmra.mxu2 %vm92_vm0, %v365_v59 }
 0x3af   :  { %v370_v1 = vadd.f32 %v1375_v54, %v369_v61 }
 0x3b1   :  { %v374_v4 = vsel %vm373_vm6, %v1375_v54, %v370_v1 }
 0x3b2   :  { %v379_v6 = vsel %vm376_vm7, %v378_v3, %v374_v4 }
 0x3b3   :  { %v380_v8 = vmul.f32 %v1780_v19, %v379_v6  ;;  %v911_v6 = vld [vmem:[#allocation8 + $0x70] sm:$0xff] }
 0x3b4   :  { %v922_v9 = vpop.permute.xlu0 %921 }
 0x3b5   :  { %412 = vst.msk [vmem:[#allocation11 + $0x8] sm:$0xff] %vm92_vm0, %v380_v8  ;;  %1246 = vmatmul.msk.f32.gmra.mxu2 %vm92_vm0, %v380_v8  ;;  %1276 = vmatpush.xpose.msk.msrb.mxu3 %vm269_vm14, %v922_v9 }
 0x3b7   :  { %541 = vmax.xlane.f32.xlu1 %v540_v10 }
 0x3b8   :  { %538 = vmax.xlane.f32.xlu2 %v537_v11 }
 0x3bc   :  { %v696_v51 = vpop.permute.xlu0 %695 }
 0x3c4   :  { %v918_v30 = vpop.permute.xlu0 %917 }
 0x3c5   :  { %v531_v13 = vpop.f32.mrf.mxu3 }
 0x3c6   :  { %v1827_v14 = vadd.f32 %v531_v13, %v472_v12  ;;  %v912_v13 = vld [vmem:[#allocation8 + $0x78] sm:$0xff] }
 0x3c8   :  { %v543_v15 = vsel %vm92_vm0, %v1827_v14, -inf }
 0x3c9   :  { %544 = vmax.xlane.f32.xlu2 %v543_v15 }
 0x3d7   :  { %v350_v16 = vpop.xlane.xlu1 %349 }
 0x3d8   :  { %1376 = vrcp.f32 %v350_v16  ;;  %v407_v20 = vand.u32 2147483648, %v350_v16  ;;  %v405_v25 = vand.u32 2147483647, %v350_v16  ;;  %vm401_vm9 = vweird.f32 %v350_v16 }
 0x3da   :  { %v347_v17 = vpop.xlane.xlu2 %346  ;;  %v408_v31 = vor.u32 1.1754944e-38, %v407_v20  ;;  %vm406_vm12 = vcmp.eq.f32.partialorder %v405_v25, 8.507059e+37  ;;  %v689_v20 = vld [vmem:[#allocation8 + $0x40] sm:$0xff] }
 0x3db   :  { %1378 = vrcp.f32 %v347_v17  ;;  %v392_v27 = vand.u32 2147483648, %v347_v17  ;;  %v390_v36 = vand.u32 2147483647, %v347_v17  ;;  %vm386_vm13 = vweird.f32 %v347_v17 }
 0x3dd   :  { %v393_v43 = vor.u32 1.1754944e-38, %v392_v27  ;;  %vm391_vm1 = vcmp.eq.f32.partialorder %v390_v36, 8.507059e+37 }
 0x3de   :  { %v1377_v18 = vpop.eup %1376 }
 0x3df   :  { %v397_v21 = vmul.f32 %v1377_v18, %v350_v16  ;;  %vm402_vm8 = vweird.f32 %v1377_v18 }
 0x3e0   :  { %vm403_vm11 = vmor %vm401_vm9, %vm402_vm8 }
 0x3e1   :  { %v1379_v22 = vpop.eup %1378  ;;  %v398_v19 = vsub.f32 1.0, %v397_v21 }
 0x3e2   :  { %v382_v23 = vmul.f32 %v1379_v22, %v347_v17  ;;  %vm387_vm10 = vweird.f32 %v1379_v22  ;;  %v694_v49 = vpop.permute.xlu2 %693 }
 0x3e3   :  { %v399_v24 = vmul.f32 %v1377_v18, %v398_v19  ;;  %vm388_vm15 = vmor %vm386_vm13, %vm387_vm10 }
 0x3e4   :  { %v383_v26 = vsub.f32 1.0, %v382_v23  ;;  %v690_v23 = vld [vmem:[#allocation8 + $0x48] sm:$0xff] }
 0x3e5   :  { %v400_v28 = vadd.f32 %v1377_v18, %v399_v24  ;;  %v691_v24 = vld [vmem:[#allocation8 + $0x50] sm:$0xff] }
 0x3e6   :  { %v384_v32 = vmul.f32 %v1379_v22, %v383_v26 }
 0x3e7   :  { %v404_v40 = vsel %vm403_vm11, %v1377_v18, %v400_v28 }
 0x3e8   :  { %v385_v41 = vadd.f32 %v1379_v22, %v384_v32  ;;  %v409_v42 = vsel %vm406_vm12, %v408_v31, %v404_v40 }
 0x3e9   :  { %v410_v45 = vmul.f32 %v1792_v33, %v409_v42  ;;  %v692_v42 = vld [vmem:[#allocation8 + $0x58] sm:$0xff] }
 0x3ea   :  { %v389_v46 = vsel %vm388_vm15, %v1379_v22, %v385_v41  ;;  %v916_v52 = vpop.permute.xlu2 %915 }
 0x3eb   :  { %v394_v47 = vsel %vm391_vm1, %v393_v43, %v389_v46  ;;  %414 = vst.msk [vmem:[#allocation11 + $0x18] sm:$0xff] %vm92_vm0, %v410_v45 }
 0x3ec   :  { %v395_v48 = vmul.f32 %v1794_v35, %v394_v47 }
 0x3ee   :  { %413 = vst.msk [vmem:[#allocation11 + $0x10] sm:$0xff] %vm92_vm0, %v395_v48  ;;  %1247 = vmatmul.msk.f32.gmra.mxu2 %vm92_vm0, %v395_v48 }
 0x3ef   :  { %v914_v50 = vpop.permute.xlu1 %913  ;;  %v536_v55 = vpop.xlane.xlu0 %535 }
 0x3f0   :  { %1277 = vmatmul.msk.f32.vlgmr.msrb.gmra.mxu3 %vm269_vm14, %v914_v50  ;;  %v546_v58 = vsub.f32 %v1801_v44, %v536_v55 }
 0x3f2   :  { %v700_v53 = vpop.permute.xlu2 %699  ;;  %v550_v60 = vmul.f32 1.442695, %v546_v58 }
 0x3f4   :  { %1380 = vpow2.f32 %v550_v60 }
 0x3f6   :  { %1248 = vmatmul.msk.f32.gmra.mxu2 %vm92_vm0, %v410_v45 }
 0x3f7   :  { %v698_v33 = vpop.permute.xlu1 %697 }
 0x3f8   :  { %1278 = vmatmul.msk.f32.gmra.mxu3 %vm269_vm14, %v916_v52 }
 0x3fa   :  { %v1863_v8 = vpop.eup %1380 }
 0x3fb   :  { %v558_v12 = vsel %vm92_vm0, %v1863_v8, 0.0 }
 0x3fe   :  { %1265 = vmatmul.msk.f32.vlgmr.msra.gmra.mxu2 %vm269_vm14, %v694_v49 }
 0x3ff   :  { %v920_v35 = vpop.permute.xlu1 %919 }
 0x400   :  { %1279 = vmatmul.msk.f32.gmra.mxu3 %vm269_vm14, %v918_v30 }
 0x406   :  { %1266 = vmatmul.msk.f32.gmra.mxu2 %vm269_vm14, %v696_v51 }
 0x408   :  { %1280 = vmatmul.msk.f32.gmra.mxu3 %vm269_vm14, %v920_v35 }
 0x40e   :  { %1267 = vmatmul.msk.f32.gmra.mxu2 %vm269_vm14, %v698_v33 }
 0x416   :  { %1268 = vmatmul.msk.f32.gmra.mxu2 %vm269_vm14, %v700_v53 }
 0x42a   :  { %v542_v15 = vpop.xlane.xlu1 %541 }
 0x42b   :  { %v539_v63 = vpop.xlane.xlu2 %538  ;;  %v548_v21 = vsub.f32 %v1815_v5, %v542_v15 }
 0x42c   :  { %v547_v2 = vsub.f32 %v1817_v7, %v539_v63 }
 0x42d   :  { %v554_v25 = vmul.f32 1.442695, %v548_v21 }
 0x42e   :  { %v552_v44 = vmul.f32 1.442695, %v547_v2 }
 0x430   :  { %v1845_v34 = vpop.f32.mrf.mxu2  ;;  %1382 = vpow2.f32 %v552_v44 }
 0x431   :  { %1384 = vpow2.f32 %v554_v25 }
 0x436   :  { %v1871_v16 = vpop.eup %1382 }
 0x437   :  { %v561_v22 = vsel %vm92_vm0, %v1871_v16, 0.0  ;;  %v1892_v47 = vpop.eup %1384 }
 0x438   :  { %v1847_v29 = vpop.f32.mrf.mxu2 }
 0x43c   :  { %v545_v27 = vpop.xlane.xlu2 %544 }
 0x43d   :  { %v549_v36 = vsub.f32 %v1827_v14, %v545_v27  ;;  %v564_v14 = vsel %vm92_vm0, %v1892_v47, 0.0 }
 0x43f   :  { %v556_v43 = vmul.f32 1.442695, %v549_v36 }
 0x441   :  { %1386 = vpow2.f32 %v556_v43 }
 0x447   :  { %v1898_v49 = vpop.eup %1386 }
 0x448   :  { %v567_v50 = vsel %vm92_vm0, %v1898_v49, 0.0 }
 0x471   :  { %v1849_v54 = vpop.f32.mrf.mxu2 }
 0x473   :  { %v962_v56 = vpop.f32.mrf.mxu3 }
 0x474   :  { %v1851_v57 = vadd.f32 %v962_v56, %v909_v37 }
 0x476   :  { %v974_v59 = vsel %vm92_vm0, %v1851_v57, -inf }
 0x477   :  { %975 = vmax.xlane.f32.xlu1 %v974_v59 }
 0x479   :  { %v1856_v61 = vpop.f32.mrf.mxu2 }
 0x47b   :  { %v965_v0 = vpop.f32.mrf.mxu3 }
 0x47c   :  { %v1858_v1 = vadd.f32 %v965_v0, %v910_v62 }
 0x47e   :  { %v977_v3 = vsel %vm92_vm0, %v1858_v1, -inf }
 0x47f   :  { %978 = vmax.xlane.f32.xlu0 %v977_v3 }
 0x481   :  { %v742_v4 = vpop.f32.mrf.mxu2 }
 0x482   :  { %v1880_v28 = vadd.f32 %v742_v4, %v689_v20 }
 0x483   :  { %v968_v9 = vpop.f32.mrf.mxu3 }
 0x484   :  { %v1865_v10 = vadd.f32 %v968_v9, %v911_v6  ;;  %v754_v40 = vsel %vm92_vm0, %v1880_v28, -inf }
 0x486   :  { %v980_v11 = vsel %vm92_vm0, %v1865_v10, -inf }
 0x487   :  { %981 = vmax.xlane.f32.xlu2 %v980_v11  ;;  %559 = vadd.xlane.f32.xlu0 %v558_v12 }
 0x489   :  { %v745_v7 = vpop.f32.mrf.mxu2 }
 0x48a   :  { %v1882_v31 = vadd.f32 %v745_v7, %v690_v23 }
 0x48b   :  { %v971_v17 = vpop.f32.mrf.mxu3 }
 0x48c   :  { %v1873_v18 = vadd.f32 %v971_v17, %v912_v13  ;;  %v757_v41 = vsel %vm92_vm0, %v1882_v31, -inf }
 0x48e   :  { %v983_v19 = vsel %vm92_vm0, %v1873_v18, -inf }
 0x48f   :  { %562 = vadd.xlane.f32.xlu0 %v561_v22  ;;  %984 = vmax.xlane.f32.xlu2 %v983_v19 }
 0x491   :  { %v748_v26 = vpop.f32.mrf.mxu2 }
 0x492   :  { %v749_v32 = vadd.f32 %v748_v26, %v691_v24 }
 0x494   :  { %v760_v5 = vsel %vm92_vm0, %v749_v32, -inf }
 0x495   :  { %761 = vmax.xlane.f32.xlu1 %v760_v5 }
 0x497   :  { %755 = vmax.xlane.f32.xlu0 %v754_v40  ;;  %758 = vmax.xlane.f32.xlu2 %v757_v41 }
 0x499   :  { %v751_v45 = vpop.f32.mrf.mxu2 }
 0x49a   :  { %v1890_v46 = vadd.f32 %v751_v45, %v692_v42 }
 0x49c   :  { %v763_v48 = vsel %vm92_vm0, %v1890_v46, -inf }
 0x49d   :  { %764 = vmax.xlane.f32.xlu1 %v763_v48 }
 0x49f   :  { %565 = vadd.xlane.f32.xlu2 %v564_v14 }
 0x4a7   :  { %568 = vadd.xlane.f32.xlu2 %v567_v50 }
 0x4ab   :  { %1327 = vrot.lane.b32.xlu0 %v1715_v38, %s1597_s29 }
 0x4b6   :  { %1322 = vrot.lane.b32.xlu1 %v1736_v39, %s1597_s29 }
 0x4ea   :  { %v976_v51 = vpop.xlane.xlu1 %975 }
 0x4eb   :  { %v986_v52 = vsub.f32 %v1851_v57, %v976_v51 }
 0x4ed   :  { %v990_v33 = vmul.f32 1.442695, %v986_v52 }
 0x4ef   :  { %1388 = vpow2.f32 %v990_v33 }
 0x4f2   :  { %v979_v30 = vpop.xlane.xlu0 %978 }
 0x4f3   :  { %v987_v22 = vsub.f32 %v1858_v1, %v979_v30 }
 0x4f5   :  { %v1905_v35 = vpop.eup %1388 }
 0x4f6   :  { %v998_v53 = vsel %vm92_vm0, %v1905_v35, 0.0 }
 0x4f7   :  { %999 = vadd.xlane.f32.xlu0 %v998_v53 }
 0x4fa   :  { %v982_v37 = vpop.xlane.xlu2 %981  ;;  %v560_v55 = vpop.xlane.xlu0 %559 }
 0x4fb   :  { %1390 = vrcp.f32 %v560_v55  ;;  %v581_v57 = vand.u32 2147483648, %v560_v55  ;;  %v579_v0 = vand.u32 2147483647, %v560_v55  ;;  %vm575_vm3 = vweird.f32 %v560_v55 }
 0x4fc   :  { %v988_v25 = vsub.f32 %v1865_v10, %v982_v37 }
 0x4fd   :  { %v582_v4 = vor.u32 1.1754944e-38, %v581_v57  ;;  %vm580_vm5 = vcmp.eq.f32.partialorder %v579_v0, 8.507059e+37 }
 0x501   :  { %v1391_v56 = vpop.eup %1390 }
 0x502   :  { %v571_v58 = vmul.f32 %v1391_v56, %v560_v55  ;;  %v563_v59 = vpop.xlane.xlu0 %562  ;;  %v1909_v60 = vpop.xlane.xlu2 %984  ;;  %vm576_vm2 = vweird.f32 %v1391_v56 }
 0x503   :  { %1392 = vrcp.f32 %v563_v59  ;;  %vm577_vm4 = vmor %vm575_vm3, %vm576_vm2  ;;  %v596_v27 = vand.u32 2147483648, %v563_v59  ;;  %vm590_vm7 = vweird.f32 %v563_v59  ;;  %v989_v48 = vsub.f32 %v1873_v18, %v1909_v60 }
 0x504   :  { %v572_v62 = vsub.f32 1.0, %v571_v58 }
 0x505   :  { %v996_v52 = vmul.f32 1.442695, %v989_v48 }
 0x506   :  { %v573_v63 = vmul.f32 %v1391_v56, %v572_v62 }
 0x508   :  { %v574_v2 = vadd.f32 %v1391_v56, %v573_v63  ;;  %v762_v3 = vpop.xlane.xlu1 %761 }
 0x509   :  { %v1393_v44 = vpop.eup %1392  ;;  %v768_v6 = vsub.f32 %v749_v32, %v762_v3  ;;  %v597_v32 = vor.u32 1.1754944e-38, %v596_v27 }
 0x50a   :  { %v586_v9 = vmul.f32 %v1393_v44, %v563_v59  ;;  %v756_v11 = vpop.xlane.xlu0 %755  ;;  %v759_v12 = vpop.xlane.xlu2 %758  ;;  %v578_v7 = vsel %vm577_vm4, %v1391_v56, %v574_v2  ;;  %vm591_vm6 = vweird.f32 %v1393_v44 }
 0x50b   :  { %v774_v13 = vmul.f32 1.442695, %v768_v6  ;;  %v766_v15 = vsub.f32 %v1880_v28, %v756_v11  ;;  %v767_v17 = vsub.f32 %v1882_v31, %v759_v12  ;;  %v583_v21 = vsel %vm580_vm5, %v582_v4, %v578_v7  ;;  %vm592_vm8 = vmor %vm590_vm7, %vm591_vm6 }
 0x50c   :  { %v587_v19 = vsub.f32 1.0, %v586_v9  ;;  %v1915_v20 = vmul.f32 %v1863_v8, %v583_v21  ;;  %v594_v28 = vand.u32 2147483647, %v563_v59  ;;  %v992_v31 = vmul.f32 1.442695, %v987_v22 }
 0x50d   :  { %1394 = vpow2.f32 %v774_v13  ;;  %v770_v23 = vmul.f32 1.442695, %v766_v15  ;;  %v772_v24 = vmul.f32 1.442695, %v767_v17  ;;  %v994_v8 = vmul.f32 1.442695, %v988_v25 }
 0x50e   :  { %v588_v26 = vmul.f32 %v1393_v44, %v587_v19  ;;  %631 = vst.msk [vmem:[#allocation11 + $0x20] sm:$0xff] %vm92_vm0, %v1915_v20  ;;  %vm595_vm9 = vcmp.eq.f32.partialorder %v594_v28, 8.507059e+37 }
 0x50f   :  { %1396 = vpow2.f32 %v770_v23 }
 0x510   :  { %1398 = vpow2.f32 %v772_v24  ;;  %v589_v1 = vadd.f32 %v1393_v44, %v588_v26  ;;  %v765_v60 = vpop.xlane.xlu1 %764 }
 0x512   :  { %v566_v5 = vpop.xlane.xlu2 %565  ;;  %v593_v36 = vsel %vm592_vm8, %v1393_v44, %v589_v1 }
 0x513   :  { %v1920_v40 = vpop.eup %1394  ;;  %1400 = vrcp.f32 %v566_v5  ;;  %v598_v41 = vsel %vm595_vm9, %v597_v32, %v593_v36  ;;  %v611_v37 = vand.u32 2147483648, %v566_v5  ;;  %v609_v58 = vand.u32 2147483647, %v566_v5 }
 0x514   :  { %1402 = vpow2.f32 %v992_v31  ;;  %v784_v10 = vsel %vm92_vm0, %v1920_v40, 0.0  ;;  %v1927_v43 = vmul.f32 %v1871_v16, %v598_v41  ;;  %vm605_vm11 = vweird.f32 %v566_v5 }
 0x515   :  { %v1924_v42 = vpop.eup %1396  ;;  %785 = vadd.xlane.f32.xlu0 %v784_v10  ;;  %1404 = vpow2.f32 %v994_v8  ;;  %v612_v63 = vor.u32 1.1754944e-38, %v611_v37  ;;  %vm610_vm13 = vcmp.eq.f32.partialorder %v609_v58, 8.507059e+37 }
 0x516   :  { %v1929_v45 = vpop.eup %1398  ;;  %v778_v14 = vsel %vm92_vm0, %v1924_v42, 0.0  ;;  %632 = vst.msk [vmem:[#allocation11 + $0x28] sm:$0xff] %vm92_vm0, %v1927_v43 }
 0x517   :  { %v781_v50 = vsel %vm92_vm0, %v1929_v45, 0.0  ;;  %779 = vadd.xlane.f32.xlu2 %v778_v14 }
 0x518   :  { %782 = vadd.xlane.f32.xlu1 %v781_v50 }
 0x519   :  { %v1401_v51 = vpop.eup %1400 }
 0x51a   :  { %v1939_v16 = vpop.eup %1402  ;;  %v601_v33 = vmul.f32 %v1401_v51, %v566_v5  ;;  %v569_v30 = vpop.xlane.xlu2 %568  ;;  %vm606_vm10 = vweird.f32 %v1401_v51 }
 0x51b   :  { %1406 = vrcp.f32 %v569_v30  ;;  %v1941_v53 = vpop.eup %1404  ;;  %v1001_v55 = vsel %vm92_vm0, %v1939_v16, 0.0  ;;  %vm607_vm12 = vmor %vm605_vm11, %vm606_vm10  ;;  %v626_v9 = vand.u32 2147483648, %v569_v30  ;;  %v624_v12 = vand.u32 2147483647, %v569_v30 }
 0x51c   :  { %v602_v18 = vsub.f32 1.0, %v601_v33  ;;  %1408 = vpow2.f32 %v996_v52  ;;  %v1004_v59 = vsel %vm92_vm0, %v1941_v53, 0.0  ;;  %vm620_vm1 = vweird.f32 %v569_v30 }
 0x51d   :  { %v627_v17 = vor.u32 1.1754944e-38, %v626_v9  ;;  %vm625_vm3 = vcmp.eq.f32.partialorder %v624_v12, 8.507059e+37 }
 0x51e   :  { %v603_v56 = vmul.f32 %v1401_v51, %v602_v18 }
 0x51f   :  { %1002 = vadd.xlane.f32.xlu2 %v1001_v55 }
 0x520   :  { %1005 = vadd.xlane.f32.xlu1 %v1004_v59  ;;  %v604_v62 = vadd.f32 %v1401_v51, %v603_v56 }
 0x521   :  { %v1407_v57 = vpop.eup %1406 }
 0x522   :  { %v616_v0 = vmul.f32 %v1407_v57, %v569_v30  ;;  %v608_v2 = vsel %vm607_vm12, %v1401_v51, %v604_v62  ;;  %v1947_v44 = vpop.eup %1408  ;;  %vm621_vm15 = vweird.f32 %v1407_v57 }
 0x523   :  { %v613_v3 = vsel %vm610_vm13, %v612_v63, %v608_v2  ;;  %v1007_v7 = vsel %vm92_vm0, %v1947_v44, 0.0  ;;  %vm622_vm2 = vmor %vm620_vm1, %vm621_vm15 }
 0x524   :  { %v617_v4 = vsub.f32 1.0, %v616_v0  ;;  %v614_v6 = vmul.f32 %v1892_v47, %v613_v3  ;;  %v1328_v47 = vpop.permute.xlu0 %1327 }
 0x525   :  { %v1329_v25 = vunpack.i.l.bf16 %v1328_v47  ;;  %v1330_v26 = vunpack.i.h.bf16 %v1328_v47 }
 0x526   :  { %v618_v11 = vmul.f32 %v1407_v57, %v617_v4  ;;  %633 = vst.msk [vmem:[#allocation11 + $0x30] sm:$0xff] %vm92_vm0, %v614_v6 }
 0x528   :  { %1008 = vadd.xlane.f32.xlu1 %v1007_v7  ;;  %v1323_v13 = vpop.permute.xlu1 %1322  ;;  %v619_v15 = vadd.f32 %v1407_v57, %v618_v11 }
 0x529   :  { %1347 = vrot.lane.b32.xlu0 %v1715_v38, %s1598_s30  ;;  %v1324_v21 = vunpack.i.l.bf16 %v1323_v13  ;;  %v1325_v19 = vunpack.i.h.bf16 %v1323_v13 }
 0x52a   :  { %v623_v22 = vsel %vm622_vm2, %v1407_v57, %v619_v15 }
 0x52b   :  { %671 = vmatpush.msrb.mxu0 %v1324_v21  ;;  %v628_v23 = vsel %vm625_vm3, %v627_v17, %v623_v22 }
 0x52c   :  { %v629_v24 = vmul.f32 %v1898_v49, %v628_v23  ;;  %v769_v49 = vsub.f32 %v1890_v46, %v765_v60 }
 0x52d   :  { %672 = vmatpush.msrb.mxu0 %v1325_v19 }
 0x52e   :  { %634 = vst.msk [vmem:[#allocation11 + $0x38] sm:$0xff] %vm92_vm0, %v629_v24  ;;  %v776_v27 = vmul.f32 1.442695, %v769_v49 }
 0x52f   :  { %673 = vmatpush.msrb.mxu0 %v1329_v25 }
 0x530   :  { %1410 = vpow2.f32 %v776_v27 }
 0x531   :  { %674 = vmatpush.msrb.mxu0 %v1330_v26 }
 0x532   :  { %1257 = vmatmul.msk.f32.vlgmr.msrb.gmra.mxu0 %vm92_vm0, %v1915_v20 }
 0x536   :  { %v1966_v20 = vpop.eup %1410 }
 0x537   :  { %1332 = vrot.lane.b32.xlu2 %v1736_v39, %s1599_s8  ;;  %v787_v31 = vsel %vm92_vm0, %v1966_v20, 0.0 }
 0x53a   :  { %1258 = vmatmul.msk.f32.gmra.mxu0 %vm92_vm0, %v1927_v43 }
 0x53f   :  { %1337 = vrot.lane.b32.xlu2 %v1736_v39, %s1598_s30 }
 0x542   :  { %1259 = vmatmul.msk.f32.gmra.mxu0 %vm92_vm0, %v614_v6 }
 0x547   :  { %1342 = vrot.lane.b32.xlu2 %v1715_v38, %s1599_s8 }
 0x54a   :  { %1260 = vmatmul.msk.f32.gmra.mxu0 %vm92_vm0, %v629_v24 }
 0x56a   :  { %v1000_v28 = vpop.xlane.xlu0 %999 }
 0x56b   :  { %1412 = vrcp.f32 %v1000_v28  ;;  %v1021_v32 = vand.u32 2147483648, %v1000_v28  ;;  %v1019_v38 = vand.u32 2147483647, %v1000_v28  ;;  %vm1015_vm5 = vweird.f32 %v1000_v28 }
 0x56d   :  { %v1022_v46 = vor.u32 1.1754944e-38, %v1021_v32  ;;  %vm1020_vm7 = vcmp.eq.f32.partialorder %v1019_v38, 8.507059e+37 }
 0x570   :  { %788 = vadd.xlane.f32.xlu2 %v787_v31 }
 0x571   :  { %v1413_v1 = vpop.eup %1412 }
 0x572   :  { %v1011_v39 = vmul.f32 %v1413_v1, %v1000_v28  ;;  %vm1016_vm4 = vweird.f32 %v1413_v1 }
 0x573   :  { %vm1017_vm6 = vmor %vm1015_vm5, %vm1016_vm4 }
 0x574   :  { %v1012_v8 = vsub.f32 1.0, %v1011_v39 }
 0x576   :  { %v1013_v5 = vmul.f32 %v1413_v1, %v1012_v8 }
 0x578   :  { %v1014_v36 = vadd.f32 %v1413_v1, %v1013_v5 }
 0x57a   :  { %v1018_v10 = vsel %vm1017_vm6, %v1413_v1, %v1014_v36 }
 0x57b   :  { %v1023_v41 = vsel %vm1020_vm7, %v1022_v46, %v1018_v10 }
 0x57c   :  { %v1971_v43 = vmul.f32 %v1905_v35, %v1023_v41 }
 0x57e   :  { %1071 = vst.msk [vmem:[#allocation11 + $0x60] sm:$0xff] %vm92_vm0, %v1971_v43 }
 0x588   :  { %v786_v48 = vpop.xlane.xlu0 %785 }
 0x589   :  { %1414 = vrcp.f32 %v786_v48  ;;  %v831_v35 = vand.u32 2147483648, %v786_v48  ;;  %v829_v59 = vand.u32 2147483647, %v786_v48  ;;  %vm825_vm9 = vweird.f32 %v786_v48 }
 0x58a   :  { %v780_v14 = vpop.xlane.xlu2 %779 }
 0x58b   :  { %1416 = vrcp.f32 %v780_v14  ;;  %v783_v50 = vpop.xlane.xlu1 %782  ;;  %v799_v57 = vand.u32 2147483647, %v780_v14  ;;  %v801_v63 = vand.u32 2147483648, %v780_v14  ;;  %v832_v4 = vor.u32 1.1754944e-38, %v831_v35 }
 0x58c   :  { %1418 = vrcp.f32 %v783_v50  ;;  %vm795_vm11 = vweird.f32 %v780_v14  ;;  %v816_v9 = vand.u32 2147483648, %v783_v50  ;;  %v814_v12 = vand.u32 2147483647, %v783_v50 }
 0x58d   :  { %vm830_vm13 = vcmp.eq.f32.partialorder %v829_v59, 8.507059e+37  ;;  %vm800_vm1 = vcmp.eq.f32.partialorder %v799_v57, 8.507059e+37  ;;  %v802_v17 = vor.u32 1.1754944e-38, %v801_v63  ;;  %vm810_vm3 = vweird.f32 %v783_v50 }
 0x58e   :  { %v817_v31 = vor.u32 1.1754944e-38, %v816_v9  ;;  %vm2001_vm4 = vcmp.eq.f32.partialorder %v814_v12, 8.507059e+37 }
 0x58f   :  { %v1415_v51 = vpop.eup %1414 }
 0x590   :  { %v821_v52 = vmul.f32 %v1415_v51, %v786_v48  ;;  %vm826_vm8 = vweird.f32 %v1415_v51 }
 0x591   :  { %v1417_v33 = vpop.eup %1416  ;;  %vm827_vm12 = vmor %vm825_vm9, %vm826_vm8 }
 0x592   :  { %v1975_v30 = vpop.eup %1418  ;;  %v822_v18 = vsub.f32 1.0, %v821_v52  ;;  %v791_v37 = vmul.f32 %v1417_v33, %v780_v14  ;;  %v1977_v55 = vpop.xlane.xlu2 %1002  ;;  %vm796_vm10 = vweird.f32 %v1417_v33 }
 0x593   :  { %v806_v56 = vmul.f32 %v1975_v30, %v783_v50  ;;  %1420 = vrcp.f32 %v1977_v55  ;;  %v1981_v58 = vpop.xlane.xlu1 %1005  ;;  %vm1985_vm15 = vmor %vm795_vm11, %vm796_vm10  ;;  %vm811_vm2 = vweird.f32 %v1975_v30  ;;  %v1034_v36 = vand.u32 2147483647, %v1977_v55 }
 0x594   :  { %v823_v60 = vmul.f32 %v1415_v51, %v822_v18  ;;  %v792_v62 = vsub.f32 1.0, %v791_v37  ;;  %1422 = vrcp.f32 %v1981_v58  ;;  %vm812_vm5 = vmor %vm810_vm3, %vm811_vm2  ;;  %vm1030_vm7 = vweird.f32 %v1977_v55 }
 0x595   :  { %v807_v0 = vsub.f32 1.0, %v806_v56  ;;  %v1051_v41 = vand.u32 2147483648, %v1981_v58  ;;  %v1049_v50 = vand.u32 2147483647, %v1981_v58  ;;  %vm1045_vm10 = vweird.f32 %v1981_v58 }
 0x596   :  { %v793_v2 = vmul.f32 %v1417_v33, %v792_v62  ;;  %v824_v3 = vadd.f32 %v1415_v51, %v823_v60  ;;  %vm1035_vm11 = vcmp.eq.f32.partialorder %v1034_v36, 8.507059e+37 }
 0x597   :  { %v808_v6 = vmul.f32 %v1975_v30, %v807_v0  ;;  %v1052_v37 = vor.u32 1.1754944e-38, %v1051_v41 }
 0x598   :  { %v794_v11 = vadd.f32 %v1417_v33, %v793_v2  ;;  %v828_v7 = vsel %vm827_vm12, %v1415_v51, %v824_v3 }
 0x599   :  { %v1421_v13 = vpop.eup %1420  ;;  %v833_v21 = vsel %vm830_vm13, %v832_v4, %v828_v7  ;;  %v809_v24 = vadd.f32 %v1975_v30, %v808_v6  ;;  %vm1050_vm13 = vcmp.eq.f32.partialorder %v1049_v50, 8.507059e+37 }
 0x59a   :  { %v1423_v47 = vpop.eup %1422  ;;  %v1026_v22 = vmul.f32 %v1421_v13, %v1977_v55  ;;  %v1333_v19 = vpop.permute.xlu2 %1332  ;;  %v798_v23 = vsel %vm1985_vm15, %v1417_v33, %v794_v11  ;;  %v1995_v25 = vmul.f32 %v1920_v40, %v833_v21  ;;  %v1036_v40 = vand.u32 2147483648, %v1977_v55 }
 0x59b   :  { %v1041_v26 = vmul.f32 %v1423_v47, %v1981_v58  ;;  %v1998_v49 = vpop.xlane.xlu1 %1008  ;;  %v1334_v27 = vunpack.i.l.bf16 %v1333_v19  ;;  %v803_v28 = vsel %vm800_vm1, %v802_v17, %v798_v23  ;;  %v1335_v32 = vunpack.i.h.bf16 %v1333_v19 }
 0x59c   :  { %v1027_v1 = vsub.f32 1.0, %v1026_v22  ;;  %1424 = vrcp.f32 %v1998_v49  ;;  %853 = vst.msk [vmem:[#allocation11 + $0x50] sm:$0xff] %vm92_vm0, %v1995_v25  ;;  %v2009_v5 = vmul.f32 %v1924_v42, %v803_v28  ;;  %vm1031_vm6 = vweird.f32 %v1421_v13 }
 0x59d   :  { %v1042_v8 = vsub.f32 1.0, %v1041_v26  ;;  %891 = vmatpush.msrb.mxu1 %v1334_v27  ;;  %v813_v46 = vsel %vm812_vm5, %v1975_v30, %v809_v24  ;;  %vm1046_vm8 = vweird.f32 %v1423_v47  ;;  %v1037_v51 = vor.u32 1.1754944e-38, %v1036_v40  ;;  %vm1032_vm9 = vmor %vm1030_vm7, %vm1031_vm6 }
 0x59e   :  { %v1028_v38 = vmul.f32 %v1421_v13, %v1027_v1  ;;  %851 = vst.msk [vmem:[#allocation11 + $0x40] sm:$0xff] %vm92_vm0, %v2009_v5  ;;  %v818_v42 = vsel %vm2001_vm4, %v817_v31, %v813_v46  ;;  %vm1047_vm12 = vmor %vm1045_vm10, %vm1046_vm8  ;;  %v1066_v63 = vand.u32 2147483648, %v1998_v49  ;;  %v1064_v4 = vand.u32 2147483647, %v1998_v49 }
 0x59f   :  { %v1043_v10 = vmul.f32 %v1423_v47, %v1042_v8  ;;  %892 = vmatpush.msrb.mxu1 %v1335_v32  ;;  %v819_v14 = vmul.f32 %v1929_v45, %v818_v42  ;;  %v1348_v45 = vpop.permute.xlu0 %1347  ;;  %vm1060_vm1 = vweird.f32 %v1998_v49  ;;  %vm1185_vm8 = vcmask 195584  }
 0x5a0   :  { %v1029_v48 = vadd.f32 %v1421_v13, %v1028_v38  ;;  %v1349_v3 = vunpack.i.l.bf16 %v1348_v45  ;;  %v1067_v9 = vor.u32 1.1754944e-38, %v1066_v63  ;;  %vm1065_vm3 = vcmp.eq.f32.partialorder %v1064_v4, 8.507059e+37 }
 0x5a1   :  { %v1044_v52 = vadd.f32 %v1423_v47, %v1043_v10  ;;  %852 = vst.msk [vmem:[#allocation11 + $0x48] sm:$0xff] %vm92_vm0, %v819_v14 }
 0x5a2   :  { %v1425_v33 = vpop.eup %1424  ;;  %v1338_v30 = vpop.permute.xlu2 %1337  ;;  %v1033_v18 = vsel %vm1032_vm9, %v1421_v13, %v1029_v48  ;;  %vm1180_vm9 = vcmask 130048  }
 0x5a3   :  { %v1056_v55 = vmul.f32 %v1425_v33, %v1998_v49  ;;  %v1339_v35 = vunpack.i.l.bf16 %v1338_v30  ;;  %v1038_v56 = vsel %vm1035_vm11, %v1037_v51, %v1033_v18  ;;  %v1048_v60 = vsel %vm1047_vm12, %v1423_v47, %v1044_v52 }
 0x5a4   :  { %v1039_v59 = vmul.f32 %v1939_v16, %v1038_v56  ;;  %v1340_v57 = vunpack.i.h.bf16 %v1338_v30  ;;  %v1053_v58 = vsel %vm1050_vm13, %v1052_v37, %v1048_v60  ;;  %vm1061_vm15 = vweird.f32 %v1425_v33 }
 0x5a5   :  { %v1057_v62 = vsub.f32 1.0, %v1056_v55  ;;  %1111 = vmatpush.msra.mxu0 %v1339_v35  ;;  %v1054_v0 = vmul.f32 %v1941_v53, %v1053_v58  ;;  %v1350_v16 = vunpack.i.h.bf16 %v1348_v45  ;;  %vm1062_vm2 = vmor %vm1060_vm1, %vm1061_vm15 }
 0x5a6   :  { %1072 = vst.msk [vmem:[#allocation11 + $0x68] sm:$0xff] %vm92_vm0, %v1039_v59 }
 0x5a7   :  { %v1058_v2 = vmul.f32 %v1425_v33, %v1057_v62  ;;  %1112 = vmatpush.msra.mxu0 %v1340_v57  ;;  %1073 = vst.msk [vmem:[#allocation11 + $0x70] sm:$0xff] %vm92_vm0, %v1054_v0 }
 0x5a9   :  { %1113 = vmatpush.msra.mxu0 %v1349_v3  ;;  %v1059_v6 = vadd.f32 %v1425_v33, %v1058_v2 }
 0x5aa   :  { %v1343_v11 = vpop.permute.xlu2 %1342 }
 0x5ab   :  { %1114 = vmatpush.msra.mxu0 %v1350_v16  ;;  %v1344_v12 = vunpack.i.l.bf16 %v1343_v11  ;;  %v1063_v7 = vsel %vm1062_vm2, %v1425_v33, %v1059_v6  ;;  %v1345_v13 = vunpack.i.h.bf16 %v1343_v11 }
 0x5ac   :  { %1281 = vmatmul.msk.f32.vlgmr.msra.gmra.mxu0 %vm92_vm0, %v1971_v43  ;;  %v1068_v53 = vsel %vm1065_vm3, %v1067_v9, %v1063_v7 }
 0x5ad   :  { %893 = vmatpush.msrb.mxu1 %v1344_v12  ;;  %v1069_v15 = vmul.f32 %v1947_v44, %v1068_v53 }
 0x5af   :  { %v676_v17 = vpop.f32.mrf.mxu0  ;;  %894 = vmatpush.msrb.mxu1 %v1345_v13  ;;  %1074 = vst.msk [vmem:[#allocation11 + $0x78] sm:$0xff] %vm92_vm0, %v1069_v15 }
 0x5b0   :  { %1269 = vmatmul.msk.f32.vlgmr.msrb.gmra.mxu1 %vm92_vm0, %v2009_v5  ;;  %1132 = vrot.lane.b32.xlu1 %v676_v17, %s1585_s12 }
 0x5b4   :  { %1282 = vmatmul.msk.f32.gmra.mxu0 %vm92_vm0, %v1039_v59 }
 0x5b7   :  { %v679_v21 = vpop.f32.mrf.mxu0 }
 0x5b8   :  { %1270 = vmatmul.msk.f32.gmra.mxu1 %vm92_vm0, %v819_v14  ;;  %1134 = vrot.lane.b32.xlu0 %v679_v21, %s1585_s12 }
 0x5bc   :  { %1283 = vmatmul.msk.f32.gmra.mxu0 %vm92_vm0, %v1054_v0 }
 0x5bf   :  { %v682_v43 = vpop.f32.mrf.mxu0 }
 0x5c0   :  { %1271 = vmatmul.msk.f32.gmra.mxu1 %vm92_vm0, %v1995_v25  ;;  %1136 = vrot.lane.b32.xlu0 %v682_v43, %s1585_s12 }
 0x5c4   :  { %1284 = vmatmul.msk.f32.gmra.mxu0 %vm92_vm0, %v1069_v15 }
 0x5c7   :  { %v685_v44 = vpop.f32.mrf.mxu0 }
 0x5c8   :  { %1138 = vrot.lane.b32.xlu1 %v685_v44, %s1585_s12 }
 0x5e3   :  { %v789_v47 = vpop.xlane.xlu2 %788 }
 0x5e4   :  { %1426 = vrcp.f32 %v789_v47  ;;  %v846_v24 = vand.u32 2147483648, %v789_v47  ;;  %v844_v49 = vand.u32 2147483647, %v789_v47  ;;  %vm840_vm5 = vweird.f32 %v789_v47 }
 0x5e6   :  { %v847_v28 = vor.u32 1.1754944e-38, %v846_v24  ;;  %vm845_vm7 = vcmp.eq.f32.partialorder %v844_v49, 8.507059e+37 }
 0x5ea   :  { %v1427_v22 = vpop.eup %1426 }
 0x5eb   :  { %v836_v19 = vmul.f32 %v1427_v22, %v789_v47  ;;  %vm841_vm4 = vweird.f32 %v1427_v22 }
 0x5ec   :  { %vm842_vm6 = vmor %vm840_vm5, %vm841_vm4 }
 0x5ed   :  { %v837_v23 = vsub.f32 1.0, %v836_v19 }
 0x5ef   :  { %v838_v26 = vmul.f32 %v1427_v22, %v837_v23 }
 0x5f1   :  { %v839_v27 = vadd.f32 %v1427_v22, %v838_v26 }
 0x5f3   :  { %v843_v25 = vsel %vm842_vm6, %v1427_v22, %v839_v27 }
 0x5f4   :  { %v848_v31 = vsel %vm845_vm7, %v847_v28, %v843_v25 }
 0x5f5   :  { %v849_v1 = vmul.f32 %v1966_v20, %v848_v31 }
 0x5f7   :  { %854 = vst.msk [vmem:[#allocation11 + $0x58] sm:$0xff] %vm92_vm0, %v849_v1  ;;  %1272 = vmatmul.msk.f32.gmra.mxu1 %vm92_vm0, %v849_v1 }
 0x5f8   :  { %1219 = dma.vmem_to_hbm [thread:$0]  %s1212_s13, 2048, %s1214_s16, [#allocation12], %s1584_s11, %s1584_s11, %s1585_s12  }
 0x622   :  { %v1133_v10 = vpop.permute.xlu1 %1132 }
 0x623   :  { %v1176_v48 = vsel %vm269_vm14, %v1845_v34, %v1133_v10 }
 0x629   :  { %v1116_v39 = vpop.f32.mrf.mxu0 }
 0x62a   :  { %1164 = vrot.lane.b32.xlu1 %v1116_v39, %s1600_s9  ;;  %v1135_v46 = vpop.permute.xlu0 %1134 }
 0x62b   :  { %v1177_v30 = vsel %vm269_vm14, %v1847_v29, %v1135_v46 }
 0x62d   :  { %v896_v40 = vpop.f32.mrf.mxu1 }
 0x62e   :  { %1148 = vrot.lane.b32.xlu0 %v896_v40, %s1601_s10 }
 0x631   :  { %v1119_v8 = vpop.f32.mrf.mxu0 }
 0x632   :  { %v1137_v41 = vpop.permute.xlu0 %1136 }
 0x633   :  { %v1178_v35 = vsel %vm269_vm14, %v1849_v54, %v1137_v41 }
 0x635   :  { %v899_v32 = vpop.f32.mrf.mxu1 }
 0x636   :  { %1150 = vrot.lane.b32.xlu2 %v899_v32, %s1601_s10  ;;  %1166 = vrot.lane.b32.xlu0 %v1119_v8, %s1600_s9 }
 0x639   :  { %v1122_v38 = vpop.f32.mrf.mxu0 }
 0x63a   :  { %v1139_v42 = vpop.permute.xlu1 %1138 }
 0x63b   :  { %v1179_v29 = vsel %vm269_vm14, %v1856_v61, %v1139_v42 }
 0x63d   :  { %v902_v5 = vpop.f32.mrf.mxu1 }
 0x63e   :  { %1152 = vrot.lane.b32.xlu1 %v902_v5, %s1601_s10 }
 0x641   :  { %v1125_v20 = vpop.f32.mrf.mxu0 }
 0x646   :  { %1168 = vrot.lane.b32.xlu1 %v1122_v38, %s1600_s9 }
 0x674   :  { %v905_v36 = vpop.f32.mrf.mxu1 }
 0x675   :  { %1154 = vrot.lane.b32.xlu0 %v905_v36, %s1601_s10 }
 0x67d   :  { %1170 = vrot.lane.b32.xlu0 %v1125_v20, %s1600_s9 }
 0x690   :  { %v1151_v33 = vpop.permute.xlu2 %1150 }
 0x691   :  { %v1182_v18 = vsel %vm1180_vm9, %v1177_v30, %v1151_v33 }
 0x69c   :  { %v1165_v50 = vpop.permute.xlu1 %1164 }
 0x6a0   :  { %v1149_v14 = vpop.permute.xlu0 %1148 }
 0x6a1   :  { %v1181_v51 = vsel %vm1180_vm9, %v1176_v48, %v1149_v14 }
 0x6a2   :  { %v1186_v52 = vsel %vm1185_vm8, %v1181_v51, %v1165_v50 }
 0x6a3   :  { %1190 = vst.msk [vmem:[#allocation10] sm:$0xff] %vm92_vm0, %v1186_v52 }
 0x6a8   :  { %v1167_v37 = vpop.permute.xlu0 %1166 }
 0x6a9   :  { %v1187_v55 = vsel %vm1185_vm8, %v1182_v18, %v1167_v37 }
 0x6aa   :  { %1191 = vst.msk [vmem:[#allocation10 + $0x8] sm:$0xff] %vm92_vm0, %v1187_v55 }
 0x6b0   :  { %v1153_v34 = vpop.permute.xlu1 %1152 }
 0x6b1   :  { %v1183_v56 = vsel %vm1180_vm9, %v1178_v35, %v1153_v34 }
 0x6b8   :  { %v1169_v45 = vpop.permute.xlu1 %1168 }
 0x6b9   :  { %v1188_v59 = vsel %vm1185_vm8, %v1183_v56, %v1169_v45 }
 0x6ba   :  { %1192 = vst.msk [vmem:[#allocation10 + $0x10] sm:$0xff] %vm92_vm0, %v1188_v59 }
 0x6e7   :  { %v1155_v60 = vpop.permute.xlu0 %1154 }
 0x6e8   :  { %v1184_v62 = vsel %vm1180_vm9, %v1179_v29, %v1155_v60 }
 0x6ef   :  { %v1171_v54 = vpop.permute.xlu0 %1170 }
 0x6f0   :  { %v1189_v57 = vsel %vm1185_vm8, %v1184_v62, %v1171_v54 }
 0x6f1   :  { %1193 = vst.msk [vmem:[#allocation10 + $0x18] sm:$0xff] %vm92_vm0, %v1189_v57 }
 0x6f2   :  { %1206 = dma.vmem_to_hbm [thread:$0]  %s1199_s0, 512, %s1201_s19, [#allocation4], %s1584_s11, %s1584_s11, %s1585_s12  }
 0x6f3   :  { %1578 = dma.done.wait [#allocation4], 512  }
 0x6f4   :  { %1579 = vsyncadd [#allocation4], 4294966784 }
 0x6f5   :  { %1580 = dma.done.wait [#allocation12], 2048  }
 0x6f6   :  { %1581 = vsyncadd [#allocation12], 4294965248 }
 0x6f7   :  { %1228 = vsyncpa [#allocation3], 1 }
 0x6f8   :  { %1229 = vsyncpa [#allocation6], 1 }
 0x6f9   :  { %1230 = vsyncpa [#allocation9], 1 }
 0x6fa   :  { %1231 = vsyncpa [#allocation4], 1 }
 0x6fb   :  { %1232 = vsyncpa [#allocation12], 1 }

// kernel: tpu_custom_call.1
= control target key start
LH: loop header
LB: loop body
LE: loop exit
PB: predicated region body
PF: predicated region fallthrough
CT: control target
= control target key end

     0   :  { %13 = vsyncpa [#allocation3], 0  ;;  %s2086_s0 = inlined_call_operand.hbm [shape: f32[4,8,32], index: 0, kind: input, shape index: {}]   ;;  %s2087_s1 = inlined_call_operand.hbm [shape: f32[1,32], index: 1, kind: input, shape index: {}]   ;;  %s2088_s2 = inlined_call_operand.vmem [shape: f32[1,32], index: 2, kind: input, shape index: {}]   ;;  %s2089_s3 = inlined_call_operand.hbm [shape: f32[32,96], index: 3, kind: input, shape index: {}]   ;;  %s2090_s4 = inlined_call_operand.vmem [shape: f32[1,96], index: 4, kind: input, shape index: {}]   ;;  %s2091_s5 = inlined_call_operand.hbm [shape: f32[4,32,32], index: 5, kind: input, shape index: {}]   ;;  %s2092_s6 = inlined_call_operand.hbm [shape: f32[4,8,32], index: 6, kind: output, shape index: {0}]   ;;  %s2093_s7 = inlined_call_operand.hbm [shape: f32[1,4,32,32], index: 7, kind: output, shape index: {1}]  }
   0x1   :  { %14 = vsyncpa [#allocation6], 0 }
   0x2   :  { %15 = vsyncpa [#allocation9], 0 }
   0x3   :  { %16 = vsyncpa [#allocation4], 0  ;;  %s36_s26 = sshll.u32 %s2087_s1, 4  ;;  %s37_s26 = int_to_ptr.hbm [resolvable:$true] %s36_s26 }
   0x4   :  { %17 = vsyncpa [#allocation12], 0  ;;  %s1582_s27 = smov [#allocation5]   ;;  %s22_s8 = sshll.u32 %s2086_s0, 4  ;;  %s23_s8 = int_to_ptr.hbm [resolvable:$true] %s22_s8 }
   0x5   :  { %s38_s28 = sshll.u32 %s1582_s27, 4  ;;  %s1583_s9 = smov [#allocation2]   ;;  %s39_s28 = int_to_ptr.vmem [resolvable:$true] %s38_s28 }
   0x6   :  { %41 = dma.hbm_to_vmem [thread:$0]  %s37_s26, 16, %s39_s28, [#allocation6]  }
   0x7   :  { %s24_s10 = sshll.u32 %s1583_s9, 4  ;;  %s1584_s11 = smov 128   ;;  %s25_s10 = int_to_ptr.vmem [resolvable:$true] %s24_s10 }
   0x8   :  { %s1585_s12 = smov 8   ;;  %s48_s14 = sshll.u32 %s2089_s3, 4  ;;  %s49_s14 = int_to_ptr.hbm [resolvable:$true] %s48_s14 }
   0x9   :  { %30 = dma.hbm_to_vmem [thread:$0]  %s23_s8, 512, %s25_s10, [#allocation3], %s1584_s11, %s1584_s11, %s1585_s12  }
   0xa   :  { %s1586_s15 = smov [#allocation7]   ;;  %s63_s18 = sshll.u32 %s2091_s5, 4  ;;  %s64_s18 = int_to_ptr.hbm [resolvable:$true] %s63_s18 }
   0xb   :  { %s50_s16 = sshll.u32 %s1586_s15, 4  ;;  %s1587_s19 = smov [#allocation8]   ;;  %s51_s16 = int_to_ptr.vmem [resolvable:$true] %s50_s16 }
   0xc   :  { %56 = dma.hbm_to_vmem [thread:$0]  %s49_s14, 512, %s51_s16, [#allocation6], %s1584_s11, %s1584_s11, %s1585_s12  }
   0xd   :  { %s65_s20 = sshll.u32 %s1587_s19, 4  ;;  %s66_s20 = int_to_ptr.vmem [resolvable:$true] %s65_s20 }
   0xe   :  { %71 = dma.hbm_to_vmem [thread:$0]  %s64_s18, 2048, %s66_s20, [#allocation9], %s1584_s11, %s1584_s11, %s1585_s12  }
   0xf   :  { %1572 = dma.done.wait [#allocation3], 512  }
  0x10   :  { %1573 = vsyncadd [#allocation3], 4294966784 }
  0x11   :  { %1574 = dma.done.wait [#allocation6], 528  }
  0x12   :  { %1575 = vsyncadd [#allocation6], 4294966768 }
  0x13   :  { %1576 = dma.done.wait [#allocation9], 2048  }
  0x14   :  { %1577 = vsyncadd [#allocation9], 4294965248  ;;  %vm92_vm0 = vcmask 261120   ;;  %v90_v0 = vld [vmem:[#allocation2 + $0x10] sm:$0xff]  ;;  %v88_v1 = vld [vmem:[#allocation2] sm:$0xff]  ;;  %v1588_v8 = vmov 32.0  }
  0x15   :  { %v99_v2 = vsel %vm92_vm0, %v90_v0, 0.0  ;;  %v93_v3 = vsel %vm92_vm0, %v88_v1, 0.0  ;;  %v91_v4 = vld [vmem:[#allocation2 + $0x18] sm:$0xff]  ;;  %v89_v5 = vld [vmem:[#allocation2 + $0x8] sm:$0xff]  ;;  %1354 = vrcp.f32 %v1588_v8  ;;  %v1352_v8 = vld [vmem:[%s2088_s2] ss:$0 sm:$0xff] }
  0x16   :  { %100 = vadd.xlane.f32.xlu0 %v99_v2  ;;  %94 = vadd.xlane.f32.xlu1 %v93_v3  ;;  %v102_v6 = vsel %vm92_vm0, %v91_v4, 0.0  ;;  %v96_v7 = vsel %vm92_vm0, %v89_v5, 0.0  ;;  %v207_v35 = vld [vmem:[#allocation7 + $0x18] sm:$0xff]  ;;  %v206_v36 = vld [vmem:[#allocation7 + $0x10] sm:$0xff]  ;;  %v205_v37 = vld [vmem:[#allocation7 + $0x8] sm:$0xff]  ;;  %s1589_s22 = smov 96  }
  0x17   :  { %236 = vmatpush.msra.mxu0 %v207_v35  ;;  %1285 = vmatpush.msra.mxu2 %v207_v35  ;;  %v204_v38 = vld [vmem:[#allocation7] sm:$0xff]  ;;  %v1351_v3 = vld [vmem:[#allocation5] ss:$0 sm:$0xff]  ;;  %s1591_s23 = smov 88   ;;  %s1592_s24 = smov 120   ;;  %vm269_vm14 = vcmask 64512  }
  0x18   :  { %s1593_s25 = smov 80   ;;  %s1594_s26 = smov 72  }
  0x19   :  { %237 = vmatpush.msra.mxu0 %v206_v36  ;;  %1286 = vmatpush.msra.mxu2 %v206_v36  ;;  %s1595_s27 = smov 112   ;;  %s1596_s28 = smov 104  }
  0x1a   :  { %s1597_s29 = smov 56   ;;  %s1598_s30 = smov 40  }
  0x1b   :  { %v1355_v9 = vpop.eup %1354  ;;  %238 = vmatpush.msra.mxu0 %v205_v37  ;;  %1287 = vmatpush.msra.mxu2 %v205_v37  ;;  %s1599_s8 = smov 48   ;;  %s1600_s9 = smov 24  }
  0x1c   :  { %v106_v10 = vmul.f32 32.0, %v1355_v9  ;;  %vm110_vm1 = vweird.f32 %v1355_v9  ;;  %s1601_s10 = smov 16   ;;  %s1602_s1 = smov [#allocation11]  }
  0x1d   :  { %239 = vmatpush.msra.mxu0 %v204_v38  ;;  %1288 = vmatpush.msra.mxu2 %v204_v38  ;;  %s1211_s13 = sshll.u32 %s1602_s1, 4  ;;  %s1213_s16 = sshll.u32 %s2093_s7, 4  ;;  %s1212_s13 = int_to_ptr.vmem [resolvable:$true] %s1211_s13  ;;  %s1214_s16 = int_to_ptr.hbm [resolvable:$true] %s1213_s16 }
  0x1e   :  { %103 = vadd.xlane.f32.xlu0 %v102_v6  ;;  %97 = vadd.xlane.f32.xlu1 %v96_v7  ;;  %v107_v11 = vsub.f32 1.0, %v106_v10  ;;  %s1603_s7 = smov [#allocation10]   ;;  %s1200_s19 = sshll.u32 %s2092_s6, 4  ;;  %s1201_s19 = int_to_ptr.hbm [resolvable:$true] %s1200_s19 }
  0x1f   :  { %s1198_s0 = sshll.u32 %s1603_s7, 4  ;;  %s1199_s0 = int_to_ptr.vmem [resolvable:$true] %s1198_s0 }
  0x20   :  { %v108_v12 = vmul.f32 %v1355_v9, %v107_v11 }
  0x22   :  { %v109_v13 = vadd.f32 %v1355_v9, %v108_v12 }
  0x24   :  { %v111_v14 = vsel %vm110_vm1, %v1355_v9, %v109_v13 }
  0x89   :  { %v101_v15 = vpop.xlane.xlu0 %100  ;;  %v95_v16 = vpop.xlane.xlu1 %94 }
  0x8a   :  { %v114_v17 = vmul.f32 %v111_v14, %v101_v15  ;;  %v112_v18 = vmul.f32 %v111_v14, %v95_v16 }
  0x8c   :  { %v1669_v19 = vsub.f32 %v90_v0, %v114_v17  ;;  %v1671_v20 = vsub.f32 %v88_v1, %v112_v18 }
  0x8e   :  { %v122_v21 = vmul.f32 %v1669_v19, %v1669_v19  ;;  %v120_v22 = vmul.f32 %v1671_v20, %v1671_v20 }
  0x90   :  { %v130_v23 = vsel %vm92_vm0, %v122_v21, 0.0  ;;  %v124_v24 = vsel %vm92_vm0, %v120_v22, 0.0 }
  0x91   :  { %131 = vadd.xlane.f32.xlu2 %v130_v23  ;;  %v104_v25 = vpop.xlane.xlu0 %103  ;;  %125 = vadd.xlane.f32.xlu0 %v124_v24  ;;  %v98_v26 = vpop.xlane.xlu1 %97 }
  0x92   :  { %v115_v27 = vmul.f32 %v111_v14, %v104_v25  ;;  %v113_v28 = vmul.f32 %v111_v14, %v98_v26 }
  0x94   :  { %v1679_v29 = vsub.f32 %v91_v4, %v115_v27  ;;  %v1681_v30 = vsub.f32 %v89_v5, %v113_v28 }
  0x96   :  { %v123_v31 = vmul.f32 %v1679_v29, %v1679_v29  ;;  %v121_v32 = vmul.f32 %v1681_v30, %v1681_v30 }
  0x98   :  { %v133_v33 = vsel %vm92_vm0, %v123_v31, 0.0  ;;  %v127_v34 = vsel %vm92_vm0, %v121_v32, 0.0  ;;  %v1353_v32 = vld [vmem:[%s2090_s4] ss:$0 sm:$0xff]  ;;  %s1590_s4 = smov 64  }
  0x99   :  { %134 = vadd.xlane.f32.xlu2 %v133_v33  ;;  %128 = vadd.xlane.f32.xlu1 %v127_v34 }
 0x104   :  { %v132_v39 = vpop.xlane.xlu2 %131  ;;  %v126_v40 = vpop.xlane.xlu0 %125 }
 0x105   :  { %v138_v41 = vmul.f32 %v132_v39, %v111_v14  ;;  %v136_v42 = vmul.f32 %v126_v40, %v111_v14 }
 0x107   :  { %v142_v43 = vadd.f32 1e-05, %v138_v41  ;;  %v140_v44 = vadd.f32 1e-05, %v136_v42 }
 0x109   :  { %1356 = vrsqrt.f32 %v142_v43  ;;  %vm170_vm4 = vweird.f32 %v142_v43  ;;  %vm150_vm6 = vweird.f32 %v140_v44 }
 0x10a   :  { %1358 = vrsqrt.f32 %v140_v44 }
 0x10c   :  { %v135_v45 = vpop.xlane.xlu2 %134  ;;  %v129_v46 = vpop.xlane.xlu1 %128 }
 0x10d   :  { %v139_v47 = vmul.f32 %v135_v45, %v111_v14  ;;  %v137_v48 = vmul.f32 %v129_v46, %v111_v14 }
 0x10f   :  { %v1357_v49 = vpop.eup %1356  ;;  %v143_v50 = vadd.f32 1e-05, %v139_v47  ;;  %v141_v51 = vadd.f32 1e-05, %v137_v48 }
 0x110   :  { %v1359_v52 = vpop.eup %1358  ;;  %v165_v53 = vmul.f32 %v1357_v49, %v142_v43  ;;  %vm171_vm2 = vweird.f32 %v1357_v49 }
 0x111   :  { %v145_v54 = vmul.f32 %v1359_v52, %v140_v44  ;;  %1360 = vrsqrt.f32 %v143_v50  ;;  %vm151_vm3 = vweird.f32 %v1359_v52  ;;  %vm172_vm5 = vmor %vm170_vm4, %vm171_vm2  ;;  %vm180_vm8 = vweird.f32 %v143_v50 }
 0x112   :  { %v166_v55 = vmul.f32 %v1357_v49, %v165_v53  ;;  %1362 = vrsqrt.f32 %v141_v51  ;;  %vm152_vm7 = vmor %vm150_vm6, %vm151_vm3  ;;  %vm160_vm12 = vweird.f32 %v141_v51 }
 0x113   :  { %v146_v56 = vmul.f32 %v1359_v52, %v145_v54 }
 0x114   :  { %v167_v57 = vmul.f32 0.5, %v166_v55 }
 0x115   :  { %v147_v58 = vmul.f32 0.5, %v146_v56 }
 0x116   :  { %v168_v59 = vsub.f32 1.5, %v167_v57 }
 0x117   :  { %v1361_v60 = vpop.eup %1360  ;;  %v148_v61 = vsub.f32 1.5, %v147_v58 }
 0x118   :  { %v1363_v62 = vpop.eup %1362  ;;  %v169_v63 = vmul.f32 %v1357_v49, %v168_v59  ;;  %v175_v0 = vmul.f32 %v1361_v60, %v143_v50  ;;  %vm181_vm9 = vweird.f32 %v1361_v60 }
 0x119   :  { %v149_v1 = vmul.f32 %v1359_v52, %v148_v61  ;;  %v155_v2 = vmul.f32 %v1363_v62, %v141_v51  ;;  %vm161_vm10 = vweird.f32 %v1363_v62  ;;  %vm182_vm11 = vmor %vm180_vm8, %vm181_vm9  ;;  %v253_v61 = vld [vmem:[#allocation8] sm:$0xff] }
 0x11a   :  { %v173_v4 = vsel %vm172_vm5, %v1357_v49, %v169_v63  ;;  %v176_v5 = vmul.f32 %v1361_v60, %v175_v0  ;;  %vm162_vm13 = vmor %vm160_vm12, %vm161_vm10 }
 0x11b   :  { %v153_v6 = vsel %vm152_vm7, %v1359_v52, %v149_v1  ;;  %v156_v7 = vmul.f32 %v1363_v62, %v155_v2  ;;  %v186_v9 = vmul.f32 %v173_v4, %v1669_v19  ;;  %v254_v1 = vld [vmem:[#allocation8 + $0x8] sm:$0xff] }
 0x11c   :  { %v177_v10 = vmul.f32 0.5, %v176_v5  ;;  %v184_v11 = vmul.f32 %v153_v6, %v1671_v20  ;;  %v255_v5 = vld [vmem:[#allocation8 + $0x10] sm:$0xff] }
 0x11d   :  { %v157_v12 = vmul.f32 0.5, %v156_v7  ;;  %v194_v13 = vmul.f32 %v1351_v3, %v186_v9  ;;  %v256_v9 = vld [vmem:[#allocation8 + $0x18] sm:$0xff] }
 0x11e   :  { %v178_v14 = vsub.f32 1.5, %v177_v10  ;;  %v192_v15 = vmul.f32 %v1351_v3, %v184_v11 }
 0x11f   :  { %v158_v16 = vsub.f32 1.5, %v157_v12  ;;  %v202_v17 = vadd.f32 %v1352_v8, %v194_v13 }
 0x120   :  { %v179_v18 = vmul.f32 %v1361_v60, %v178_v14  ;;  %v200_v21 = vadd.f32 %v1352_v8, %v192_v15 }
 0x121   :  { %v159_v22 = vmul.f32 %v1363_v62, %v158_v16  ;;  %1235 = vmatmul.msk.f32.vlgmr.msra.gmra.mxu2 %vm92_vm0, %v202_v17 }
 0x122   :  { %v183_v19 = vsel %vm182_vm11, %v1361_v60, %v179_v18  ;;  %1233 = vmatmul.msk.f32.vlgmr.msra.gmra.mxu0 %vm92_vm0, %v200_v21 }
 0x123   :  { %v163_v20 = vsel %vm162_vm13, %v1363_v62, %v159_v22  ;;  %v187_v23 = vmul.f32 %v183_v19, %v1679_v29 }
 0x124   :  { %v185_v24 = vmul.f32 %v163_v20, %v1681_v30 }
 0x125   :  { %v195_v25 = vmul.f32 %v1351_v3, %v187_v23 }
 0x126   :  { %v193_v26 = vmul.f32 %v1351_v3, %v185_v24 }
 0x127   :  { %v203_v27 = vadd.f32 %v1352_v8, %v195_v25 }
 0x128   :  { %v201_v28 = vadd.f32 %v1352_v8, %v193_v26 }
 0x129   :  { %1236 = vmatmul.msk.f32.gmra.mxu2 %vm92_vm0, %v203_v27 }
 0x12a   :  { %1234 = vmatmul.msk.f32.gmra.mxu0 %vm92_vm0, %v201_v28 }
 0x19f   :  { %v241_v31 = vpop.f32.mrf.mxu0 }
 0x1a0   :  { %v1709_v30 = vadd.f32 %v1353_v32, %v241_v31 }
 0x1a4   :  { %v247_v33 = vpop.f32.mrf.mxu2 }
 0x1a5   :  { %v1703_v34 = vadd.f32 %v1353_v32, %v247_v33 }
 0x1a7   :  { %v244_v35 = vpop.f32.mrf.mxu0  ;;  %265 = vrot.lane.b32.xlu0 %v1703_v34, %s1589_s22 }
 0x1a8   :  { %v1706_v29 = vadd.f32 %v1353_v32, %v244_v35 }
 0x1aa   :  { %263 = vrot.lane.b32.xlu1 %v1706_v29, %s1589_s22  ;;  %v1715_v38 = vpack.i.bf16 %v1709_v30, %v1706_v29 }
 0x1ac   :  { %v250_v36 = vpop.f32.mrf.mxu2 }
 0x1ad   :  { %v1711_v37 = vadd.f32 %v1353_v32, %v250_v36 }
 0x1af   :  { %267 = vrot.lane.b32.xlu2 %v1711_v37, %s1589_s22  ;;  %1312 = vrot.lane.b32.xlu0 %v1715_v38, %s1590_s4  ;;  %v1736_v39 = vpack.i.bf16 %v1703_v34, %v1711_v37 }
 0x1b2   :  { %483 = vrot.lane.b32.xlu1 %v1706_v29, %s1591_s23 }
 0x1b7   :  { %261 = vrot.lane.b32.xlu2 %v1709_v30, %s1589_s22  ;;  %473 = vrot.lane.b32.xlu0 %v1709_v30, %s1592_s24 }
 0x1ba   :  { %481 = vrot.lane.b32.xlu1 %v1709_v30, %s1591_s23 }
 0x1bf   :  { %485 = vrot.lane.b32.xlu2 %v1703_v34, %s1591_s23  ;;  %475 = vrot.lane.b32.xlu0 %v1706_v29, %s1592_s24 }
 0x1c2   :  { %487 = vrot.lane.b32.xlu1 %v1711_v37, %s1591_s23 }
 0x1c7   :  { %705 = vrot.lane.b32.xlu2 %v1703_v34, %s1593_s25  ;;  %477 = vrot.lane.b32.xlu0 %v1703_v34, %s1592_s24 }
 0x1cf   :  { %925 = vrot.lane.b32.xlu0 %v1703_v34, %s1594_s26 }
 0x1d7   :  { %1317 = vrot.lane.b32.xlu0 %v1736_v39, %s1590_s4 }
 0x1df   :  { %707 = vrot.lane.b32.xlu0 %v1711_v37, %s1593_s25 }
 0x1e7   :  { %927 = vrot.lane.b32.xlu0 %v1711_v37, %s1594_s26 }
 0x209   :  { %v268_v40 = vpop.permute.xlu2 %267 }
 0x20a   :  { %1237 = vmatpush.xpose.msk.msra.mxu1 %vm269_vm14, %v268_v40 }
 0x211   :  { %v262_v43 = vpop.permute.xlu2 %261 }
 0x219   :  { %v266_v41 = vpop.permute.xlu0 %265  ;;  %v486_v50 = vpop.permute.xlu2 %485 }
 0x21a   :  { %1238 = vmatpush.xpose.msk.msra.mxu1 %vm269_vm14, %v266_v41 }
 0x21c   :  { %v264_v42 = vpop.permute.xlu1 %263 }
 0x21e   :  { %1239 = vmatpush.xpose.msk.msra.mxu1 %vm269_vm14, %v264_v42  ;;  %v469_v42 = vld [vmem:[#allocation8 + $0x20] sm:$0xff] }
 0x221   :  { %v1313_v44 = vpop.permute.xlu0 %1312  ;;  %v706_v59 = vpop.permute.xlu2 %705 }
 0x222   :  { %1240 = vmatpush.xpose.msk.msra.mxu1 %vm269_vm14, %v262_v43  ;;  %v1314_v56 = vunpack.i.l.bf16 %v1313_v44  ;;  %v1315_v57 = vunpack.i.h.bf16 %v1313_v44 }
 0x224   :  { %v484_v45 = vpop.permute.xlu1 %483 }
 0x225   :  { %1241 = vmatmul.msk.f32.vlgmr.msra.gmra.mxu1 %vm269_vm14, %v1709_v30 }
 0x229   :  { %v474_v46 = vpop.permute.xlu0 %473 }
 0x22c   :  { %v482_v47 = vpop.permute.xlu1 %481 }
 0x22d   :  { %1242 = vmatmul.msk.f32.gmra.mxu1 %vm269_vm14, %v1706_v29 }
 0x231   :  { %v476_v48 = vpop.permute.xlu0 %475 }
 0x234   :  { %v488_v49 = vpop.permute.xlu1 %487 }
 0x235   :  { %1249 = vmatpush.xpose.msk.msra.mxu3 %vm269_vm14, %v488_v49  ;;  %1243 = vmatmul.msk.f32.gmra.mxu1 %vm269_vm14, %v1703_v34 }
 0x239   :  { %1250 = vmatpush.xpose.msk.msra.mxu3 %vm269_vm14, %v486_v50  ;;  %v478_v51 = vpop.permute.xlu0 %477 }
 0x23d   :  { %1251 = vmatpush.xpose.msk.msra.mxu3 %vm269_vm14, %v484_v45  ;;  %1244 = vmatmul.msk.f32.gmra.mxu1 %vm269_vm14, %v1711_v37 }
 0x241   :  { %1252 = vmatpush.xpose.msk.msra.mxu3 %vm269_vm14, %v482_v47  ;;  %v926_v52 = vpop.permute.xlu0 %925 }
 0x244   :  { %1253 = vmatmul.msk.f32.vlgmr.msra.gmra.mxu3 %vm269_vm14, %v474_v46 }
 0x249   :  { %v1318_v53 = vpop.permute.xlu0 %1317 }
 0x24a   :  { %v1319_v54 = vunpack.i.l.bf16 %v1318_v53  ;;  %v1320_v55 = vunpack.i.h.bf16 %v1318_v53 }
 0x24c   :  { %1254 = vmatmul.msk.f32.gmra.mxu3 %vm269_vm14, %v476_v48  ;;  %451 = vmatpush.msrb.mxu2 %v1319_v54 }
 0x24e   :  { %452 = vmatpush.msrb.mxu2 %v1320_v55 }
 0x250   :  { %453 = vmatpush.msrb.mxu2 %v1314_v56 }
 0x251   :  { %v708_v58 = vpop.permute.xlu0 %707 }
 0x252   :  { %454 = vmatpush.msrb.mxu2 %v1315_v57 }
 0x254   :  { %1261 = vmatpush.xpose.msk.msra.mxu2 %vm269_vm14, %v708_v58  ;;  %1255 = vmatmul.msk.f32.gmra.mxu3 %vm269_vm14, %v478_v51 }
 0x258   :  { %1262 = vmatpush.xpose.msk.msra.mxu2 %vm269_vm14, %v706_v59 }
 0x259   :  { %v928_v60 = vpop.permute.xlu0 %927 }
 0x25a   :  { %1273 = vmatpush.xpose.msk.msrb.mxu3 %vm269_vm14, %v928_v60 }
 0x25e   :  { %1274 = vmatpush.xpose.msk.msrb.mxu3 %vm269_vm14, %v926_v52 }
 0x2a2   :  { %v303_v62 = vpop.f32.mrf.mxu1 }
 0x2a3   :  { %v304_v63 = vadd.f32 %v303_v62, %v253_v61 }
 0x2a5   :  { %v315_v0 = vsel %vm92_vm0, %v304_v63, -inf }
 0x2a6   :  { %316 = vmax.xlane.f32.xlu0 %v315_v0 }
 0x2aa   :  { %v306_v2 = vpop.f32.mrf.mxu1 }
 0x2ab   :  { %v307_v3 = vadd.f32 %v306_v2, %v254_v1  ;;  %v470_v2 = vld [vmem:[#allocation8 + $0x28] sm:$0xff] }
 0x2ad   :  { %v318_v4 = vsel %vm92_vm0, %v307_v3, -inf }
 0x2ae   :  { %319 = vmax.xlane.f32.xlu2 %v318_v4 }
 0x2b2   :  { %v309_v6 = vpop.f32.mrf.mxu1 }
 0x2b3   :  { %v310_v7 = vadd.f32 %v309_v6, %v255_v5 }
 0x2b5   :  { %v321_v8 = vsel %vm92_vm0, %v310_v7, -inf }
 0x2b6   :  { %322 = vmax.xlane.f32.xlu1 %v321_v8 }
 0x2ba   :  { %703 = vrot.lane.b32.xlu0 %v1706_v29, %s1593_s25  ;;  %v312_v10 = vpop.f32.mrf.mxu1 }
 0x2bb   :  { %v313_v11 = vadd.f32 %v312_v10, %v256_v9 }
 0x2bd   :  { %v324_v12 = vsel %vm92_vm0, %v313_v11, -inf }
 0x2c7   :  { %v522_v43 = vpop.f32.mrf.mxu3 }
 0x2c8   :  { %v1801_v44 = vadd.f32 %v522_v43, %v469_v42 }
 0x2ca   :  { %v534_v45 = vsel %vm92_vm0, %v1801_v44, -inf }
 0x2cf   :  { %479 = vrot.lane.b32.xlu1 %v1711_v37, %s1592_s24 }
 0x2e4   :  { %325 = vmax.xlane.f32.xlu0 %v324_v12  ;;  %v472_v12 = vld [vmem:[#allocation8 + $0x38] sm:$0xff] }
 0x2f8   :  { %923 = vrot.lane.b32.xlu0 %v1706_v29, %s1594_s26 }
 0x319   :  { %v317_v13 = vpop.xlane.xlu0 %316 }
 0x31a   :  { %v327_v14 = vsub.f32 %v304_v63, %v317_v13  ;;  %v471_v63 = vld [vmem:[#allocation8 + $0x30] sm:$0xff] }
 0x31c   :  { %v331_v15 = vmul.f32 1.442695, %v327_v14 }
 0x31e   :  { %1364 = vpow2.f32 %v331_v15 }
 0x321   :  { %v320_v16 = vpop.xlane.xlu2 %319 }
 0x322   :  { %v328_v17 = vsub.f32 %v307_v3, %v320_v16 }
 0x324   :  { %v1776_v18 = vpop.eup %1364  ;;  %v333_v21 = vmul.f32 1.442695, %v328_v17 }
 0x325   :  { %v339_v22 = vsel %vm92_vm0, %v1776_v18, 0.0 }
 0x326   :  { %1366 = vpow2.f32 %v333_v21  ;;  %340 = vadd.xlane.f32.xlu2 %v339_v22 }
 0x329   :  { %v323_v24 = vpop.xlane.xlu1 %322 }
 0x32a   :  { %v329_v26 = vsub.f32 %v310_v7, %v323_v24 }
 0x32c   :  { %v1780_v19 = vpop.eup %1366  ;;  %v704_v20 = vpop.permute.xlu0 %703  ;;  %v335_v31 = vmul.f32 1.442695, %v329_v26 }
 0x32d   :  { %1263 = vmatpush.xpose.msk.msra.mxu2 %vm269_vm14, %v704_v20  ;;  %v342_v23 = vsel %vm92_vm0, %v1780_v19, 0.0 }
 0x32e   :  { %343 = vadd.xlane.f32.xlu0 %v342_v23 }
 0x33e   :  { %701 = vrot.lane.b32.xlu2 %v1709_v30, %s1593_s25 }
 0x341   :  { %v480_v25 = vpop.permute.xlu1 %479 }
 0x342   :  { %921 = vrot.lane.b32.xlu0 %v1709_v30, %s1594_s26  ;;  %1256 = vmatmul.msk.f32.gmra.mxu3 %vm269_vm14, %v480_v25 }
 0x34a   :  { %695 = vrot.lane.b32.xlu0 %v1706_v29, %s1595_s27 }
 0x352   :  { %917 = vrot.lane.b32.xlu0 %v1703_v34, %s1596_s28 }
 0x357   :  { %v326_v27 = vpop.xlane.xlu0 %325 }
 0x358   :  { %v330_v28 = vsub.f32 %v313_v11, %v326_v27 }
 0x35a   :  { %v337_v32 = vmul.f32 1.442695, %v330_v28 }
 0x35c   :  { %1368 = vpow2.f32 %v337_v32 }
 0x35d   :  { %1370 = vpow2.f32 %v335_v31 }
 0x362   :  { %v1792_v33 = vpop.eup %1368 }
 0x363   :  { %v1794_v35 = vpop.eup %1370  ;;  %v348_v36 = vsel %vm92_vm0, %v1792_v33, 0.0 }
 0x364   :  { %349 = vadd.xlane.f32.xlu1 %v348_v36  ;;  %v345_v40 = vsel %vm92_vm0, %v1794_v35, 0.0 }
 0x367   :  { %346 = vadd.xlane.f32.xlu2 %v345_v40 }
 0x36a   :  { %v924_v41 = vpop.permute.xlu0 %923 }
 0x36b   :  { %1275 = vmatpush.xpose.msk.msrb.mxu3 %vm269_vm14, %v924_v41 }
 0x37c   :  { %535 = vmax.xlane.f32.xlu0 %v534_v45 }
 0x37d   :  { %913 = vrot.lane.b32.xlu1 %v1709_v30, %s1596_s28 }
 0x37f   :  { %693 = vrot.lane.b32.xlu2 %v1709_v30, %s1595_s27  ;;  %v525_v30 = vpop.f32.mrf.mxu3 }
 0x380   :  { %v1817_v7 = vadd.f32 %v525_v30, %v470_v2 }
 0x382   :  { %v537_v11 = vsel %vm92_vm0, %v1817_v7, -inf }
 0x385   :  { %697 = vrot.lane.b32.xlu1 %v1703_v34, %s1595_s27 }
 0x387   :  { %915 = vrot.lane.b32.xlu2 %v1706_v29, %s1596_s28  ;;  %v528_v0 = vpop.f32.mrf.mxu3 }
 0x388   :  { %v1815_v5 = vadd.f32 %v528_v0, %v471_v63 }
 0x38a   :  { %v540_v10 = vsel %vm92_vm0, %v1815_v5, -inf }
 0x38d   :  { %919 = vrot.lane.b32.xlu1 %v1711_v37, %s1596_s28 }
 0x38f   :  { %699 = vrot.lane.b32.xlu2 %v1711_v37, %s1595_s27 }
 0x399   :  { %v341_v46 = vpop.xlane.xlu2 %340 }
 0x39a   :  { %1372 = vrcp.f32 %v341_v46  ;;  %v362_v52 = vand.u32 2147483648, %v341_v46  ;;  %v360_v34 = vand.u32 2147483647, %v341_v46  ;;  %vm356_vm1 = vweird.f32 %v341_v46 }
 0x39c   :  { %v363_v37 = vor.u32 1.1754944e-38, %v362_v52  ;;  %vm361_vm3 = vcmp.eq.f32.partialorder %v360_v34, 8.507059e+37 }
 0x3a0   :  { %v1373_v47 = vpop.eup %1372 }
 0x3a1   :  { %v352_v48 = vmul.f32 %v1373_v47, %v341_v46  ;;  %v702_v49 = vpop.permute.xlu2 %701  ;;  %v344_v50 = vpop.xlane.xlu0 %343  ;;  %vm357_vm15 = vweird.f32 %v1373_v47 }
 0x3a2   :  { %1374 = vrcp.f32 %v344_v50  ;;  %1264 = vmatpush.xpose.msk.msra.mxu2 %vm269_vm14, %v702_v49  ;;  %vm358_vm2 = vmor %vm356_vm1, %vm357_vm15  ;;  %v377_v60 = vand.u32 2147483648, %v344_v50  ;;  %v375_v62 = vand.u32 2147483647, %v344_v50  ;;  %vm371_vm5 = vweird.f32 %v344_v50 }
 0x3a3   :  { %v353_v51 = vsub.f32 1.0, %v352_v48 }
 0x3a4   :  { %v378_v3 = vor.u32 1.1754944e-38, %v377_v60  ;;  %vm376_vm7 = vcmp.eq.f32.partialorder %v375_v62, 8.507059e+37  ;;  %v910_v62 = vld [vmem:[#allocation8 + $0x68] sm:$0xff] }
 0x3a5   :  { %v354_v53 = vmul.f32 %v1373_v47, %v353_v51 }
 0x3a7   :  { %v355_v29 = vadd.f32 %v1373_v47, %v354_v53 }
 0x3a8   :  { %v1375_v54 = vpop.eup %1374 }
 0x3a9   :  { %v367_v55 = vmul.f32 %v1375_v54, %v344_v50  ;;  %v359_v56 = vsel %vm358_vm2, %v1373_v47, %v355_v29  ;;  %vm372_vm4 = vweird.f32 %v1375_v54 }
 0x3aa   :  { %v364_v57 = vsel %vm361_vm3, %v363_v37, %v359_v56  ;;  %vm373_vm6 = vmor %vm371_vm5, %vm372_vm4  ;;  %v909_v37 = vld [vmem:[#allocation8 + $0x60] sm:$0xff] }
 0x3ab   :  { %v368_v58 = vsub.f32 1.0, %v367_v55  ;;  %v365_v59 = vmul.f32 %v1776_v18, %v364_v57 }
 0x3ad   :  { %v369_v61 = vmul.f32 %v1375_v54, %v368_v58  ;;  %411 = vst.msk [vmem:[#allocation11] sm:$0xff] %vm92_vm0, %v365_v59  ;;  %1245 = vmatmul.msk.f32.vlgmr.msrb.gmra.mxu2 %vm92_vm0, %v365_v59 }
 0x3af   :  { %v370_v1 = vadd.f32 %v1375_v54, %v369_v61 }
 0x3b1   :  { %v374_v4 = vsel %vm373_vm6, %v1375_v54, %v370_v1 }
 0x3b2   :  { %v379_v6 = vsel %vm376_vm7, %v378_v3, %v374_v4 }
 0x3b3   :  { %v380_v8 = vmul.f32 %v1780_v19, %v379_v6  ;;  %v911_v6 = vld [vmem:[#allocation8 + $0x70] sm:$0xff] }
 0x3b4   :  { %v922_v9 = vpop.permute.xlu0 %921 }
 0x3b5   :  { %412 = vst.msk [vmem:[#allocation11 + $0x8] sm:$0xff] %vm92_vm0, %v380_v8  ;;  %1246 = vmatmul.msk.f32.gmra.mxu2 %vm92_vm0, %v380_v8  ;;  %1276 = vmatpush.xpose.msk.msrb.mxu3 %vm269_vm14, %v922_v9 }
 0x3b7   :  { %541 = vmax.xlane.f32.xlu1 %v540_v10 }
 0x3b8   :  { %538 = vmax.xlane.f32.xlu2 %v537_v11 }
 0x3bc   :  { %v696_v51 = vpop.permute.xlu0 %695 }
 0x3c4   :  { %v918_v30 = vpop.permute.xlu0 %917 }
 0x3c5   :  { %v531_v13 = vpop.f32.mrf.mxu3 }
 0x3c6   :  { %v1827_v14 = vadd.f32 %v531_v13, %v472_v12  ;;  %v912_v13 = vld [vmem:[#allocation8 + $0x78] sm:$0xff] }
 0x3c8   :  { %v543_v15 = vsel %vm92_vm0, %v1827_v14, -inf }
 0x3c9   :  { %544 = vmax.xlane.f32.xlu2 %v543_v15 }
 0x3d7   :  { %v350_v16 = vpop.xlane.xlu1 %349 }
 0x3d8   :  { %1376 = vrcp.f32 %v350_v16  ;;  %v407_v20 = vand.u32 2147483648, %v350_v16  ;;  %v405_v25 = vand.u32 2147483647, %v350_v16  ;;  %vm401_vm9 = vweird.f32 %v350_v16 }
 0x3da   :  { %v347_v17 = vpop.xlane.xlu2 %346  ;;  %v408_v31 = vor.u32 1.1754944e-38, %v407_v20  ;;  %vm406_vm12 = vcmp.eq.f32.partialorder %v405_v25, 8.507059e+37  ;;  %v689_v20 = vld [vmem:[#allocation8 + $0x40] sm:$0xff] }
 0x3db   :  { %1378 = vrcp.f32 %v347_v17  ;;  %v392_v27 = vand.u32 2147483648, %v347_v17  ;;  %v390_v36 = vand.u32 2147483647, %v347_v17  ;;  %vm386_vm13 = vweird.f32 %v347_v17 }
 0x3dd   :  { %v393_v43 = vor.u32 1.1754944e-38, %v392_v27  ;;  %vm391_vm1 = vcmp.eq.f32.partialorder %v390_v36, 8.507059e+37 }
 0x3de   :  { %v1377_v18 = vpop.eup %1376 }
 0x3df   :  { %v397_v21 = vmul.f32 %v1377_v18, %v350_v16  ;;  %vm402_vm8 = vweird.f32 %v1377_v18 }
 0x3e0   :  { %vm403_vm11 = vmor %vm401_vm9, %vm402_vm8 }
 0x3e1   :  { %v1379_v22 = vpop.eup %1378  ;;  %v398_v19 = vsub.f32 1.0, %v397_v21 }
 0x3e2   :  { %v382_v23 = vmul.f32 %v1379_v22, %v347_v17  ;;  %vm387_vm10 = vweird.f32 %v1379_v22  ;;  %v694_v49 = vpop.permute.xlu2 %693 }
 0x3e3   :  { %v399_v24 = vmul.f32 %v1377_v18, %v398_v19  ;;  %vm388_vm15 = vmor %vm386_vm13, %vm387_vm10 }
 0x3e4   :  { %v383_v26 = vsub.f32 1.0, %v382_v23  ;;  %v690_v23 = vld [vmem:[#allocation8 + $0x48] sm:$0xff] }
 0x3e5   :  { %v400_v28 = vadd.f32 %v1377_v18, %v399_v24  ;;  %v691_v24 = vld [vmem:[#allocation8 + $0x50] sm:$0xff] }
 0x3e6   :  { %v384_v32 = vmul.f32 %v1379_v22, %v383_v26 }
 0x3e7   :  { %v404_v40 = vsel %vm403_vm11, %v1377_v18, %v400_v28 }
 0x3e8   :  { %v385_v41 = vadd.f32 %v1379_v22, %v384_v32  ;;  %v409_v42 = vsel %vm406_vm12, %v408_v31, %v404_v40 }
 0x3e9   :  { %v410_v45 = vmul.f32 %v1792_v33, %v409_v42  ;;  %v692_v42 = vld [vmem:[#allocation8 + $0x58] sm:$0xff] }
 0x3ea   :  { %v389_v46 = vsel %vm388_vm15, %v1379_v22, %v385_v41  ;;  %v916_v52 = vpop.permute.xlu2 %915 }
 0x3eb   :  { %v394_v47 = vsel %vm391_vm1, %v393_v43, %v389_v46  ;;  %414 = vst.msk [vmem:[#allocation11 + $0x18] sm:$0xff] %vm92_vm0, %v410_v45 }
 0x3ec   :  { %v395_v48 = vmul.f32 %v1794_v35, %v394_v47 }
 0x3ee   :  { %413 = vst.msk [vmem:[#allocation11 + $0x10] sm:$0xff] %vm92_vm0, %v395_v48  ;;  %1247 = vmatmul.msk.f32.gmra.mxu2 %vm92_vm0, %v395_v48 }
 0x3ef   :  { %v914_v50 = vpop.permute.xlu1 %913  ;;  %v536_v55 = vpop.xlane.xlu0 %535 }
 0x3f0   :  { %1277 = vmatmul.msk.f32.vlgmr.msrb.gmra.mxu3 %vm269_vm14, %v914_v50  ;;  %v546_v58 = vsub.f32 %v1801_v44, %v536_v55 }
 0x3f2   :  { %v700_v53 = vpop.permute.xlu2 %699  ;;  %v550_v60 = vmul.f32 1.442695, %v546_v58 }
 0x3f4   :  { %1380 = vpow2.f32 %v550_v60 }
 0x3f6   :  { %1248 = vmatmul.msk.f32.gmra.mxu2 %vm92_vm0, %v410_v45 }
 0x3f7   :  { %v698_v33 = vpop.permute.xlu1 %697 }
 0x3f8   :  { %1278 = vmatmul.msk.f32.gmra.mxu3 %vm269_vm14, %v916_v52 }
 0x3fa   :  { %v1863_v8 = vpop.eup %1380 }
 0x3fb   :  { %v558_v12 = vsel %vm92_vm0, %v1863_v8, 0.0 }
 0x3fe   :  { %1265 = vmatmul.msk.f32.vlgmr.msra.gmra.mxu2 %vm269_vm14, %v694_v49 }
 0x3ff   :  { %v920_v35 = vpop.permute.xlu1 %919 }
 0x400   :  { %1279 = vmatmul.msk.f32.gmra.mxu3 %vm269_vm14, %v918_v30 }
 0x406   :  { %1266 = vmatmul.msk.f32.gmra.mxu2 %vm269_vm14, %v696_v51 }
 0x408   :  { %1280 = vmatmul.msk.f32.gmra.mxu3 %vm269_vm14, %v920_v35 }
 0x40e   :  { %1267 = vmatmul.msk.f32.gmra.mxu2 %vm269_vm14, %v698_v33 }
 0x416   :  { %1268 = vmatmul.msk.f32.gmra.mxu2 %vm269_vm14, %v700_v53 }
 0x42a   :  { %v542_v15 = vpop.xlane.xlu1 %541 }
 0x42b   :  { %v539_v63 = vpop.xlane.xlu2 %538  ;;  %v548_v21 = vsub.f32 %v1815_v5, %v542_v15 }
 0x42c   :  { %v547_v2 = vsub.f32 %v1817_v7, %v539_v63 }
 0x42d   :  { %v554_v25 = vmul.f32 1.442695, %v548_v21 }
 0x42e   :  { %v552_v44 = vmul.f32 1.442695, %v547_v2 }
 0x430   :  { %v1845_v34 = vpop.f32.mrf.mxu2  ;;  %1382 = vpow2.f32 %v552_v44 }
 0x431   :  { %1384 = vpow2.f32 %v554_v25 }
 0x436   :  { %v1871_v16 = vpop.eup %1382 }
 0x437   :  { %v561_v22 = vsel %vm92_vm0, %v1871_v16, 0.0  ;;  %v1892_v47 = vpop.eup %1384 }
 0x438   :  { %v1847_v29 = vpop.f32.mrf.mxu2 }
 0x43c   :  { %v545_v27 = vpop.xlane.xlu2 %544 }
 0x43d   :  { %v549_v36 = vsub.f32 %v1827_v14, %v545_v27  ;;  %v564_v14 = vsel %vm92_vm0, %v1892_v47, 0.0 }
 0x43f   :  { %v556_v43 = vmul.f32 1.442695, %v549_v36 }
 0x441   :  { %1386 = vpow2.f32 %v556_v43 }
 0x447   :  { %v1898_v49 = vpop.eup %1386 }
 0x448   :  { %v567_v50 = vsel %vm92_vm0, %v1898_v49, 0.0 }
 0x471   :  { %v1849_v54 = vpop.f32.mrf.mxu2 }
 0x473   :  { %v962_v56 = vpop.f32.mrf.mxu3 }
 0x474   :  { %v1851_v57 = vadd.f32 %v962_v56, %v909_v37 }
 0x476   :  { %v974_v59 = vsel %vm92_vm0, %v1851_v57, -inf }
 0x477   :  { %975 = vmax.xlane.f32.xlu1 %v974_v59 }
 0x479   :  { %v1856_v61 = vpop.f32.mrf.mxu2 }
 0x47b   :  { %v965_v0 = vpop.f32.mrf.mxu3 }
 0x47c   :  { %v1858_v1 = vadd.f32 %v965_v0, %v910_v62 }
 0x47e   :  { %v977_v3 = vsel %vm92_vm0, %v1858_v1, -inf }
 0x47f   :  { %978 = vmax.xlane.f32.xlu0 %v977_v3 }
 0x481   :  { %v742_v4 = vpop.f32.mrf.mxu2 }
 0x482   :  { %v1880_v28 = vadd.f32 %v742_v4, %v689_v20 }
 0x483   :  { %v968_v9 = vpop.f32.mrf.mxu3 }
 0x484   :  { %v1865_v10 = vadd.f32 %v968_v9, %v911_v6  ;;  %v754_v40 = vsel %vm92_vm0, %v1880_v28, -inf }
 0x486   :  { %v980_v11 = vsel %vm92_vm0, %v1865_v10, -inf }
 0x487   :  { %981 = vmax.xlane.f32.xlu2 %v980_v11  ;;  %559 = vadd.xlane.f32.xlu0 %v558_v12 }
 0x489   :  { %v745_v7 = vpop.f32.mrf.mxu2 }
 0x48a   :  { %v1882_v31 = vadd.f32 %v745_v7, %v690_v23 }
 0x48b   :  { %v971_v17 = vpop.f32.mrf.mxu3 }
 0x48c   :  { %v1873_v18 = vadd.f32 %v971_v17, %v912_v13  ;;  %v757_v41 = vsel %vm92_vm0, %v1882_v31, -inf }
 0x48e   :  { %v983_v19 = vsel %vm92_vm0, %v1873_v18, -inf }
 0x48f   :  { %562 = vadd.xlane.f32.xlu0 %v561_v22  ;;  %984 = vmax.xlane.f32.xlu2 %v983_v19 }
 0x491   :  { %v748_v26 = vpop.f32.mrf.mxu2 }
 0x492   :  { %v749_v32 = vadd.f32 %v748_v26, %v691_v24 }
 0x494   :  { %v760_v5 = vsel %vm92_vm0, %v749_v32, -inf }
 0x495   :  { %761 = vmax.xlane.f32.xlu1 %v760_v5 }
 0x497   :  { %755 = vmax.xlane.f32.xlu0 %v754_v40  ;;  %758 = vmax.xlane.f32.xlu2 %v757_v41 }
 0x499   :  { %v751_v45 = vpop.f32.mrf.mxu2 }
 0x49a   :  { %v1890_v46 = vadd.f32 %v751_v45, %v692_v42 }
 0x49c   :  { %v763_v48 = vsel %vm92_vm0, %v1890_v46, -inf }
 0x49d   :  { %764 = vmax.xlane.f32.xlu1 %v763_v48 }
 0x49f   :  { %565 = vadd.xlane.f32.xlu2 %v564_v14 }
 0x4a7   :  { %568 = vadd.xlane.f32.xlu2 %v567_v50 }
 0x4ab   :  { %1327 = vrot.lane.b32.xlu0 %v1715_v38, %s1597_s29 }
 0x4b6   :  { %1322 = vrot.lane.b32.xlu1 %v1736_v39, %s1597_s29 }
 0x4ea   :  { %v976_v51 = vpop.xlane.xlu1 %975 }
 0x4eb   :  { %v986_v52 = vsub.f32 %v1851_v57, %v976_v51 }
 0x4ed   :  { %v990_v33 = vmul.f32 1.442695, %v986_v52 }
 0x4ef   :  { %1388 = vpow2.f32 %v990_v33 }
 0x4f2   :  { %v979_v30 = vpop.xlane.xlu0 %978 }
 0x4f3   :  { %v987_v22 = vsub.f32 %v1858_v1, %v979_v30 }
 0x4f5   :  { %v1905_v35 = vpop.eup %1388 }
 0x4f6   :  { %v998_v53 = vsel %vm92_vm0, %v1905_v35, 0.0 }
 0x4f7   :  { %999 = vadd.xlane.f32.xlu0 %v998_v53 }
 0x4fa   :  { %v982_v37 = vpop.xlane.xlu2 %981  ;;  %v560_v55 = vpop.xlane.xlu0 %559 }
 0x4fb   :  { %1390 = vrcp.f32 %v560_v55  ;;  %v581_v57 = vand.u32 2147483648, %v560_v55  ;;  %v579_v0 = vand.u32 2147483647, %v560_v55  ;;  %vm575_vm3 = vweird.f32 %v560_v55 }
 0x4fc   :  { %v988_v25 = vsub.f32 %v1865_v10, %v982_v37 }
 0x4fd   :  { %v582_v4 = vor.u32 1.1754944e-38, %v581_v57  ;;  %vm580_vm5 = vcmp.eq.f32.partialorder %v579_v0, 8.507059e+37 }
 0x501   :  { %v1391_v56 = vpop.eup %1390 }
 0x502   :  { %v571_v58 = vmul.f32 %v1391_v56, %v560_v55  ;;  %v563_v59 = vpop.xlane.xlu0 %562  ;;  %v1909_v60 = vpop.xlane.xlu2 %984  ;;  %vm576_vm2 = vweird.f32 %v1391_v56 }
 0x503   :  { %1392 = vrcp.f32 %v563_v59  ;;  %vm577_vm4 = vmor %vm575_vm3, %vm576_vm2  ;;  %v596_v27 = vand.u32 2147483648, %v563_v59  ;;  %vm590_vm7 = vweird.f32 %v563_v59  ;;  %v989_v48 = vsub.f32 %v1873_v18, %v1909_v60 }
 0x504   :  { %v572_v62 = vsub.f32 1.0, %v571_v58 }
 0x505   :  { %v996_v52 = vmul.f32 1.442695, %v989_v48 }
 0x506   :  { %v573_v63 = vmul.f32 %v1391_v56, %v572_v62 }
 0x508   :  { %v574_v2 = vadd.f32 %v1391_v56, %v573_v63  ;;  %v762_v3 = vpop.xlane.xlu1 %761 }
 0x509   :  { %v1393_v44 = vpop.eup %1392  ;;  %v768_v6 = vsub.f32 %v749_v32, %v762_v3  ;;  %v597_v32 = vor.u32 1.1754944e-38, %v596_v27 }
 0x50a   :  { %v586_v9 = vmul.f32 %v1393_v44, %v563_v59  ;;  %v756_v11 = vpop.xlane.xlu0 %755  ;;  %v759_v12 = vpop.xlane.xlu2 %758  ;;  %v578_v7 = vsel %vm577_vm4, %v1391_v56, %v574_v2  ;;  %vm591_vm6 = vweird.f32 %v1393_v44 }
 0x50b   :  { %v774_v13 = vmul.f32 1.442695, %v768_v6  ;;  %v766_v15 = vsub.f32 %v1880_v28, %v756_v11  ;;  %v767_v17 = vsub.f32 %v1882_v31, %v759_v12  ;;  %v583_v21 = vsel %vm580_vm5, %v582_v4, %v578_v7  ;;  %vm592_vm8 = vmor %vm590_vm7, %vm591_vm6 }
 0x50c   :  { %v587_v19 = vsub.f32 1.0, %v586_v9  ;;  %v1915_v20 = vmul.f32 %v1863_v8, %v583_v21  ;;  %v594_v28 = vand.u32 2147483647, %v563_v59  ;;  %v992_v31 = vmul.f32 1.442695, %v987_v22 }
 0x50d   :  { %1394 = vpow2.f32 %v774_v13  ;;  %v770_v23 = vmul.f32 1.442695, %v766_v15  ;;  %v772_v24 = vmul.f32 1.442695, %v767_v17  ;;  %v994_v8 = vmul.f32 1.442695, %v988_v25 }
 0x50e   :  { %v588_v26 = vmul.f32 %v1393_v44, %v587_v19  ;;  %631 = vst.msk [vmem:[#allocation11 + $0x20] sm:$0xff] %vm92_vm0, %v1915_v20  ;;  %vm595_vm9 = vcmp.eq.f32.partialorder %v594_v28, 8.507059e+37 }
 0x50f   :  { %1396 = vpow2.f32 %v770_v23 }
 0x510   :  { %1398 = vpow2.f32 %v772_v24  ;;  %v589_v1 = vadd.f32 %v1393_v44, %v588_v26  ;;  %v765_v60 = vpop.xlane.xlu1 %764 }
 0x512   :  { %v566_v5 = vpop.xlane.xlu2 %565  ;;  %v593_v36 = vsel %vm592_vm8, %v1393_v44, %v589_v1 }
 0x513   :  { %v1920_v40 = vpop.eup %1394  ;;  %1400 = vrcp.f32 %v566_v5  ;;  %v598_v41 = vsel %vm595_vm9, %v597_v32, %v593_v36  ;;  %v611_v37 = vand.u32 2147483648, %v566_v5  ;;  %v609_v58 = vand.u32 2147483647, %v566_v5 }
 0x514   :  { %1402 = vpow2.f32 %v992_v31  ;;  %v784_v10 = vsel %vm92_vm0, %v1920_v40, 0.0  ;;  %v1927_v43 = vmul.f32 %v1871_v16, %v598_v41  ;;  %vm605_vm11 = vweird.f32 %v566_v5 }
 0x515   :  { %v1924_v42 = vpop.eup %1396  ;;  %785 = vadd.xlane.f32.xlu0 %v784_v10  ;;  %1404 = vpow2.f32 %v994_v8  ;;  %v612_v63 = vor.u32 1.1754944e-38, %v611_v37  ;;  %vm610_vm13 = vcmp.eq.f32.partialorder %v609_v58, 8.507059e+37 }
 0x516   :  { %v1929_v45 = vpop.eup %1398  ;;  %v778_v14 = vsel %vm92_vm0, %v1924_v42, 0.0  ;;  %632 = vst.msk [vmem:[#allocation11 + $0x28] sm:$0xff] %vm92_vm0, %v1927_v43 }
 0x517   :  { %v781_v50 = vsel %vm92_vm0, %v1929_v45, 0.0  ;;  %779 = vadd.xlane.f32.xlu2 %v778_v14 }
 0x518   :  { %782 = vadd.xlane.f32.xlu1 %v781_v50 }
 0x519   :  { %v1401_v51 = vpop.eup %1400 }
 0x51a   :  { %v1939_v16 = vpop.eup %1402  ;;  %v601_v33 = vmul.f32 %v1401_v51, %v566_v5  ;;  %v569_v30 = vpop.xlane.xlu2 %568  ;;  %vm606_vm10 = vweird.f32 %v1401_v51 }
 0x51b   :  { %1406 = vrcp.f32 %v569_v30  ;;  %v1941_v53 = vpop.eup %1404  ;;  %v1001_v55 = vsel %vm92_vm0, %v1939_v16, 0.0  ;;  %vm607_vm12 = vmor %vm605_vm11, %vm606_vm10  ;;  %v626_v9 = vand.u32 2147483648, %v569_v30  ;;  %v624_v12 = vand.u32 2147483647, %v569_v30 }
 0x51c   :  { %v602_v18 = vsub.f32 1.0, %v601_v33  ;;  %1408 = vpow2.f32 %v996_v52  ;;  %v1004_v59 = vsel %vm92_vm0, %v1941_v53, 0.0  ;;  %vm620_vm1 = vweird.f32 %v569_v30 }
 0x51d   :  { %v627_v17 = vor.u32 1.1754944e-38, %v626_v9  ;;  %vm625_vm3 = vcmp.eq.f32.partialorder %v624_v12, 8.507059e+37 }
 0x51e   :  { %v603_v56 = vmul.f32 %v1401_v51, %v602_v18 }
 0x51f   :  { %1002 = vadd.xlane.f32.xlu2 %v1001_v55 }
 0x520   :  { %1005 = vadd.xlane.f32.xlu1 %v1004_v59  ;;  %v604_v62 = vadd.f32 %v1401_v51, %v603_v56 }
 0x521   :  { %v1407_v57 = vpop.eup %1406 }
 0x522   :  { %v616_v0 = vmul.f32 %v1407_v57, %v569_v30  ;;  %v608_v2 = vsel %vm607_vm12, %v1401_v51, %v604_v62  ;;  %v1947_v44 = vpop.eup %1408  ;;  %vm621_vm15 = vweird.f32 %v1407_v57 }
 0x523   :  { %v613_v3 = vsel %vm610_vm13, %v612_v63, %v608_v2  ;;  %v1007_v7 = vsel %vm92_vm0, %v1947_v44, 0.0  ;;  %vm622_vm2 = vmor %vm620_vm1, %vm621_vm15 }
 0x524   :  { %v617_v4 = vsub.f32 1.0, %v616_v0  ;;  %v614_v6 = vmul.f32 %v1892_v47, %v613_v3  ;;  %v1328_v47 = vpop.permute.xlu0 %1327 }
 0x525   :  { %v1329_v25 = vunpack.i.l.bf16 %v1328_v47  ;;  %v1330_v26 = vunpack.i.h.bf16 %v1328_v47 }
 0x526   :  { %v618_v11 = vmul.f32 %v1407_v57, %v617_v4  ;;  %633 = vst.msk [vmem:[#allocation11 + $0x30] sm:$0xff] %vm92_vm0, %v614_v6 }
 0x528   :  { %1008 = vadd.xlane.f32.xlu1 %v1007_v7  ;;  %v1323_v13 = vpop.permute.xlu1 %1322  ;;  %v619_v15 = vadd.f32 %v1407_v57, %v618_v11 }
 0x529   :  { %1347 = vrot.lane.b32.xlu0 %v1715_v38, %s1598_s30  ;;  %v1324_v21 = vunpack.i.l.bf16 %v1323_v13  ;;  %v1325_v19 = vunpack.i.h.bf16 %v1323_v13 }
 0x52a   :  { %v623_v22 = vsel %vm622_vm2, %v1407_v57, %v619_v15 }
 0x52b   :  { %671 = vmatpush.msrb.mxu0 %v1324_v21  ;;  %v628_v23 = vsel %vm625_vm3, %v627_v17, %v623_v22 }
 0x52c   :  { %v629_v24 = vmul.f32 %v1898_v49, %v628_v23  ;;  %v769_v49 = vsub.f32 %v1890_v46, %v765_v60 }
 0x52d   :  { %672 = vmatpush.msrb.mxu0 %v1325_v19 }
 0x52e   :  { %634 = vst.msk [vmem:[#allocation11 + $0x38] sm:$0xff] %vm92_vm0, %v629_v24  ;;  %v776_v27 = vmul.f32 1.442695, %v769_v49 }
 0x52f   :  { %673 = vmatpush.msrb.mxu0 %v1329_v25 }
 0x530   :  { %1410 = vpow2.f32 %v776_v27 }
 0x531   :  { %674 = vmatpush.msrb.mxu0 %v1330_v26 }
 0x532   :  { %1257 = vmatmul.msk.f32.vlgmr.msrb.gmra.mxu0 %vm92_vm0, %v1915_v20 }
 0x536   :  { %v1966_v20 = vpop.eup %1410 }
 0x537   :  { %1332 = vrot.lane.b32.xlu2 %v1736_v39, %s1599_s8  ;;  %v787_v31 = vsel %vm92_vm0, %v1966_v20, 0.0 }
 0x53a   :  { %1258 = vmatmul.msk.f32.gmra.mxu0 %vm92_vm0, %v1927_v43 }
 0x53f   :  { %1337 = vrot.lane.b32.xlu2 %v1736_v39, %s1598_s30 }
 0x542   :  { %1259 = vmatmul.msk.f32.gmra.mxu0 %vm92_vm0, %v614_v6 }
 0x547   :  { %1342 = vrot.lane.b32.xlu2 %v1715_v38, %s1599_s8 }
 0x54a   :  { %1260 = vmatmul.msk.f32.gmra.mxu0 %vm92_vm0, %v629_v24 }
 0x56a   :  { %v1000_v28 = vpop.xlane.xlu0 %999 }
 0x56b   :  { %1412 = vrcp.f32 %v1000_v28  ;;  %v1021_v32 = vand.u32 2147483648, %v1000_v28  ;;  %v1019_v38 = vand.u32 2147483647, %v1000_v28  ;;  %vm1015_vm5 = vweird.f32 %v1000_v28 }
 0x56d   :  { %v1022_v46 = vor.u32 1.1754944e-38, %v1021_v32  ;;  %vm1020_vm7 = vcmp.eq.f32.partialorder %v1019_v38, 8.507059e+37 }
 0x570   :  { %788 = vadd.xlane.f32.xlu2 %v787_v31 }
 0x571   :  { %v1413_v1 = vpop.eup %1412 }
 0x572   :  { %v1011_v39 = vmul.f32 %v1413_v1, %v1000_v28  ;;  %vm1016_vm4 = vweird.f32 %v1413_v1 }
 0x573   :  { %vm1017_vm6 = vmor %vm1015_vm5, %vm1016_vm4 }
 0x574   :  { %v1012_v8 = vsub.f32 1.0, %v1011_v39 }
 0x576   :  { %v1013_v5 = vmul.f32 %v1413_v1, %v1012_v8 }
 0x578   :  { %v1014_v36 = vadd.f32 %v1413_v1, %v1013_v5 }
 0x57a   :  { %v1018_v10 = vsel %vm1017_vm6, %v1413_v1, %v1014_v36 }
 0x57b   :  { %v1023_v41 = vsel %vm1020_vm7, %v1022_v46, %v1018_v10 }
 0x57c   :  { %v1971_v43 = vmul.f32 %v1905_v35, %v1023_v41 }
 0x57e   :  { %1071 = vst.msk [vmem:[#allocation11 + $0x60] sm:$0xff] %vm92_vm0, %v1971_v43 }
 0x588   :  { %v786_v48 = vpop.xlane.xlu0 %785 }
 0x589   :  { %1414 = vrcp.f32 %v786_v48  ;;  %v831_v35 = vand.u32 2147483648, %v786_v48  ;;  %v829_v59 = vand.u32 2147483647, %v786_v48  ;;  %vm825_vm9 = vweird.f32 %v786_v48 }
 0x58a   :  { %v780_v14 = vpop.xlane.xlu2 %779 }
 0x58b   :  { %1416 = vrcp.f32 %v780_v14  ;;  %v783_v50 = vpop.xlane.xlu1 %782  ;;  %v799_v57 = vand.u32 2147483647, %v780_v14  ;;  %v801_v63 = vand.u32 2147483648, %v780_v14  ;;  %v832_v4 = vor.u32 1.1754944e-38, %v831_v35 }
 0x58c   :  { %1418 = vrcp.f32 %v783_v50  ;;  %vm795_vm11 = vweird.f32 %v780_v14  ;;  %v816_v9 = vand.u32 2147483648, %v783_v50  ;;  %v814_v12 = vand.u32 2147483647, %v783_v50 }
 0x58d   :  { %vm830_vm13 = vcmp.eq.f32.partialorder %v829_v59, 8.507059e+37  ;;  %vm800_vm1 = vcmp.eq.f32.partialorder %v799_v57, 8.507059e+37  ;;  %v802_v17 = vor.u32 1.1754944e-38, %v801_v63  ;;  %vm810_vm3 = vweird.f32 %v783_v50 }
 0x58e   :  { %v817_v31 = vor.u32 1.1754944e-38, %v816_v9  ;;  %vm2001_vm4 = vcmp.eq.f32.partialorder %v814_v12, 8.507059e+37 }
 0x58f   :  { %v1415_v51 = vpop.eup %1414 }
 0x590   :  { %v821_v52 = vmul.f32 %v1415_v51, %v786_v48  ;;  %vm826_vm8 = vweird.f32 %v1415_v51 }
 0x591   :  { %v1417_v33 = vpop.eup %1416  ;;  %vm827_vm12 = vmor %vm825_vm9, %vm826_vm8 }
 0x592   :  { %v1975_v30 = vpop.eup %1418  ;;  %v822_v18 = vsub.f32 1.0, %v821_v52  ;;  %v791_v37 = vmul.f32 %v1417_v33, %v780_v14  ;;  %v1977_v55 = vpop.xlane.xlu2 %1002  ;;  %vm796_vm10 = vweird.f32 %v1417_v33 }
 0x593   :  { %v806_v56 = vmul.f32 %v1975_v30, %v783_v50  ;;  %1420 = vrcp.f32 %v1977_v55  ;;  %v1981_v58 = vpop.xlane.xlu1 %1005  ;;  %vm1985_vm15 = vmor %vm795_vm11, %vm796_vm10  ;;  %vm811_vm2 = vweird.f32 %v1975_v30  ;;  %v1034_v36 = vand.u32 2147483647, %v1977_v55 }
 0x594   :  { %v823_v60 = vmul.f32 %v1415_v51, %v822_v18  ;;  %v792_v62 = vsub.f32 1.0, %v791_v37  ;;  %1422 = vrcp.f32 %v1981_v58  ;;  %vm812_vm5 = vmor %vm810_vm3, %vm811_vm2  ;;  %vm1030_vm7 = vweird.f32 %v1977_v55 }
 0x595   :  { %v807_v0 = vsub.f32 1.0, %v806_v56  ;;  %v1051_v41 = vand.u32 2147483648, %v1981_v58  ;;  %v1049_v50 = vand.u32 2147483647, %v1981_v58  ;;  %vm1045_vm10 = vweird.f32 %v1981_v58 }
 0x596   :  { %v793_v2 = vmul.f32 %v1417_v33, %v792_v62  ;;  %v824_v3 = vadd.f32 %v1415_v51, %v823_v60  ;;  %vm1035_vm11 = vcmp.eq.f32.partialorder %v1034_v36, 8.507059e+37 }
 0x597   :  { %v808_v6 = vmul.f32 %v1975_v30, %v807_v0  ;;  %v1052_v37 = vor.u32 1.1754944e-38, %v1051_v41 }
 0x598   :  { %v794_v11 = vadd.f32 %v1417_v33, %v793_v2  ;;  %v828_v7 = vsel %vm827_vm12, %v1415_v51, %v824_v3 }
 0x599   :  { %v1421_v13 = vpop.eup %1420  ;;  %v833_v21 = vsel %vm830_vm13, %v832_v4, %v828_v7  ;;  %v809_v24 = vadd.f32 %v1975_v30, %v808_v6  ;;  %vm1050_vm13 = vcmp.eq.f32.partialorder %v1049_v50, 8.507059e+37 }
 0x59a   :  { %v1423_v47 = vpop.eup %1422  ;;  %v1026_v22 = vmul.f32 %v1421_v13, %v1977_v55  ;;  %v1333_v19 = vpop.permute.xlu2 %1332  ;;  %v798_v23 = vsel %vm1985_vm15, %v1417_v33, %v794_v11  ;;  %v1995_v25 = vmul.f32 %v1920_v40, %v833_v21  ;;  %v1036_v40 = vand.u32 2147483648, %v1977_v55 }
 0x59b   :  { %v1041_v26 = vmul.f32 %v1423_v47, %v1981_v58  ;;  %v1998_v49 = vpop.xlane.xlu1 %1008  ;;  %v1334_v27 = vunpack.i.l.bf16 %v1333_v19  ;;  %v803_v28 = vsel %vm800_vm1, %v802_v17, %v798_v23  ;;  %v1335_v32 = vunpack.i.h.bf16 %v1333_v19 }
 0x59c   :  { %v1027_v1 = vsub.f32 1.0, %v1026_v22  ;;  %1424 = vrcp.f32 %v1998_v49  ;;  %853 = vst.msk [vmem:[#allocation11 + $0x50] sm:$0xff] %vm92_vm0, %v1995_v25  ;;  %v2009_v5 = vmul.f32 %v1924_v42, %v803_v28  ;;  %vm1031_vm6 = vweird.f32 %v1421_v13 }
 0x59d   :  { %v1042_v8 = vsub.f32 1.0, %v1041_v26  ;;  %891 = vmatpush.msrb.mxu1 %v1334_v27  ;;  %v813_v46 = vsel %vm812_vm5, %v1975_v30, %v809_v24  ;;  %vm1046_vm8 = vweird.f32 %v1423_v47  ;;  %v1037_v51 = vor.u32 1.1754944e-38, %v1036_v40  ;;  %vm1032_vm9 = vmor %vm1030_vm7, %vm1031_vm6 }
 0x59e   :  { %v1028_v38 = vmul.f32 %v1421_v13, %v1027_v1  ;;  %851 = vst.msk [vmem:[#allocation11 + $0x40] sm:$0xff] %vm92_vm0, %v2009_v5  ;;  %v818_v42 = vsel %vm2001_vm4, %v817_v31, %v813_v46  ;;  %vm1047_vm12 = vmor %vm1045_vm10, %vm1046_vm8  ;;  %v1066_v63 = vand.u32 2147483648, %v1998_v49  ;;  %v1064_v4 = vand.u32 2147483647, %v1998_v49 }
 0x59f   :  { %v1043_v10 = vmul.f32 %v1423_v47, %v1042_v8  ;;  %892 = vmatpush.msrb.mxu1 %v1335_v32  ;;  %v819_v14 = vmul.f32 %v1929_v45, %v818_v42  ;;  %v1348_v45 = vpop.permute.xlu0 %1347  ;;  %vm1060_vm1 = vweird.f32 %v1998_v49  ;;  %vm1185_vm8 = vcmask 195584  }
 0x5a0   :  { %v1029_v48 = vadd.f32 %v1421_v13, %v1028_v38  ;;  %v1349_v3 = vunpack.i.l.bf16 %v1348_v45  ;;  %v1067_v9 = vor.u32 1.1754944e-38, %v1066_v63  ;;  %vm1065_vm3 = vcmp.eq.f32.partialorder %v1064_v4, 8.507059e+37 }
 0x5a1   :  { %v1044_v52 = vadd.f32 %v1423_v47, %v1043_v10  ;;  %852 = vst.msk [vmem:[#allocation11 + $0x48] sm:$0xff] %vm92_vm0, %v819_v14 }
 0x5a2   :  { %v1425_v33 = vpop.eup %1424  ;;  %v1338_v30 = vpop.permute.xlu2 %1337  ;;  %v1033_v18 = vsel %vm1032_vm9, %v1421_v13, %v1029_v48  ;;  %vm1180_vm9 = vcmask 130048  }
 0x5a3   :  { %v1056_v55 = vmul.f32 %v1425_v33, %v1998_v49  ;;  %v1339_v35 = vunpack.i.l.bf16 %v1338_v30  ;;  %v1038_v56 = vsel %vm1035_vm11, %v1037_v51, %v1033_v18  ;;  %v1048_v60 = vsel %vm1047_vm12, %v1423_v47, %v1044_v52 }
 0x5a4   :  { %v1039_v59 = vmul.f32 %v1939_v16, %v1038_v56  ;;  %v1340_v57 = vunpack.i.h.bf16 %v1338_v30  ;;  %v1053_v58 = vsel %vm1050_vm13, %v1052_v37, %v1048_v60  ;;  %vm1061_vm15 = vweird.f32 %v1425_v33 }
 0x5a5   :  { %v1057_v62 = vsub.f32 1.0, %v1056_v55  ;;  %1111 = vmatpush.msra.mxu0 %v1339_v35  ;;  %v1054_v0 = vmul.f32 %v1941_v53, %v1053_v58  ;;  %v1350_v16 = vunpack.i.h.bf16 %v1348_v45  ;;  %vm1062_vm2 = vmor %vm1060_vm1, %vm1061_vm15 }
 0x5a6   :  { %1072 = vst.msk [vmem:[#allocation11 + $0x68] sm:$0xff] %vm92_vm0, %v1039_v59 }
 0x5a7   :  { %v1058_v2 = vmul.f32 %v1425_v33, %v1057_v62  ;;  %1112 = vmatpush.msra.mxu0 %v1340_v57  ;;  %1073 = vst.msk [vmem:[#allocation11 + $0x70] sm:$0xff] %vm92_vm0, %v1054_v0 }
 0x5a9   :  { %1113 = vmatpush.msra.mxu0 %v1349_v3  ;;  %v1059_v6 = vadd.f32 %v1425_v33, %v1058_v2 }
 0x5aa   :  { %v1343_v11 = vpop.permute.xlu2 %1342 }
 0x5ab   :  { %1114 = vmatpush.msra.mxu0 %v1350_v16  ;;  %v1344_v12 = vunpack.i.l.bf16 %v1343_v11  ;;  %v1063_v7 = vsel %vm1062_vm2, %v1425_v33, %v1059_v6  ;;  %v1345_v13 = vunpack.i.h.bf16 %v1343_v11 }
 0x5ac   :  { %1281 = vmatmul.msk.f32.vlgmr.msra.gmra.mxu0 %vm92_vm0, %v1971_v43  ;;  %v1068_v53 = vsel %vm1065_vm3, %v1067_v9, %v1063_v7 }
 0x5ad   :  { %893 = vmatpush.msrb.mxu1 %v1344_v12  ;;  %v1069_v15 = vmul.f32 %v1947_v44, %v1068_v53 }
 0x5af   :  { %v676_v17 = vpop.f32.mrf.mxu0  ;;  %894 = vmatpush.msrb.mxu1 %v1345_v13  ;;  %1074 = vst.msk [vmem:[#allocation11 + $0x78] sm:$0xff] %vm92_vm0, %v1069_v15 }
 0x5b0   :  { %1269 = vmatmul.msk.f32.vlgmr.msrb.gmra.mxu1 %vm92_vm0, %v2009_v5  ;;  %1132 = vrot.lane.b32.xlu1 %v676_v17, %s1585_s12 }
 0x5b4   :  { %1282 = vmatmul.msk.f32.gmra.mxu0 %vm92_vm0, %v1039_v59 }
 0x5b7   :  { %v679_v21 = vpop.f32.mrf.mxu0 }
 0x5b8   :  { %1270 = vmatmul.msk.f32.gmra.mxu1 %vm92_vm0, %v819_v14  ;;  %1134 = vrot.lane.b32.xlu0 %v679_v21, %s1585_s12 }
 0x5bc   :  { %1283 = vmatmul.msk.f32.gmra.mxu0 %vm92_vm0, %v1054_v0 }
 0x5bf   :  { %v682_v43 = vpop.f32.mrf.mxu0 }
 0x5c0   :  { %1271 = vmatmul.msk.f32.gmra.mxu1 %vm92_vm0, %v1995_v25  ;;  %1136 = vrot.lane.b32.xlu0 %v682_v43, %s1585_s12 }
 0x5c4   :  { %1284 = vmatmul.msk.f32.gmra.mxu0 %vm92_vm0, %v1069_v15 }
 0x5c7   :  { %v685_v44 = vpop.f32.mrf.mxu0 }
 0x5c8   :  { %1138 = vrot.lane.b32.xlu1 %v685_v44, %s1585_s12 }
 0x5e3   :  { %v789_v47 = vpop.xlane.xlu2 %788 }
 0x5e4   :  { %1426 = vrcp.f32 %v789_v47  ;;  %v846_v24 = vand.u32 2147483648, %v789_v47  ;;  %v844_v49 = vand.u32 2147483647, %v789_v47  ;;  %vm840_vm5 = vweird.f32 %v789_v47 }
 0x5e6   :  { %v847_v28 = vor.u32 1.1754944e-38, %v846_v24  ;;  %vm845_vm7 = vcmp.eq.f32.partialorder %v844_v49, 8.507059e+37 }
 0x5ea   :  { %v1427_v22 = vpop.eup %1426 }
 0x5eb   :  { %v836_v19 = vmul.f32 %v1427_v22, %v789_v47  ;;  %vm841_vm4 = vweird.f32 %v1427_v22 }
 0x5ec   :  { %vm842_vm6 = vmor %vm840_vm5, %vm841_vm4 }
 0x5ed   :  { %v837_v23 = vsub.f32 1.0, %v836_v19 }
 0x5ef   :  { %v838_v26 = vmul.f32 %v1427_v22, %v837_v23 }
 0x5f1   :  { %v839_v27 = vadd.f32 %v1427_v22, %v838_v26 }
 0x5f3   :  { %v843_v25 = vsel %vm842_vm6, %v1427_v22, %v839_v27 }
 0x5f4   :  { %v848_v31 = vsel %vm845_vm7, %v847_v28, %v843_v25 }
 0x5f5   :  { %v849_v1 = vmul.f32 %v1966_v20, %v848_v31 }
 0x5f7   :  { %854 = vst.msk [vmem:[#allocation11 + $0x58] sm:$0xff] %vm92_vm0, %v849_v1  ;;  %1272 = vmatmul.msk.f32.gmra.mxu1 %vm92_vm0, %v849_v1 }
 0x5f8   :  { %1219 = dma.vmem_to_hbm [thread:$0]  %s1212_s13, 2048, %s1214_s16, [#allocation12], %s1584_s11, %s1584_s11, %s1585_s12  }
 0x622   :  { %v1133_v10 = vpop.permute.xlu1 %1132 }
 0x623   :  { %v1176_v48 = vsel %vm269_vm14, %v1845_v34, %v1133_v10 }
 0x629   :  { %v1116_v39 = vpop.f32.mrf.mxu0 }
 0x62a   :  { %1164 = vrot.lane.b32.xlu1 %v1116_v39, %s1600_s9  ;;  %v1135_v46 = vpop.permute.xlu0 %1134 }
 0x62b   :  { %v1177_v30 = vsel %vm269_vm14, %v1847_v29, %v1135_v46 }
 0x62d   :  { %v896_v40 = vpop.f32.mrf.mxu1 }
 0x62e   :  { %1148 = vrot.lane.b32.xlu0 %v896_v40, %s1601_s10 }
 0x631   :  { %v1119_v8 = vpop.f32.mrf.mxu0 }
 0x632   :  { %v1137_v41 = vpop.permute.xlu0 %1136 }
 0x633   :  { %v1178_v35 = vsel %vm269_vm14, %v1849_v54, %v1137_v41 }
 0x635   :  { %v899_v32 = vpop.f32.mrf.mxu1 }
 0x636   :  { %1150 = vrot.lane.b32.xlu2 %v899_v32, %s1601_s10  ;;  %1166 = vrot.lane.b32.xlu0 %v1119_v8, %s1600_s9 }
 0x639   :  { %v1122_v38 = vpop.f32.mrf.mxu0 }
 0x63a   :  { %v1139_v42 = vpop.permute.xlu1 %1138 }
 0x63b   :  { %v1179_v29 = vsel %vm269_vm14, %v1856_v61, %v1139_v42 }
 0x63d   :  { %v902_v5 = vpop.f32.mrf.mxu1 }
 0x63e   :  { %1152 = vrot.lane.b32.xlu1 %v902_v5, %s1601_s10 }
 0x641   :  { %v1125_v20 = vpop.f32.mrf.mxu0 }
 0x646   :  { %1168 = vrot.lane.b32.xlu1 %v1122_v38, %s1600_s9 }
 0x674   :  { %v905_v36 = vpop.f32.mrf.mxu1 }
 0x675   :  { %1154 = vrot.lane.b32.xlu0 %v905_v36, %s1601_s10 }
 0x67d   :  { %1170 = vrot.lane.b32.xlu0 %v1125_v20, %s1600_s9 }
 0x690   :  { %v1151_v33 = vpop.permute.xlu2 %1150 }
 0x691   :  { %v1182_v18 = vsel %vm1180_vm9, %v1177_v30, %v1151_v33 }
 0x69c   :  { %v1165_v50 = vpop.permute.xlu1 %1164 }
 0x6a0   :  { %v1149_v14 = vpop.permute.xlu0 %1148 }
 0x6a1   :  { %v1181_v51 = vsel %vm1180_vm9, %v1176_v48, %v1149_v14 }
 0x6a2   :  { %v1186_v52 = vsel %vm1185_vm8, %v1181_v51, %v1165_v50 }
 0x6a3   :  { %1190 = vst.msk [vmem:[#allocation10] sm:$0xff] %vm92_vm0, %v1186_v52 }
 0x6a8   :  { %v1167_v37 = vpop.permute.xlu0 %1166 }
 0x6a9   :  { %v1187_v55 = vsel %vm1185_vm8, %v1182_v18, %v1167_v37 }
 0x6aa   :  { %1191 = vst.msk [vmem:[#allocation10 + $0x8] sm:$0xff] %vm92_vm0, %v1187_v55 }
 0x6b0   :  { %v1153_v34 = vpop.permute.xlu1 %1152 }
 0x6b1   :  { %v1183_v56 = vsel %vm1180_vm9, %v1178_v35, %v1153_v34 }
 0x6b8   :  { %v1169_v45 = vpop.permute.xlu1 %1168 }
 0x6b9   :  { %v1188_v59 = vsel %vm1185_vm8, %v1183_v56, %v1169_v45 }
 0x6ba   :  { %1192 = vst.msk [vmem:[#allocation10 + $0x10] sm:$0xff] %vm92_vm0, %v1188_v59 }
 0x6e7   :  { %v1155_v60 = vpop.permute.xlu0 %1154 }
 0x6e8   :  { %v1184_v62 = vsel %vm1180_vm9, %v1179_v29, %v1155_v60 }
 0x6ef   :  { %v1171_v54 = vpop.permute.xlu0 %1170 }
 0x6f0   :  { %v1189_v57 = vsel %vm1185_vm8, %v1184_v62, %v1171_v54 }
 0x6f1   :  { %1193 = vst.msk [vmem:[#allocation10 + $0x18] sm:$0xff] %vm92_vm0, %v1189_v57 }
 0x6f2   :  { %1206 = dma.vmem_to_hbm [thread:$0]  %s1199_s0, 512, %s1201_s19, [#allocation4], %s1584_s11, %s1584_s11, %s1585_s12  }
 0x6f3   :  { %1578 = dma.done.wait [#allocation4], 512  }
 0x6f4   :  { %1579 = vsyncadd [#allocation4], 4294966784 }
 0x6f5   :  { %1580 = dma.done.wait [#allocation12], 2048  }
 0x6f6   :  { %1581 = vsyncadd [#allocation12], 4294965248 }
 0x6f7   :  { %1228 = vsyncpa [#allocation3], 1 }
 0x6f8   :  { %1229 = vsyncpa [#allocation6], 1 }
 0x6f9   :  { %1230 = vsyncpa [#allocation9], 1 }
 0x6fa   :  { %1231 = vsyncpa [#allocation4], 1 }
 0x6fb   :  { %1232 = vsyncpa [#allocation12], 1 }

</bundles_post_ra>
